<compile_context>
chip_gen: v7x
topology: tpu7x:2x2x1
jax: 0.10.0
libtpu: 0.0.40
codegen_flags: <defaults>
</compile_context>

<pallas_src>
import functools

import jax
import jax.numpy as jnp
import numpy as np
from jax import lax
from jax.experimental import pallas as pl
from jax.experimental.pallas import tpu as pltpu


def _attention_kernel(x_ref, wqkv_ref, wproj_ref, bproj_ref, o_ref, *, num_heads, head_dim):
    # x_ref:     (1, N, C)  bf16 (all tokens for this batch element)
    # wqkv_ref:  (C, 3C)    bf16, pre-transposed (in, out); Q columns pre-scaled by D**-0.5
    # wproj_ref: (C, C)     bf16, pre-transposed (in, out); row h*D+d belongs to head h
    # bproj_ref: (1, C)     f32
    # o_ref:     (1, N, C)
    C = num_heads * head_dim
    x = x_ref[0]                                                     # (N, C) bf16
    n_tok = x.shape[0]

    # Fused QKV projection: one lane-dense MXU pass, result kept in vregs (no scratch stores).
    qkv = jnp.dot(x, wqkv_ref[...],
                  preferred_element_type=jnp.float32).astype(jnp.bfloat16)   # (N, 3C)

    acc = jnp.zeros((n_tok, C), jnp.float32)
    # Static unroll over heads (runs once per batch element; also bounds live softmax
    # intermediates to one (N, N) slab at a time -> no vreg spills at larger N).
    for h in range(num_heads):
        lo = h * head_dim
        q_h = qkv[:, lo:lo + head_dim]                               # (N, D) scale pre-folded
        k_h = qkv[:, C + lo:C + lo + head_dim]                       # (N, D)
        v_h = qkv[:, 2 * C + lo:2 * C + lo + head_dim]               # (N, D)

        # Scores: q_h @ k_h^T via trans-b dot_general (MXU handles the transposed operand).
        s = lax.dot_general(q_h, k_h, (((1,), (1,)), ((), ())),
                            preferred_element_type=jnp.float32)      # (N, N) f32
        s = s - jnp.max(s, axis=-1, keepdims=True)
        p = jnp.exp(s)
        p = p * pl.reciprocal(jnp.sum(p, axis=-1, keepdims=True), approx=True)

        o_h = jnp.dot(p.astype(jnp.bfloat16), v_h,
                      preferred_element_type=jnp.float32)            # (N, D) f32

        # Head-merge folded into the output projection: accumulate o_h @ Wproj^T[hD:(h+1)D, :].
        acc = acc + jnp.dot(o_h.astype(jnp.bfloat16),
                            wproj_ref[lo:lo + head_dim, :],
                            preferred_element_type=jnp.float32)      # (N, C) f32

    o_ref[0] = (acc + bproj_ref[...]).astype(o_ref.dtype)


def attention_pallas(x, wq, wkv, wproj, bproj, *, num_heads):
    """x: (B, N, C); wq: (C, C); wkv: (2C, C); wproj: (C, C); bproj: (C,).
    Weight shapes follow torch.nn.Linear convention (out_features, in_features)."""
    B, N, C = x.shape
    assert C % num_heads == 0
    head_dim = C // num_heads
    scale = head_dim ** (-0.5)
    # N must be a sublane multiple for the (1, N, C) blocks; C a lane multiple keeps the
    # stored output tiles lane-dense (perf, not correctness).
    assert N % 8 == 0, "token count must be a multiple of 8 (pad upstream otherwise)"

    # Wrapper-side glue: fuse q/kv weights, fold softmax scale into the Q columns,
    # pre-transpose to (in, out), and cast matmul operands to bf16 (MXU-native).
    wqkv_t = jnp.concatenate([wq.T * scale, wkv.T], axis=1).astype(jnp.bfloat16)  # (C, 3C)
    wproj_t = wproj.T.astype(jnp.bfloat16)                                        # (C, C)
    bproj_2d = bproj.reshape(1, C).astype(jnp.float32)
    x_bf = x.astype(jnp.bfloat16)

    kernel = functools.partial(
        _attention_kernel, num_heads=num_heads, head_dim=head_dim)

    flops = 2 * B * (N * C * 3 * C                      # fused QKV projection
                     + 2 * num_heads * N * N * head_dim  # QK^T and P@V
                     + N * C * C)                        # output projection
    transcendentals = B * num_heads * N * N              # exp in softmax
    bytes_accessed = (B * N * C * 2                      # x (bf16)
                      + (C * 3 * C + C * C) * 2 + C * 4  # weights + bias
                      + B * N * C * 4)                   # output (f32)

    return pl.pallas_call(
        kernel,
        out_shape=jax.ShapeDtypeStruct((B, N, C), x.dtype),
        grid=(B,),
        in_specs=[
            pl.BlockSpec((1, N, C), lambda b: (b, 0, 0)),      # full token set per batch elem
            pl.BlockSpec((C, 3 * C), lambda b: (0, 0)),
            pl.BlockSpec((C, C), lambda b: (0, 0)),
            pl.BlockSpec((1, C), lambda b: (0, 0)),
        ],
        out_specs=pl.BlockSpec((1, N, C), lambda b: (b, 0, 0)),  # lane-dense (C = 128)
        compiler_params=pltpu.CompilerParams(
            dimension_semantics=("parallel",)),                  # whole grid megacore-shardable
        cost_estimate=pl.CostEstimate(flops=flops,
                                      transcendentals=transcendentals,
                                      bytes_accessed=bytes_accessed),
    )(x_bf, wqkv_t, wproj_t, bproj_2d)


def attention_reference(x, wq, wkv, wproj, bproj, *, num_heads):
    """Pure-JAX (f32) re-statement of the PyTorch forward (sr_ratio=1, dropout=0)."""
    B, N, C = x.shape
    D = C // num_heads
    scale = D ** (-0.5)
    q = (x @ wq.T).reshape(B, N, num_heads, D).transpose(0, 2, 1, 3)          # (B, H, N, D)
    kv = (x @ wkv.T).reshape(B, N, 2, num_heads, D).transpose(2, 0, 3, 1, 4)  # (2, B, H, N, D)
    k, v = kv[0], kv[1]
    attn = jnp.einsum('bhnd,bhmd->bhnm', q, k) * scale
    attn = jax.nn.softmax(attn, axis=-1)
    out = jnp.einsum('bhnm,bhmd->bhnd', attn, v)
    out = out.transpose(0, 2, 1, 3).reshape(B, N, C)
    return out @ wproj.T + bproj


if __name__ == "__main__":
    # Small, module-consistent shapes (UNeXt-style): 8x8 spatial -> N=64 tokens, dim=128.
    B, Himg, Wimg = 2, 8, 8
    N = Himg * Wimg                # 64 tokens
    C = 128                        # dim (lane-dense tiles)
    NUM_HEADS = 8                  # head_dim = 16

    key = jax.random.PRNGKey(0)
    kx, kq, kkv, kp, kb = jax.random.split(key, 5)

    x = jax.random.normal(kx, (B, N, C), dtype=jnp.float32)
    # nn.Linear weights: (out_features, in_features); qkv_bias=False, proj has bias.
    wq = jax.random.normal(kq, (C, C), dtype=jnp.float32) * 0.05
    wkv = jax.random.normal(kkv, (2 * C, C), dtype=jnp.float32) * 0.05
    wproj = jax.random.normal(kp, (C, C), dtype=jnp.float32) * 0.05
    bproj = jax.random.normal(kb, (C,), dtype=jnp.float32) * 0.05

    out = attention_pallas(x, wq, wkv, wproj, bproj, num_heads=NUM_HEADS)
    out = jax.block_until_ready(out)

    ref = attention_reference(x, wq, wkv, wproj, bproj, num_heads=NUM_HEADS)
    # bf16 matmul operands (f32 accumulation) + approx reciprocal -> loosened tolerance.
    np.testing.assert_allclose(np.asarray(out), np.asarray(ref), rtol=2e-2, atol=2e-2)

    print("KERNEL_OK")
</pallas_src>

<mosaic_0001>
module attributes {stable_mosaic.version = 11 : i64} {
  func.func @_attention_kernel(%arg0: i32, %arg1: memref<1x64x128xbf16, #tpu.memory_space<vmem>>, %arg2: memref<128x384xbf16, #tpu.memory_space<vmem>>, %arg3: memref<128x128xbf16, #tpu.memory_space<vmem>>, %arg4: memref<1x128xf32, #tpu.memory_space<vmem>>, %arg5: memref<1x64x128xf32, #tpu.memory_space<vmem>>) attributes {dimension_semantics = [#tpu.dimension_semantics<parallel>], iteration_bounds = array<i64: 2>, scalar_prefetch = 0 : i64, scratch_operands = 0 : i64, tpu.core_type = #tpu.core_type<tc>, window_params = [{transform_indices = @transform_0, window_bounds = array<i64: 1, 64, 128>}, {pipeline_mode = #tpu.pipeline_mode<synchronous>, transform_indices = @transform_1, window_bounds = array<i64: 128, 384>}, {pipeline_mode = #tpu.pipeline_mode<synchronous>, transform_indices = @transform_2, window_bounds = array<i64: 128, 128>}, {pipeline_mode = #tpu.pipeline_mode<synchronous>, transform_indices = @transform_3, window_bounds = array<i64: 1, 128>}, {transform_indices = @transform_4, window_bounds = array<i64: 1, 64, 128>}]} {
    %c0 = arith.constant 0 : index
    %c0_0 = arith.constant 0 : index
    %c0_1 = arith.constant 0 : index
    %0 = vector.load %arg1[%c0, %c0_0, %c0_1] : memref<1x64x128xbf16, #tpu.memory_space<vmem>>, vector<1x64x128xbf16>
    %1 = vector.shape_cast %0 : vector<1x64x128xbf16> to vector<64x128xbf16>
    %c0_2 = arith.constant 0 : index
    %c0_3 = arith.constant 0 : index
    %2 = vector.load %arg2[%c0_2, %c0_3] : memref<128x384xbf16, #tpu.memory_space<vmem>>, vector<128x384xbf16>
    %cst = arith.constant dense<0.000000e+00> : vector<64x384xf32>
    %3 = tpu.matmul %1, %2, %cst {dimension_numbers = #tpu.dot_dimension_numbers<[1], [0], [0], [1], [0, 0, 1, 1], [], []>} : vector<64x128xbf16>, vector<128x384xbf16>, vector<64x384xf32> -> vector<64x384xf32>
    %4 = arith.truncf %3 : vector<64x384xf32> to vector<64x384xbf16>
    %cst_4 = arith.constant 0.000000e+00 : f32
    %5 = vector.broadcast %cst_4 : f32 to vector<64x128xf32>
    %6 = vector.extract_strided_slice %4 {offsets = [0, 0], sizes = [64, 16], strides = [1, 1]} : vector<64x384xbf16> to vector<64x16xbf16>
    %7 = vector.extract_strided_slice %4 {offsets = [0, 128], sizes = [64, 16], strides = [1, 1]} : vector<64x384xbf16> to vector<64x16xbf16>
    %8 = vector.extract_strided_slice %4 {offsets = [0, 256], sizes = [64, 16], strides = [1, 1]} : vector<64x384xbf16> to vector<64x16xbf16>
    %cst_5 = arith.constant dense<0.000000e+00> : vector<64x64xf32>
    %9 = tpu.matmul %6, %7, %cst_5 {dimension_numbers = #tpu.dot_dimension_numbers<[1], [1], [0], [0], [0, 0, 1, 0], [], []>} : vector<64x16xbf16>, vector<64x16xbf16>, vector<64x64xf32> -> vector<64x64xf32>
    %cst_6 = arith.constant dense<0xFF800000> : vector<64xf32>
    %10 = vector.multi_reduction <maximumf>, %9, %cst_6 [1] : vector<64x64xf32> to vector<64xf32>
    %11 = vector.shape_cast %10 : vector<64xf32> to vector<64x1xf32>
    %12 = vector.broadcast %11 : vector<64x1xf32> to vector<64x64xf32>
    %13 = arith.subf %9, %12 : vector<64x64xf32>
    %14 = math.exp %13 : vector<64x64xf32>
    %cst_7 = arith.constant dense<0.000000e+00> : vector<64xf32>
    %15 = vector.multi_reduction <add>, %14, %cst_7 [1] : vector<64x64xf32> to vector<64xf32>
    %16 = vector.shape_cast %15 : vector<64xf32> to vector<64x1xf32>
    %17 = tpu.reciprocal %16 {approx = true} : vector<64x1xf32> -> vector<64x1xf32>
    %18 = vector.broadcast %17 : vector<64x1xf32> to vector<64x64xf32>
    %19 = arith.mulf %14, %18 : vector<64x64xf32>
    %20 = arith.truncf %19 : vector<64x64xf32> to vector<64x64xbf16>
    %cst_8 = arith.constant dense<0.000000e+00> : vector<64x16xf32>
    %21 = tpu.matmul %20, %8, %cst_8 {dimension_numbers = #tpu.dot_dimension_numbers<[1], [0], [0], [1], [0, 0, 1, 1], [], []>} : vector<64x64xbf16>, vector<64x16xbf16>, vector<64x16xf32> -> vector<64x16xf32>
    %22 = arith.truncf %21 : vector<64x16xf32> to vector<64x16xbf16>
    %c0_9 = arith.constant 0 : index
    %c0_10 = arith.constant 0 : index
    %23 = vector.load %arg3[%c0_9, %c0_10] : memref<128x128xbf16, #tpu.memory_space<vmem>>, vector<16x128xbf16>
    %cst_11 = arith.constant dense<0.000000e+00> : vector<64x128xf32>
    %24 = tpu.matmul %22, %23, %cst_11 {dimension_numbers = #tpu.dot_dimension_numbers<[1], [0], [0], [1], [0, 0, 1, 1], [], []>} : vector<64x16xbf16>, vector<16x128xbf16>, vector<64x128xf32> -> vector<64x128xf32>
    %25 = arith.addf %5, %24 : vector<64x128xf32>
    %26 = vector.extract_strided_slice %4 {offsets = [0, 16], sizes = [64, 16], strides = [1, 1]} : vector<64x384xbf16> to vector<64x16xbf16>
    %27 = vector.extract_strided_slice %4 {offsets = [0, 144], sizes = [64, 16], strides = [1, 1]} : vector<64x384xbf16> to vector<64x16xbf16>
    %28 = vector.extract_strided_slice %4 {offsets = [0, 272], sizes = [64, 16], strides = [1, 1]} : vector<64x384xbf16> to vector<64x16xbf16>
    %cst_12 = arith.constant dense<0.000000e+00> : vector<64x64xf32>
    %29 = tpu.matmul %26, %27, %cst_12 {dimension_numbers = #tpu.dot_dimension_numbers<[1], [1], [0], [0], [0, 0, 1, 0], [], []>} : vector<64x16xbf16>, vector<64x16xbf16>, vector<64x64xf32> -> vector<64x64xf32>
    %cst_13 = arith.constant dense<0xFF800000> : vector<64xf32>
    %30 = vector.multi_reduction <maximumf>, %29, %cst_13 [1] : vector<64x64xf32> to vector<64xf32>
    %31 = vector.shape_cast %30 : vector<64xf32> to vector<64x1xf32>
    %32 = vector.broadcast %31 : vector<64x1xf32> to vector<64x64xf32>
    %33 = arith.subf %29, %32 : vector<64x64xf32>
    %34 = math.exp %33 : vector<64x64xf32>
    %cst_14 = arith.constant dense<0.000000e+00> : vector<64xf32>
    %35 = vector.multi_reduction <add>, %34, %cst_14 [1] : vector<64x64xf32> to vector<64xf32>
    %36 = vector.shape_cast %35 : vector<64xf32> to vector<64x1xf32>
    %37 = tpu.reciprocal %36 {approx = true} : vector<64x1xf32> -> vector<64x1xf32>
    %38 = vector.broadcast %37 : vector<64x1xf32> to vector<64x64xf32>
    %39 = arith.mulf %34, %38 : vector<64x64xf32>
    %40 = arith.truncf %39 : vector<64x64xf32> to vector<64x64xbf16>
    %cst_15 = arith.constant dense<0.000000e+00> : vector<64x16xf32>
    %41 = tpu.matmul %40, %28, %cst_15 {dimension_numbers = #tpu.dot_dimension_numbers<[1], [0], [0], [1], [0, 0, 1, 1], [], []>} : vector<64x64xbf16>, vector<64x16xbf16>, vector<64x16xf32> -> vector<64x16xf32>
    %42 = arith.truncf %41 : vector<64x16xf32> to vector<64x16xbf16>
    %c16 = arith.constant 16 : index
    %c0_16 = arith.constant 0 : index
    %43 = vector.load %arg3[%c16, %c0_16] : memref<128x128xbf16, #tpu.memory_space<vmem>>, vector<16x128xbf16>
    %cst_17 = arith.constant dense<0.000000e+00> : vector<64x128xf32>
    %44 = tpu.matmul %42, %43, %cst_17 {dimension_numbers = #tpu.dot_dimension_numbers<[1], [0], [0], [1], [0, 0, 1, 1], [], []>} : vector<64x16xbf16>, vector<16x128xbf16>, vector<64x128xf32> -> vector<64x128xf32>
    %45 = arith.addf %25, %44 : vector<64x128xf32>
    %46 = vector.extract_strided_slice %4 {offsets = [0, 32], sizes = [64, 16], strides = [1, 1]} : vector<64x384xbf16> to vector<64x16xbf16>
    %47 = vector.extract_strided_slice %4 {offsets = [0, 160], sizes = [64, 16], strides = [1, 1]} : vector<64x384xbf16> to vector<64x16xbf16>
    %48 = vector.extract_strided_slice %4 {offsets = [0, 288], sizes = [64, 16], strides = [1, 1]} : vector<64x384xbf16> to vector<64x16xbf16>
    %cst_18 = arith.constant dense<0.000000e+00> : vector<64x64xf32>
    %49 = tpu.matmul %46, %47, %cst_18 {dimension_numbers = #tpu.dot_dimension_numbers<[1], [1], [0], [0], [0, 0, 1, 0], [], []>} : vector<64x16xbf16>, vector<64x16xbf16>, vector<64x64xf32> -> vector<64x64xf32>
    %cst_19 = arith.constant dense<0xFF800000> : vector<64xf32>
    %50 = vector.multi_reduction <maximumf>, %49, %cst_19 [1] : vector<64x64xf32> to vector<64xf32>
    %51 = vector.shape_cast %50 : vector<64xf32> to vector<64x1xf32>
    %52 = vector.broadcast %51 : vector<64x1xf32> to vector<64x64xf32>
    %53 = arith.subf %49, %52 : vector<64x64xf32>
    %54 = math.exp %53 : vector<64x64xf32>
    %cst_20 = arith.constant dense<0.000000e+00> : vector<64xf32>
    %55 = vector.multi_reduction <add>, %54, %cst_20 [1] : vector<64x64xf32> to vector<64xf32>
    %56 = vector.shape_cast %55 : vector<64xf32> to vector<64x1xf32>
    %57 = tpu.reciprocal %56 {approx = true} : vector<64x1xf32> -> vector<64x1xf32>
    %58 = vector.broadcast %57 : vector<64x1xf32> to vector<64x64xf32>
    %59 = arith.mulf %54, %58 : vector<64x64xf32>
    %60 = arith.truncf %59 : vector<64x64xf32> to vector<64x64xbf16>
    %cst_21 = arith.constant dense<0.000000e+00> : vector<64x16xf32>
    %61 = tpu.matmul %60, %48, %cst_21 {dimension_numbers = #tpu.dot_dimension_numbers<[1], [0], [0], [1], [0, 0, 1, 1], [], []>} : vector<64x64xbf16>, vector<64x16xbf16>, vector<64x16xf32> -> vector<64x16xf32>
    %62 = arith.truncf %61 : vector<64x16xf32> to vector<64x16xbf16>
    %c32 = arith.constant 32 : index
    %c0_22 = arith.constant 0 : index
    %63 = vector.load %arg3[%c32, %c0_22] : memref<128x128xbf16, #tpu.memory_space<vmem>>, vector<16x128xbf16>
    %cst_23 = arith.constant dense<0.000000e+00> : vector<64x128xf32>
    %64 = tpu.matmul %62, %63, %cst_23 {dimension_numbers = #tpu.dot_dimension_numbers<[1], [0], [0], [1], [0, 0, 1, 1], [], []>} : vector<64x16xbf16>, vector<16x128xbf16>, vector<64x128xf32> -> vector<64x128xf32>
    %65 = arith.addf %45, %64 : vector<64x128xf32>
    %66 = vector.extract_strided_slice %4 {offsets = [0, 48], sizes = [64, 16], strides = [1, 1]} : vector<64x384xbf16> to vector<64x16xbf16>
    %67 = vector.extract_strided_slice %4 {offsets = [0, 176], sizes = [64, 16], strides = [1, 1]} : vector<64x384xbf16> to vector<64x16xbf16>
    %68 = vector.extract_strided_slice %4 {offsets = [0, 304], sizes = [64, 16], strides = [1, 1]} : vector<64x384xbf16> to vector<64x16xbf16>
    %cst_24 = arith.constant dense<0.000000e+00> : vector<64x64xf32>
    %69 = tpu.matmul %66, %67, %cst_24 {dimension_numbers = #tpu.dot_dimension_numbers<[1], [1], [0], [0], [0, 0, 1, 0], [], []>} : vector<64x16xbf16>, vector<64x16xbf16>, vector<64x64xf32> -> vector<64x64xf32>
    %cst_25 = arith.constant dense<0xFF800000> : vector<64xf32>
    %70 = vector.multi_reduction <maximumf>, %69, %cst_25 [1] : vector<64x64xf32> to vector<64xf32>
    %71 = vector.shape_cast %70 : vector<64xf32> to vector<64x1xf32>
    %72 = vector.broadcast %71 : vector<64x1xf32> to vector<64x64xf32>
    %73 = arith.subf %69, %72 : vector<64x64xf32>
    %74 = math.exp %73 : vector<64x64xf32>
    %cst_26 = arith.constant dense<0.000000e+00> : vector<64xf32>
    %75 = vector.multi_reduction <add>, %74, %cst_26 [1] : vector<64x64xf32> to vector<64xf32>
    %76 = vector.shape_cast %75 : vector<64xf32> to vector<64x1xf32>
    %77 = tpu.reciprocal %76 {approx = true} : vector<64x1xf32> -> vector<64x1xf32>
    %78 = vector.broadcast %77 : vector<64x1xf32> to vector<64x64xf32>
    %79 = arith.mulf %74, %78 : vector<64x64xf32>
    %80 = arith.truncf %79 : vector<64x64xf32> to vector<64x64xbf16>
    %cst_27 = arith.constant dense<0.000000e+00> : vector<64x16xf32>
    %81 = tpu.matmul %80, %68, %cst_27 {dimension_numbers = #tpu.dot_dimension_numbers<[1], [0], [0], [1], [0, 0, 1, 1], [], []>} : vector<64x64xbf16>, vector<64x16xbf16>, vector<64x16xf32> -> vector<64x16xf32>
    %82 = arith.truncf %81 : vector<64x16xf32> to vector<64x16xbf16>
    %c48 = arith.constant 48 : index
    %c0_28 = arith.constant 0 : index
    %83 = vector.load %arg3[%c48, %c0_28] : memref<128x128xbf16, #tpu.memory_space<vmem>>, vector<16x128xbf16>
    %cst_29 = arith.constant dense<0.000000e+00> : vector<64x128xf32>
    %84 = tpu.matmul %82, %83, %cst_29 {dimension_numbers = #tpu.dot_dimension_numbers<[1], [0], [0], [1], [0, 0, 1, 1], [], []>} : vector<64x16xbf16>, vector<16x128xbf16>, vector<64x128xf32> -> vector<64x128xf32>
    %85 = arith.addf %65, %84 : vector<64x128xf32>
    %86 = vector.extract_strided_slice %4 {offsets = [0, 64], sizes = [64, 16], strides = [1, 1]} : vector<64x384xbf16> to vector<64x16xbf16>
    %87 = vector.extract_strided_slice %4 {offsets = [0, 192], sizes = [64, 16], strides = [1, 1]} : vector<64x384xbf16> to vector<64x16xbf16>
    %88 = vector.extract_strided_slice %4 {offsets = [0, 320], sizes = [64, 16], strides = [1, 1]} : vector<64x384xbf16> to vector<64x16xbf16>
    %cst_30 = arith.constant dense<0.000000e+00> : vector<64x64xf32>
    %89 = tpu.matmul %86, %87, %cst_30 {dimension_numbers = #tpu.dot_dimension_numbers<[1], [1], [0], [0], [0, 0, 1, 0], [], []>} : vector<64x16xbf16>, vector<64x16xbf16>, vector<64x64xf32> -> vector<64x64xf32>
    %cst_31 = arith.constant dense<0xFF800000> : vector<64xf32>
    %90 = vector.multi_reduction <maximumf>, %89, %cst_31 [1] : vector<64x64xf32> to vector<64xf32>
    %91 = vector.shape_cast %90 : vector<64xf32> to vector<64x1xf32>
    %92 = vector.broadcast %91 : vector<64x1xf32> to vector<64x64xf32>
    %93 = arith.subf %89, %92 : vector<64x64xf32>
    %94 = math.exp %93 : vector<64x64xf32>
    %cst_32 = arith.constant dense<0.000000e+00> : vector<64xf32>
    %95 = vector.multi_reduction <add>, %94, %cst_32 [1] : vector<64x64xf32> to vector<64xf32>
    %96 = vector.shape_cast %95 : vector<64xf32> to vector<64x1xf32>
    %97 = tpu.reciprocal %96 {approx = true} : vector<64x1xf32> -> vector<64x1xf32>
    %98 = vector.broadcast %97 : vector<64x1xf32> to vector<64x64xf32>
    %99 = arith.mulf %94, %98 : vector<64x64xf32>
    %100 = arith.truncf %99 : vector<64x64xf32> to vector<64x64xbf16>
    %cst_33 = arith.constant dense<0.000000e+00> : vector<64x16xf32>
    %101 = tpu.matmul %100, %88, %cst_33 {dimension_numbers = #tpu.dot_dimension_numbers<[1], [0], [0], [1], [0, 0, 1, 1], [], []>} : vector<64x64xbf16>, vector<64x16xbf16>, vector<64x16xf32> -> vector<64x16xf32>
    %102 = arith.truncf %101 : vector<64x16xf32> to vector<64x16xbf16>
    %c64 = arith.constant 64 : index
    %c0_34 = arith.constant 0 : index
    %103 = vector.load %arg3[%c64, %c0_34] : memref<128x128xbf16, #tpu.memory_space<vmem>>, vector<16x128xbf16>
    %cst_35 = arith.constant dense<0.000000e+00> : vector<64x128xf32>
    %104 = tpu.matmul %102, %103, %cst_35 {dimension_numbers = #tpu.dot_dimension_numbers<[1], [0], [0], [1], [0, 0, 1, 1], [], []>} : vector<64x16xbf16>, vector<16x128xbf16>, vector<64x128xf32> -> vector<64x128xf32>
    %105 = arith.addf %85, %104 : vector<64x128xf32>
    %106 = vector.extract_strided_slice %4 {offsets = [0, 80], sizes = [64, 16], strides = [1, 1]} : vector<64x384xbf16> to vector<64x16xbf16>
    %107 = vector.extract_strided_slice %4 {offsets = [0, 208], sizes = [64, 16], strides = [1, 1]} : vector<64x384xbf16> to vector<64x16xbf16>
    %108 = vector.extract_strided_slice %4 {offsets = [0, 336], sizes = [64, 16], strides = [1, 1]} : vector<64x384xbf16> to vector<64x16xbf16>
    %cst_36 = arith.constant dense<0.000000e+00> : vector<64x64xf32>
    %109 = tpu.matmul %106, %107, %cst_36 {dimension_numbers = #tpu.dot_dimension_numbers<[1], [1], [0], [0], [0, 0, 1, 0], [], []>} : vector<64x16xbf16>, vector<64x16xbf16>, vector<64x64xf32> -> vector<64x64xf32>
    %cst_37 = arith.constant dense<0xFF800000> : vector<64xf32>
    %110 = vector.multi_reduction <maximumf>, %109, %cst_37 [1] : vector<64x64xf32> to vector<64xf32>
    %111 = vector.shape_cast %110 : vector<64xf32> to vector<64x1xf32>
    %112 = vector.broadcast %111 : vector<64x1xf32> to vector<64x64xf32>
    %113 = arith.subf %109, %112 : vector<64x64xf32>
    %114 = math.exp %113 : vector<64x64xf32>
    %cst_38 = arith.constant dense<0.000000e+00> : vector<64xf32>
    %115 = vector.multi_reduction <add>, %114, %cst_38 [1] : vector<64x64xf32> to vector<64xf32>
    %116 = vector.shape_cast %115 : vector<64xf32> to vector<64x1xf32>
    %117 = tpu.reciprocal %116 {approx = true} : vector<64x1xf32> -> vector<64x1xf32>
    %118 = vector.broadcast %117 : vector<64x1xf32> to vector<64x64xf32>
    %119 = arith.mulf %114, %118 : vector<64x64xf32>
    %120 = arith.truncf %119 : vector<64x64xf32> to vector<64x64xbf16>
    %cst_39 = arith.constant dense<0.000000e+00> : vector<64x16xf32>
    %121 = tpu.matmul %120, %108, %cst_39 {dimension_numbers = #tpu.dot_dimension_numbers<[1], [0], [0], [1], [0, 0, 1, 1], [], []>} : vector<64x64xbf16>, vector<64x16xbf16>, vector<64x16xf32> -> vector<64x16xf32>
    %122 = arith.truncf %121 : vector<64x16xf32> to vector<64x16xbf16>
    %c80 = arith.constant 80 : index
    %c0_40 = arith.constant 0 : index
    %123 = vector.load %arg3[%c80, %c0_40] : memref<128x128xbf16, #tpu.memory_space<vmem>>, vector<16x128xbf16>
    %cst_41 = arith.constant dense<0.000000e+00> : vector<64x128xf32>
    %124 = tpu.matmul %122, %123, %cst_41 {dimension_numbers = #tpu.dot_dimension_numbers<[1], [0], [0], [1], [0, 0, 1, 1], [], []>} : vector<64x16xbf16>, vector<16x128xbf16>, vector<64x128xf32> -> vector<64x128xf32>
    %125 = arith.addf %105, %124 : vector<64x128xf32>
    %126 = vector.extract_strided_slice %4 {offsets = [0, 96], sizes = [64, 16], strides = [1, 1]} : vector<64x384xbf16> to vector<64x16xbf16>
    %127 = vector.extract_strided_slice %4 {offsets = [0, 224], sizes = [64, 16], strides = [1, 1]} : vector<64x384xbf16> to vector<64x16xbf16>
    %128 = vector.extract_strided_slice %4 {offsets = [0, 352], sizes = [64, 16], strides = [1, 1]} : vector<64x384xbf16> to vector<64x16xbf16>
    %cst_42 = arith.constant dense<0.000000e+00> : vector<64x64xf32>
    %129 = tpu.matmul %126, %127, %cst_42 {dimension_numbers = #tpu.dot_dimension_numbers<[1], [1], [0], [0], [0, 0, 1, 0], [], []>} : vector<64x16xbf16>, vector<64x16xbf16>, vector<64x64xf32> -> vector<64x64xf32>
    %cst_43 = arith.constant dense<0xFF800000> : vector<64xf32>
    %130 = vector.multi_reduction <maximumf>, %129, %cst_43 [1] : vector<64x64xf32> to vector<64xf32>
    %131 = vector.shape_cast %130 : vector<64xf32> to vector<64x1xf32>
    %132 = vector.broadcast %131 : vector<64x1xf32> to vector<64x64xf32>
    %133 = arith.subf %129, %132 : vector<64x64xf32>
    %134 = math.exp %133 : vector<64x64xf32>
    %cst_44 = arith.constant dense<0.000000e+00> : vector<64xf32>
    %135 = vector.multi_reduction <add>, %134, %cst_44 [1] : vector<64x64xf32> to vector<64xf32>
    %136 = vector.shape_cast %135 : vector<64xf32> to vector<64x1xf32>
    %137 = tpu.reciprocal %136 {approx = true} : vector<64x1xf32> -> vector<64x1xf32>
    %138 = vector.broadcast %137 : vector<64x1xf32> to vector<64x64xf32>
    %139 = arith.mulf %134, %138 : vector<64x64xf32>
    %140 = arith.truncf %139 : vector<64x64xf32> to vector<64x64xbf16>
    %cst_45 = arith.constant dense<0.000000e+00> : vector<64x16xf32>
    %141 = tpu.matmul %140, %128, %cst_45 {dimension_numbers = #tpu.dot_dimension_numbers<[1], [0], [0], [1], [0, 0, 1, 1], [], []>} : vector<64x64xbf16>, vector<64x16xbf16>, vector<64x16xf32> -> vector<64x16xf32>
    %142 = arith.truncf %141 : vector<64x16xf32> to vector<64x16xbf16>
    %c96 = arith.constant 96 : index
    %c0_46 = arith.constant 0 : index
    %143 = vector.load %arg3[%c96, %c0_46] : memref<128x128xbf16, #tpu.memory_space<vmem>>, vector<16x128xbf16>
    %cst_47 = arith.constant dense<0.000000e+00> : vector<64x128xf32>
    %144 = tpu.matmul %142, %143, %cst_47 {dimension_numbers = #tpu.dot_dimension_numbers<[1], [0], [0], [1], [0, 0, 1, 1], [], []>} : vector<64x16xbf16>, vector<16x128xbf16>, vector<64x128xf32> -> vector<64x128xf32>
    %145 = arith.addf %125, %144 : vector<64x128xf32>
    %146 = vector.extract_strided_slice %4 {offsets = [0, 112], sizes = [64, 16], strides = [1, 1]} : vector<64x384xbf16> to vector<64x16xbf16>
    %147 = vector.extract_strided_slice %4 {offsets = [0, 240], sizes = [64, 16], strides = [1, 1]} : vector<64x384xbf16> to vector<64x16xbf16>
    %148 = vector.extract_strided_slice %4 {offsets = [0, 368], sizes = [64, 16], strides = [1, 1]} : vector<64x384xbf16> to vector<64x16xbf16>
    %cst_48 = arith.constant dense<0.000000e+00> : vector<64x64xf32>
    %149 = tpu.matmul %146, %147, %cst_48 {dimension_numbers = #tpu.dot_dimension_numbers<[1], [1], [0], [0], [0, 0, 1, 0], [], []>} : vector<64x16xbf16>, vector<64x16xbf16>, vector<64x64xf32> -> vector<64x64xf32>
    %cst_49 = arith.constant dense<0xFF800000> : vector<64xf32>
    %150 = vector.multi_reduction <maximumf>, %149, %cst_49 [1] : vector<64x64xf32> to vector<64xf32>
    %151 = vector.shape_cast %150 : vector<64xf32> to vector<64x1xf32>
    %152 = vector.broadcast %151 : vector<64x1xf32> to vector<64x64xf32>
    %153 = arith.subf %149, %152 : vector<64x64xf32>
    %154 = math.exp %153 : vector<64x64xf32>
    %cst_50 = arith.constant dense<0.000000e+00> : vector<64xf32>
    %155 = vector.multi_reduction <add>, %154, %cst_50 [1] : vector<64x64xf32> to vector<64xf32>
    %156 = vector.shape_cast %155 : vector<64xf32> to vector<64x1xf32>
    %157 = tpu.reciprocal %156 {approx = true} : vector<64x1xf32> -> vector<64x1xf32>
    %158 = vector.broadcast %157 : vector<64x1xf32> to vector<64x64xf32>
    %159 = arith.mulf %154, %158 : vector<64x64xf32>
    %160 = arith.truncf %159 : vector<64x64xf32> to vector<64x64xbf16>
    %cst_51 = arith.constant dense<0.000000e+00> : vector<64x16xf32>
    %161 = tpu.matmul %160, %148, %cst_51 {dimension_numbers = #tpu.dot_dimension_numbers<[1], [0], [0], [1], [0, 0, 1, 1], [], []>} : vector<64x64xbf16>, vector<64x16xbf16>, vector<64x16xf32> -> vector<64x16xf32>
    %162 = arith.truncf %161 : vector<64x16xf32> to vector<64x16xbf16>
    %c112 = arith.constant 112 : index
    %c0_52 = arith.constant 0 : index
    %163 = vector.load %arg3[%c112, %c0_52] : memref<128x128xbf16, #tpu.memory_space<vmem>>, vector<16x128xbf16>
    %cst_53 = arith.constant dense<0.000000e+00> : vector<64x128xf32>
    %164 = tpu.matmul %162, %163, %cst_53 {dimension_numbers = #tpu.dot_dimension_numbers<[1], [0], [0], [1], [0, 0, 1, 1], [], []>} : vector<64x16xbf16>, vector<16x128xbf16>, vector<64x128xf32> -> vector<64x128xf32>
    %165 = arith.addf %145, %164 : vector<64x128xf32>
    %c0_54 = arith.constant 0 : index
    %c0_55 = arith.constant 0 : index
    %166 = vector.load %arg4[%c0_54, %c0_55] : memref<1x128xf32, #tpu.memory_space<vmem>>, vector<1x128xf32>
    %167 = vector.broadcast %166 : vector<1x128xf32> to vector<64x128xf32>
    %168 = arith.addf %165, %167 : vector<64x128xf32>
    %c0_56 = arith.constant 0 : index
    %c0_57 = arith.constant 0 : index
    %c0_58 = arith.constant 0 : index
    %169 = vector.load %arg5[%c0_56, %c0_57, %c0_58] : memref<1x64x128xf32, #tpu.memory_space<vmem>>, vector<1x64x128xf32>
    %170 = vector.shape_cast %169 : vector<1x64x128xf32> to vector<64x128xf32>
    %171 = vector.shape_cast %168 : vector<64x128xf32> to vector<1x64x128xf32>
    tpu.vector_store %arg5[%c0_56, %c0_57, %c0_58], %171 {strides = array<i32>} : memref<1x64x128xf32, #tpu.memory_space<vmem>>, vector<1x64x128xf32>,
    return
  }
  func.func @transform_0(%arg0: i32) -> (i32, i32, i32) {
    %c0_i32 = arith.constant 0 : i32
    %c0_i32_0 = arith.constant 0 : i32
    %c0_i32_1 = arith.constant 0 : i32
    return %arg0, %c0_i32, %c0_i32_0 : i32, i32, i32
  }
  func.func @transform_1(%arg0: i32) -> (i32, i32) {
    %c0_i32 = arith.constant 0 : i32
    %c0_i32_0 = arith.constant 0 : i32
    %c0_i32_1 = arith.constant 0 : i32
    return %c0_i32, %c0_i32_0 : i32, i32
  }
  func.func @transform_2(%arg0: i32) -> (i32, i32) {
    %c0_i32 = arith.constant 0 : i32
    %c0_i32_0 = arith.constant 0 : i32
    %c0_i32_1 = arith.constant 0 : i32
    return %c0_i32, %c0_i32_0 : i32, i32
  }
  func.func @transform_3(%arg0: i32) -> (i32, i32) {
    %c0_i32 = arith.constant 0 : i32
    %c0_i32_0 = arith.constant 0 : i32
    %c0_i32_1 = arith.constant 0 : i32
    return %c0_i32, %c0_i32_0 : i32, i32
  }
  func.func @transform_4(%arg0: i32) -> (i32, i32, i32) {
    %c0_i32 = arith.constant 0 : i32
    %c0_i32_0 = arith.constant 0 : i32
    %c0_i32_1 = arith.constant 0 : i32
    return %arg0, %c0_i32, %c0_i32_0 : i32, i32, i32
  }
}

</mosaic_0001>

<bundles_post_ra>
// kernel: tpu_custom_call.1
= control target key start
LH: loop header
LB: loop body
LE: loop exit
PB: predicated region body
PF: predicated region fallthrough
CT: control target
= control target key end

     0   :  { %9 = vsyncpa [#allocation3], 0  ;;  %s6348_s0 = inlined_call_operand.hbm [shape: bf16[2,64,128], index: 0, kind: input, shape index: {}]   ;;  %s6349_s1 = inlined_call_operand.hbm [shape: bf16[128,384], index: 1, kind: input, shape index: {}]   ;;  %s6350_s2 = inlined_call_operand.hbm [shape: bf16[128,128], index: 2, kind: input, shape index: {}]   ;;  %s6351_s3 = inlined_call_operand.vmem [shape: f32[1,128], index: 3, kind: input, shape index: {}]   ;;  %s6352_s4 = inlined_call_operand.hbm [shape: f32[2,64,128], index: 4, kind: output, shape index: {}]  }
   0x1   :  { %11 = vsyncpa [#allocation3 + $0x1], 0 }
   0x2   :  { %12 = vsyncpa [#allocation6], 0 }
   0x3   :  { %13 = vsyncpa [#allocation4], 0 }
   0x4   :  { %15 = vsyncpa [#allocation4 + $0x1], 0  ;;  %s5114_s15 = smov 0   ;;  %s5116_s16 = smov 0  }
   0x5   :  { %s5118_s17 = smov 0   ;;  %s5120_s18 = smov 0  }
   0x6 LB: > { %s5135_s19 = sadd.s32 4294967295, %s5069_s18   ;;  %s3751_s20 = sadd.s32 4294967294, %s5069_s18   ;;  %s5069_s18 = sphi %s5120_s18, %s6372_s18   ;;  %s5065_s17 = sphi %s5118_s17, %s6371_s17   ;;  %s5061_s16 = sphi %s5116_s16, %s6370_s16   ;;  %s5057_s15 = sphi %s5114_s15, %s6369_s15  }
   0x7   : > { %p41_p0 = scmp.ne.s32.totalorder %s5061_s16, %s5057_s15  ;;  %p6353_p1 = scmp.eq.s32.totalorder %s5135_s19, 0 }
   0x8   : > { %p134_p3 = scmp.eq.s32.totalorder %s3751_s20, 1  ;;  %p3752_p5 = scmp.ge.s32.totalorder %s5069_s18, 1 }
   0x9   : > { %p5144_p4 = por %p6353_p1, %p41_p0  ;;  %p141_p7 = scmp.lt.s32.totalorder %s5069_s18, 3 }
   0xa   : > { %p5149_p6 = por %p134_p3, %p41_p0  ;;  %s5071_s24 = smov [#allocation5]  }
   0xb   : > { %s6356_s21 = scalar_select %p5144_p4, 1, 0 }
   0xc   : > { %s6357_s22 = scalar_select %p5149_p6, 1, 0 }
   0xd   : > { %p5154_p8 = pnand %p3752_p5, %p141_p7  ;;  %s153_s25 = sshll.u32 %s5071_s24, 4  ;;  %s5158_s25 = int_to_ptr.vmem [resolvable:$true] %s153_s25 }
   0xe   : > { %s5072_s27 = smov [#allocation7]   ;;  %s4913_s5 = scalar_lea.hbm %s6349_s1, 3072 }
   0xf   : > { %p4544_p9 = pneg %p5154_p8  ;;  %s166_s28 = sshll.u32 %s5072_s27, 4  ;;  %s5169_s28 = int_to_ptr.vmem [resolvable:$true] %s166_s28 }
  0x10   : > { %p4914_p12 = scmp.ne.s32.totalorder %s6349_s1, %s4913_s5  ;;  %p4920_p5 = scmp.lt.u32.totalorder %s4913_s5, %s6349_s1 }
  0x11   : > { %p5165_p11 = pnand %p4544_p9, %p6353_p1 }
  0x13   : > { %p4915_p13 = pneg %p5165_p11 }
  0x15   : > { %p4916_p0 = pnand %p4915_p13, %p4914_p12 }
  0x17   : > { %p4917_p3 = pneg %p4916_p0 }
  0x19   : > { %p4922_p7 = pnand %p4920_p5, %p4917_p3 }
  0x1b   : > { %4925 = shalt.err (!%p4922_p7)
}
  0x1c   : > { %s4926_s10 = scalar_lea.vmem %s5158_s25, 3072  ;;  %p4934_p2 = scmp.lt.s32.totalorder %s5158_s25, %s5158_s25 }
  0x1d   : > { %p4927_p9 = scmp.ne.s32.totalorder %s5158_s25, %s4926_s10  ;;  %p4935_p12 = scmp.lt.s32.totalorder %s4926_s10, %s4926_s10 }
  0x1f   : > { %p4929_p10 = pnand %p4927_p9, %p4915_p13  ;;  %p4936_p0 = por %p4935_p12, %p4934_p2 }
  0x21   : > { %p4930_p1 = pneg %p4929_p10 }
  0x23   : > { %p4937_p6 = pnand %p4936_p0, %p4930_p1 }
  0x25   : > { %4940 = shalt.err (!%p4937_p6)
}
  0x26   : > { %s5073_s11 = smov 192   ;;  %s5074_s12 = smov 12  }
  0x27   : > { %4547 = dma.hbm_to_vmem [thread:$0]  (!%p5165_p11), %s6349_s1, 3072, %s5158_s25, [#allocation6], %s5073_s11, %s5073_s11, %s5074_s12  }
  0x28   : > { %s4941_s27 = scalar_lea.hbm %s6350_s2, 1024 }
  0x29   : > { %p4942_p2 = scmp.ne.s32.totalorder %s6350_s2, %s4941_s27  ;;  %p4948_p10 = scmp.lt.u32.totalorder %s4941_s27, %s6350_s2 }
  0x2b   : > { %p4944_p1 = pnand %p4942_p2, %p4915_p13 }
  0x2d   : > { %p4945_p6 = pneg %p4944_p1 }
  0x2f   : > { %p4950_p3 = pnand %p4948_p10, %p4945_p6 }
  0x31   : > { %4953 = shalt.err (!%p4950_p3)
}
  0x32   : > { %s4954_s25 = scalar_lea.vmem %s5169_s28, 1024  ;;  %p4962_p12 = scmp.lt.s32.totalorder %s5169_s28, %s5169_s28 }
  0x33   : > { %p4955_p5 = scmp.ne.s32.totalorder %s5169_s28, %s4954_s25  ;;  %p4963_p0 = scmp.lt.s32.totalorder %s4954_s25, %s4954_s25 }
  0x35   : > { %p4957_p7 = pnand %p4955_p5, %p4915_p13  ;;  %p4964_p2 = por %p4963_p0, %p4962_p12 }
  0x37   : > { %p4958_p9 = pneg %p4957_p7 }
  0x39   : > { %p4965_p1 = pnand %p4964_p2, %p4958_p9 }
  0x3b   : > { %4968 = shalt.err (!%p4965_p1)
}
  0x3c   : > { %s5075_s7 = smov 64   ;;  %s5076_s8 = smov 4  }
  0x3d   : > { %4550 = dma.hbm_to_vmem [thread:$0]  (!%p5165_p11), %s6350_s2, 1024, %s5169_s28, [#allocation6], %s5075_s7, %s5075_s7, %s5076_s8  }
  0x3e   : > { %s5227_s11 = sadd.s32 1, %s5069_s18   ;;  %s28_s13 = sadd.s32 1, %s5065_s17 }
  0x3f   : > { %s25_s12 = ssub.s32 %s5069_s18, %s5227_s11  ;;  %p35_p6 = scmp.ne.s32.totalorder %s5065_s17, %s5061_s16 }
  0x40   : > { %p26_p13 = scmp.eq.s32.totalorder %s25_s12, 0  ;;  %p36_p10 = scmp.eq.s32.totalorder %s5069_s18, 0 }
  0x41   : > { %p6360_p5 = scmp.eq.s32.totalorder %s5135_s19, 1  ;;  %p4561_p9 = scmp.lt.s32.totalorder %s5069_s18, 2 }
  0x42   : > { %s5236_s14 = scalar_select %p26_p13, %s5065_s17, %s28_s13  }
  0x43   : > { %p37_p3 = por %p36_p10, %p35_p6  ;;  %p5240_p7 = por %p6360_p5, %p35_p6 }
  0x44   : > { %s183_s20 = sand.u32 1, %s5065_s17   ;;  %s3902_s28 = sshll.u32 %s5069_s18, 9 }
  0x45   : > { %s6361_s26 = scalar_select %p5240_p7, 1, 0 }
  0x46   : > { %s3756_s24 = sshll.u32 %s183_s20, 5  ;;  %s5250_s30 = scalar_lea.hbm %s6348_s0, %s3902_s28 }
  0x47   : > { %s187_s5 = scalar_lea.vmem [#allocation2], %s3756_s24  ;;  %p5254_p11 = pnand %p4561_p9, %p37_p3 }
  0x48   : > { %s194_s6 = sshll.u32 %s187_s5, 4  ;;  %s5258_s9 = scalar_lea.sflag [#allocation3], %s183_s20  ;;  %s5252_s6 = int_to_ptr.vmem [resolvable:$true] %s194_s6 }
  0x49   : > { %s4969_s10 = scalar_lea.hbm %s5250_s30, 512  ;;  %p4971_p0 = pneg %p5254_p11 }
  0x4a   : > { %p4970_p12 = scmp.ne.s32.totalorder %s5250_s30, %s4969_s10  ;;  %s4974_s24 = scalar_lea.hbm %s6348_s0, 1024 }
  0x4b   : > { %p4975_p13 = scmp.lt.u32.totalorder %s5250_s30, %s6348_s0  ;;  %p4976_p6 = scmp.lt.u32.totalorder %s4974_s24, %s4969_s10 }
  0x4c   : > { %p4972_p2 = pnand %p4971_p0, %p4970_p12  ;;  %p4978_p3 = scmp.lt.u32.totalorder %s4969_s10, %s5250_s30 }
  0x4d   : > { %p4977_p10 = por %p4976_p6, %p4975_p13 }
  0x4e   : > { %p4973_p1 = pneg %p4972_p2 }
  0x4f   : > { %p4979_p5 = por %p4978_p3, %p4977_p10 }
  0x51   : > { %p4980_p9 = pnand %p4979_p5, %p4973_p1 }
  0x53   : > { %4983 = shalt.err (!%p4980_p9)
}
  0x54   : > { %s4984_s20 = scalar_lea.vmem %s5252_s6, 512  ;;  %s5077_s29 = smov [#allocation2]  }
  0x55   : > { %p4985_p12 = scmp.ne.s32.totalorder %s5252_s6, %s4984_s20  ;;  %s4989_s5 = sshll.u32 %s5077_s29, 4  ;;  %s4990_s5 = int_to_ptr.vmem [resolvable:$false] %s4989_s5 }
  0x56   : > { %s4991_s12 = scalar_lea.vmem %s4990_s5, 1024  ;;  %p4992_p4 = scmp.lt.s32.totalorder %s5252_s6, %s4990_s5 }
  0x57   : > { %p4987_p2 = pnand %p4985_p12, %p4971_p0  ;;  %p4993_p13 = scmp.lt.s32.totalorder %s4991_s12, %s4984_s20 }
  0x59   : > { %p4988_p7 = pneg %p4987_p2  ;;  %p4994_p6 = por %p4993_p13, %p4992_p4 }
  0x5b   : > { %p4995_p10 = pnand %p4994_p6, %p4988_p7 }
  0x5d   : > { %4998 = shalt.err (!%p4995_p10)
}
  0x5e   : > { %4554 = dma.hbm_to_vmem [thread:$0]  (!%p5254_p11), %s5250_s30, 512, %s5252_s6, %s5258_s9, %s5075_s7, %s5075_s7, %s5076_s8  }
  0x5f   : > { %206 = sbr.rel (%p5154_p8) target bundleno = 4182 (0x1056), region = 36  ;;  %s5292_s10 = sand.u32 (!%p5154_p8), 1, %s5061_s16  }
  0x60   : > { %s3760_s13 = sshll.u32 (!%p5154_p8), %s5292_s10, 5  ;;  %s209_s24 = scalar_lea.sflag (!%p5154_p8), [#allocation3], %s5292_s10 }
  0x61   : > { %s5296_s28 = scalar_lea.vmem (!%p5154_p8), [#allocation2], %s3760_s13  ;;  %p6363_p4 = scmp.ne.s32.totalorder (!%p5154_p8), %s6356_s21, 0 }
  0x66   : > { %5044 = dma.done.wait (%p6363_p4), %s209_s24, 512  }
  0x67   : > { %5046 = vsyncadd (%p6363_p4), %s209_s24, 4294966784  ;;  %p6364_p7 = scmp.eq.s32.totalorder %s5135_s19, 0 }
  0x69   : > { %5048 = dma.done.wait (%p6364_p7), [#allocation6], 4096   ;;  %p6365_p8 = pmov %p6364_p7 }
  0x6a   : > { %v5078_v0 = vmov 0   ;;  %v4613_v1 = vld [vmem:[#allocation5 + $0x4] ss:$12 sps:$4 sm:$0xff]   ;;  %v4615_v2 = vld [vmem:[#allocation5] ss:$12 sps:$4 sm:$0xff]   ;;  %v5316_v20 = vld [vmem:[%s5296_s28 + $0x18] sm:$0xff]  }
  0x6b   : > { %5050 = vsyncadd (%p6365_p8), [#allocation6], 4294963200  ;;  %470 = vmatprep.mubr.bf16.mxu0 %v5078_v0  ;;  %438 = vmatprep.subr.bf16.mxu0 %v4613_v1  ;;  %v4616_v3 = vld [vmem:[#allocation5 + $0x1c] ss:$12 sps:$4 sm:$0xff]   ;;  %v4618_v4 = vld [vmem:[#allocation5 + $0x18] ss:$12 sps:$4 sm:$0xff]  }
  0x6c   : > { %439 = vmatpush1.bf16.msra.mxu0 %v4615_v2  ;;  %v4619_v5 = vld [vmem:[#allocation5 + $0x34] ss:$12 sps:$4 sm:$0xff]   ;;  %v4621_v6 = vld [vmem:[#allocation5 + $0x30] ss:$12 sps:$4 sm:$0xff]   ;;  %v4622_v7 = vld [vmem:[#allocation5 + $0x4c] ss:$12 sps:$4 sm:$0xff]  }
  0x6d   : > { %440 = vmatprep.subr.bf16.mxu0 %v4616_v3  ;;  %v4624_v8 = vld [vmem:[#allocation5 + $0x48] ss:$12 sps:$4 sm:$0xff]   ;;  %v4637_v9 = vld [vmem:[%s5296_s28] sm:$0xff]   ;;  %v4633_v15 = vld [vmem:[#allocation5 + $0x90] ss:$12 sps:$4 sm:$0xff]   ;;  %vm588_vm0 = vcmask 130048  }
  0x6e   : > { %v4625_v10 = vld [vmem:[#allocation5 + $0x64] ss:$12 sps:$4 sm:$0xff]   ;;  %v4627_v11 = vld [vmem:[#allocation5 + $0x60] ss:$12 sps:$4 sm:$0xff]   ;;  %4100 = vmatprep.mubr.bf16.mxu1 %v4637_v9  ;;  %v4628_v12 = vld [vmem:[#allocation5 + $0x7c] ss:$12 sps:$4 sm:$0xff]  }
  0x6f   : > { %v4630_v13 = vld [vmem:[#allocation5 + $0x78] ss:$12 sps:$4 sm:$0xff]   ;;  %v4631_v14 = vld [vmem:[#allocation5 + $0x94] ss:$12 sps:$4 sm:$0xff]   ;;  %v5308_v18 = vld [vmem:[%s5296_s28 + $0x8] sm:$0xff]   ;;  %vm678_vm1 = vcmask 523264  }
  0x70   : > { %441 = vmatpush1.bf16.msra.mxu0 %v4618_v4  ;;  %v4634_v16 = vld [vmem:[#allocation5 + $0xac] ss:$12 sps:$4 sm:$0xff]   ;;  %v4636_v17 = vld [vmem:[#allocation5 + $0xa8] ss:$12 sps:$4 sm:$0xff]   ;;  %v4644_v52 = vld [vmem:[#allocation5 + $0x50] ss:$12 sps:$4 sm:$0xff]  }
  0x71   : > { %442 = vmatprep.subr.bf16.mxu0 %v4619_v5  ;;  %v5312_v19 = vld [vmem:[%s5296_s28 + $0x10] sm:$0xff]   ;;  %v4642_v50 = vld [vmem:[#allocation5 + $0x20] ss:$12 sps:$4 sm:$0xff]   ;;  %v4643_v51 = vld [vmem:[#allocation5 + $0x38] ss:$12 sps:$4 sm:$0xff]   ;;  %s5079_s21 = smov 112  }
  0x72   : > { %v4641_v49 = vld [vmem:[#allocation5 + $0x8] ss:$12 sps:$4 sm:$0xff]   ;;  %v4646_v54 = vld [vmem:[#allocation5 + $0x80] ss:$12 sps:$4 sm:$0xff]   ;;  %v4647_v55 = vld [vmem:[#allocation5 + $0x98] ss:$12 sps:$4 sm:$0xff]  }
  0x73   : > { %4084 = vmatprep.subr.bf16.mxu1 %v4641_v49  ;;  %v4645_v53 = vld [vmem:[#allocation5 + $0x68] ss:$12 sps:$4 sm:$0xff]   ;;  %v4648_v56 = vld [vmem:[#allocation5 + $0xb0] ss:$12 sps:$4 sm:$0xff]   ;;  %s5080_s23 = smov 96   ;;  %s5081_s7 = smov 80  }
  0x74   : > { %443 = vmatpush1.bf16.msra.mxu0 %v4621_v6  ;;  %4085 = vmatpush3.bf16.msra.mxu1 %v4641_v49  ;;  %s5082_s8 = smov 64   ;;  %s5083_s30 = smov 48  }
  0x75   : > { %444 = vmatprep.subr.bf16.mxu0 %v4622_v7  ;;  %4086 = vmatprep.subr.bf16.mxu1 %v4642_v50  ;;  %s5084_s6 = smov 32   ;;  %s5085_s25 = smov 16  }
  0x76   : > { %s3763_s9 = sshll.u32 %s5292_s10, 6  ;;  %s3903_s12 = sshll.u32 %s5135_s19, 10 }
  0x77   : > { %s244_s29 = scalar_lea.vmem [#allocation8], %s3763_s9  ;;  %s6304_s28 = scalar_lea.hbm %s6352_s4, %s3903_s12 }
  0x78   : > { %445 = vmatpush1.bf16.msra.mxu0 %v4624_v8  ;;  %4087 = vmatpush3.bf16.msra.mxu1 %v4642_v50  ;;  %s3659_s5 = sshll.u32 %s244_s29, 4  ;;  %s3646_s19 = scalar_lea.sflag [#allocation4], %s5292_s10  ;;  %s6299_s5 = int_to_ptr.vmem [resolvable:$true] %s3659_s5 }
  0x79   : > { %446 = vmatprep.subr.bf16.mxu0 %v4625_v10  ;;  %4088 = vmatprep.subr.bf16.mxu1 %v4643_v51  ;;  %p6366_p0 = scmp.ne.s32.totalorder %s6361_s26, 0 }
  0x7c   : > { %447 = vmatpush1.bf16.msra.mxu0 %v4627_v11  ;;  %4089 = vmatpush3.bf16.msra.mxu1 %v4643_v51 }
  0x7d   : > { %448 = vmatprep.subr.bf16.mxu0 %v4628_v12  ;;  %4090 = vmatprep.subr.bf16.mxu1 %v4644_v52 }
  0x80   : > { %449 = vmatpush1.bf16.msra.mxu0 %v4630_v13  ;;  %4091 = vmatpush3.bf16.msra.mxu1 %v4644_v52 }
  0x81   : > { %450 = vmatprep.subr.bf16.mxu0 %v4631_v14  ;;  %4092 = vmatprep.subr.bf16.mxu1 %v4645_v53 }
  0x84   : > { %451 = vmatpush1.bf16.msra.mxu0 %v4633_v15  ;;  %4093 = vmatpush3.bf16.msra.mxu1 %v4645_v53 }
  0x85   : > { %452 = vmatprep.subr.bf16.mxu0 %v4634_v16  ;;  %4094 = vmatprep.subr.bf16.mxu1 %v4646_v54 }
  0x88   : > { %453 = vmatpush1.bf16.msra.mxu0 %v4636_v17  ;;  %4095 = vmatpush3.bf16.msra.mxu1 %v4646_v54 }
  0x89   : > { %4096 = vmatprep.subr.bf16.mxu1 %v4647_v55 }
  0x8b   : > { %471 = vmatmul.mubr.bf16.vlgmr.msra.gmra.mrb[0].mxu0 %v4637_v9 }
  0x8c   : > { %480 = vmatprep.mubr.bf16.mxu0 %v5078_v0  ;;  %4097 = vmatpush3.bf16.msra.mxu1 %v4647_v55 }
  0x8d   : > { %4098 = vmatprep.subr.bf16.mxu1 %v4648_v56 }
  0x90   : > { %4099 = vmatpush3.bf16.msra.mxu1 %v4648_v56 }
  0x93   : > { %481 = vmatmul.mubr.bf16.gmra.mrb[4].mxu0 %v5308_v18  ;;  %4101 = vmatmul.mubr.bf16.vlgmr.msra.gmra.mrb[0].mxu1 %v5308_v18 }
  0x94   : > { %490 = vmatprep.mubr.bf16.mxu0 %v5078_v0  ;;  %4104 = vmatprep.mubr.bf16.mxu1 %v5312_v19 }
  0x9b   : > { %491 = vmatmul.mubr.bf16.gmra.mrb[8].mxu0 %v5312_v19  ;;  %4105 = vmatmul.mubr.bf16.gmra.mrb[4].mxu1 %v5316_v20 }
  0x9c   : > { %500 = vmatprep.mubr.bf16.mxu0 %v5078_v0 }
  0xa3   : > { %501 = vmatmul.mubr.bf16.gmra.mrb[12].mxu0 %v5316_v20 }
 0x15e   : > { %v472_v21 = vpop.f32.mrb[0].mxu0 }
 0x15f   : > { %v474_v22 = vpop.f32.mrb[1].mxu0 }
 0x160   : > { %v476_v23 = vpop.f32.mrb[2].mxu0 }
 0x161   : > { %v5319_v24 = vpack.c.bf16 %v476_v23, %v472_v21  ;;  %v478_v25 = vpop.f32.mrb[3].mxu0 }
 0x162   : > { %v5321_v26 = vpack.c.bf16 %v478_v25, %v474_v22 }
 0x163   : > { %4116 = vmatprep.mubr.msk.bf16.mxu0 %vm588_vm0, %v5319_v24 }
 0x164   : > { %4500 = vmatprep.subr.msk.bf16.mxu0 %vm588_vm0, %v5321_v26  ;;  %v602_v27 = vsel %vm588_vm0, %v5321_v26, 0 }
 0x165   : > { %4109 = vmatpush3.bf16.xpose.msra.mxu0 %v602_v27 }
 0x166   : > { %v482_v28 = vpop.f32.mrb[4].mxu0  ;;  %v4102_v9 = vpop.f32.mrb[0].mxu1 }
 0x167   : > { %v484_v29 = vpop.f32.mrb[5].mxu0  ;;  %v545_v10 = vpop.f32.mrb[1].mxu1 }
 0x168   : > { %v486_v30 = vpop.f32.mrb[6].mxu0  ;;  %v4103_v11 = vpop.f32.mrb[2].mxu1 }
 0x169   : > { %v5329_v31 = vpack.c.bf16 %v486_v30, %v482_v28  ;;  %v488_v32 = vpop.f32.mrb[7].mxu0  ;;  %v5376_v12 = vpack.c.bf16 %v4103_v11, %v4102_v9  ;;  %v548_v13 = vpop.f32.mrb[3].mxu1 }
 0x16a   : > { %v5331_v33 = vpack.c.bf16 %v488_v32, %v484_v29  ;;  %v5378_v14 = vpack.c.bf16 %v548_v13, %v545_v10 }
 0x16c   : > { %4501 = vmatprep.subr.msk.bf16.mxu0 %vm588_vm0, %v5331_v33  ;;  %v605_v34 = vsel %vm588_vm0, %v5331_v33, 0  ;;  %4124 = vmatprep.subr.bf16.mxu1 %v5378_v14 }
 0x16d   : > { %4111 = vmatpush3.bf16.xpose.msra.mxu0 %v605_v34  ;;  %4125 = vmatpush3.bf16.msra.mxu1 %v5378_v14 }
 0x16e   : > { %v492_v35 = vpop.f32.mrb[8].mxu0  ;;  %4126 = vmatprep.subr.bf16.mxu1 %v5376_v12  ;;  %v4106_v53 = vpop.f32.mrb[4].mxu1 }
 0x16f   : > { %v494_v36 = vpop.f32.mrb[9].mxu0  ;;  %v561_v54 = vpop.f32.mrb[5].mxu1 }
 0x170   : > { %v496_v37 = vpop.f32.mrb[10].mxu0  ;;  %v4107_v55 = vpop.f32.mrb[6].mxu1 }
 0x171   : > { %v5337_v38 = vpack.c.bf16 %v496_v37, %v492_v35  ;;  %v498_v39 = vpop.f32.mrb[11].mxu0  ;;  %4127 = vmatpush3.bf16.msra.mxu1 %v5376_v12  ;;  %v564_v56 = vpop.f32.mrb[7].mxu1 }
 0x172   : > { %v5339_v40 = vpack.c.bf16 %v498_v39, %v494_v36 }
 0x174   : > { %4502 = vmatprep.subr.msk.bf16.mxu0 %vm588_vm0, %v5339_v40  ;;  %v608_v41 = vsel %vm588_vm0, %v5339_v40, 0 }
 0x175   : > { %4113 = vmatpush3.bf16.xpose.msra.mxu0 %v608_v41 }
 0x176   : > { %v502_v42 = vpop.f32.mrb[12].mxu0 }
 0x177   : > { %v504_v43 = vpop.f32.mrb[13].mxu0 }
 0x178   : > { %v506_v44 = vpop.f32.mrb[14].mxu0 }
 0x179   : > { %v5345_v45 = vpack.c.bf16 %v506_v44, %v502_v42  ;;  %v508_v46 = vpop.f32.mrb[15].mxu0 }
 0x17a   : > { %v5347_v47 = vpack.c.bf16 %v508_v46, %v504_v43 }
 0x17c   : > { %4503 = vmatprep.subr.msk.bf16.mxu0 %vm588_vm0, %v5347_v47  ;;  %v611_v48 = vsel %vm588_vm0, %v5347_v47, 0 }
 0x17d   : > { %4115 = vmatpush3.bf16.xpose.msra.mxu0 %v611_v48 }
 0x184   : > { %4117 = vmatmul.mubr.msk.bf16.vlgmr.msra.gmra.mrb[16].mxu0 %vm588_vm0, %v5329_v31 }
 0x185   : > { %4120 = vmatprep.mubr.msk.bf16.mxu0 %vm588_vm0, %v5337_v38 }
 0x18c   : > { %4121 = vmatmul.mubr.msk.bf16.gmra.mrb[20].mxu0 %vm588_vm0, %v5345_v45 }
 0x257   : > { %v4118_v57 = vpop.f32.mrb[16].mxu0 }
 0x258   : > { %v647_v58 = vpop.f32.mrb[17].mxu0  ;;  %v685_v59 = vsel %vm678_vm1, %v4118_v57, -inf }
 0x259   : > { %686 = vmax.xlane.f32.xlu1 %v685_v59  ;;  %v4119_v60 = vpop.f32.mrb[18].mxu0  ;;  %v679_v61 = vsel %vm678_vm1, %v647_v58, -inf }
 0x25a   : > { %680 = vmax.xlane.f32.xlu0 %v679_v61  ;;  %v650_v62 = vpop.f32.mrb[19].mxu0  ;;  %v688_v63 = vsel %vm678_vm1, %v4119_v60, -inf }
 0x25b   : > { %v682_v0 = vsel %vm678_vm1, %v650_v62, -inf }
 0x25d   : > { %689 = vmax.xlane.f32.xlu1 %v688_v63 }
 0x25e   : > { %683 = vmax.xlane.f32.xlu0 %v682_v0 }
 0x25f   : > { %v4122_v1 = vpop.f32.mrb[20].mxu0 }
 0x260   : > { %v663_v2 = vpop.f32.mrb[21].mxu0  ;;  %v697_v7 = vsel %vm678_vm1, %v4122_v1, -inf }
 0x261   : > { %v5366_v3 = vpop.f32.mrb[22].mxu0  ;;  %v691_v4 = vsel %vm678_vm1, %v663_v2, -inf }
 0x262   : > { %692 = vmax.xlane.f32.xlu0 %v691_v4  ;;  %v5369_v5 = vpop.f32.mrb[23].mxu0  ;;  %v700_v8 = vsel %vm678_vm1, %v5366_v3, -inf }
 0x263   : > { %v694_v6 = vsel %vm678_vm1, %v5369_v5, -inf }
 0x264   : > { %695 = vmax.xlane.f32.xlu1 %v694_v6 }
 0x266   : > { %698 = vmax.xlane.f32.xlu0 %v697_v7 }
 0x268   : > { %701 = vmax.xlane.f32.xlu1 %v700_v8 }
 0x2e6   : > { %v687_v15 = vpop.xlane.xlu1 %686 }
 0x2e7   : > { %v705_v16 = vsub.f32 %v4118_v57, %v687_v15  ;;  %v681_v17 = vpop.xlane.xlu0 %680  ;;  %v5402_v57 = vpack.c.bf16 %v564_v56, %v561_v54 }
 0x2e8   : > { %v703_v18 = vsub.f32 %v647_v58, %v681_v17  ;;  %v5408_v58 = vpack.c.bf16 %v4107_v55, %v4106_v53 }
 0x2e9   : > { %v715_v19 = vmul.f32 1.442695, %v705_v16  ;;  %4128 = vmatprep.subr.bf16.mxu1 %v5402_v57 }
 0x2ea   : > { %v711_v20 = vmul.f32 1.442695, %v703_v18  ;;  %v690_v21 = vpop.xlane.xlu1 %689  ;;  %4129 = vmatpush3.bf16.msra.mxu1 %v5402_v57 }
 0x2eb   : > { %4657 = vpow2.f32 %v715_v19  ;;  %v706_v22 = vsub.f32 %v4119_v60, %v690_v21  ;;  %v684_v23 = vpop.xlane.xlu0 %683  ;;  %4130 = vmatprep.subr.bf16.mxu1 %v5408_v58 }
 0x2ec   : > { %v704_v25 = vsub.f32 %v650_v62, %v684_v23  ;;  %4659 = vpow2.f32 %v711_v20 }
 0x2ed   : > { %v717_v27 = vmul.f32 1.442695, %v706_v22 }
 0x2ee   : > { %v713_v28 = vmul.f32 1.442695, %v704_v25  ;;  %4131 = vmatpush3.bf16.msra.mxu1 %v5408_v58 }
 0x2ef   : > { %4661 = vpow2.f32 %v717_v27  ;;  %v693_v29 = vpop.xlane.xlu0 %692 }
 0x2f0   : > { %4663 = vpow2.f32 %v713_v28  ;;  %v707_v30 = vsub.f32 %v663_v2, %v693_v29 }
 0x2f1   : > { %v696_v59 = vpop.xlane.xlu1 %695 }
 0x2f2   : > { %v719_v36 = vmul.f32 1.442695, %v707_v30  ;;  %v708_v62 = vsub.f32 %v5369_v5, %v696_v59 }
 0x2f3   : > { %v699_v32 = vpop.xlane.xlu0 %698 }
 0x2f4   : > { %v709_v34 = vsub.f32 %v4122_v1, %v699_v32  ;;  %v721_v0 = vmul.f32 1.442695, %v708_v62 }
 0x2f5   : > { %v5384_v35 = vpop.eup %4657  ;;  %v702_v60 = vpop.xlane.xlu1 %701 }
 0x2f6   : > { %v723_v37 = vmul.f32 1.442695, %v709_v34  ;;  %v733_v39 = vsel %vm678_vm1, %v5384_v35, 0.0  ;;  %v5388_v41 = vpop.eup %4659  ;;  %v710_v61 = vsub.f32 %v5366_v3, %v702_v60 }
 0x2f7   : > { %734 = vadd.xlane.f32.xlu0 %v733_v39  ;;  %v727_v43 = vsel %vm678_vm1, %v5388_v41, 0.0 }
 0x2f8   : > { %4665 = vpow2.f32 %v723_v37  ;;  %v725_v63 = vmul.f32 1.442695, %v710_v61 }
 0x2f9   : > { %v4662_v42 = vpop.eup %4661  ;;  %4667 = vpow2.f32 %v719_v36 }
 0x2fa   : > { %v736_v44 = vsel %vm678_vm1, %v4662_v42, 0.0  ;;  %v4664_v46 = vpop.eup %4663  ;;  %4669 = vpow2.f32 %v725_v63 }
 0x2fb   : > { %728 = vadd.xlane.f32.xlu0 %v727_v43  ;;  %737 = vadd.xlane.f32.xlu1 %v736_v44  ;;  %v730_v48 = vsel %vm678_vm1, %v4664_v46, 0.0  ;;  %4671 = vpow2.f32 %v721_v0 }
 0x2ff   : > { %731 = vadd.xlane.f32.xlu1 %v730_v48 }
 0x302   : > { %v5394_v49 = vpop.eup %4665 }
 0x303   : > { %v745_v50 = vsel %vm678_vm1, %v5394_v49, 0.0  ;;  %v5398_v51 = vpop.eup %4667 }
 0x304   : > { %746 = vadd.xlane.f32.xlu0 %v745_v50  ;;  %v739_v52 = vsel %vm678_vm1, %v5398_v51, 0.0  ;;  %v4670_v1 = vpop.eup %4669 }
 0x305   : > { %v748_v2 = vsel %vm678_vm1, %v4670_v1, 0.0  ;;  %v4672_v4 = vpop.eup %4671 }
 0x306   : > { %v742_v6 = vsel %vm678_vm1, %v4672_v4, 0.0 }
 0x308   : > { %740 = vadd.xlane.f32.xlu0 %v739_v52 }
 0x310   : > { %872 = vrot.lane.b32.xlu1 %v5331_v33, %s5079_s21 }
 0x314   : > { %874 = vrot.lane.b32.xlu1 %v5339_v40, %s5079_s21 }
 0x31e   : > { %870 = vrot.lane.b32.xlu0 %v5321_v26, %s5079_s21 }
 0x322   : > { %858 = vrot.lane.b32.xlu0 %v5319_v24, %s5079_s21 }
 0x326   : > { %862 = vrot.lane.b32.xlu0 %v5337_v38, %s5079_s21 }
 0x338   : > { %749 = vadd.xlane.f32.xlu1 %v748_v2 }
 0x33c   : > { %743 = vadd.xlane.f32.xlu1 %v742_v6 }
 0x34d   : > { %876 = vrot.lane.b32.xlu1 %v5347_v47, %s5079_s21 }
 0x351   : > { %860 = vrot.lane.b32.xlu1 %v5329_v31, %s5079_s21 }
 0x355   : > { %864 = vrot.lane.b32.xlu1 %v5345_v45, %s5079_s21 }
 0x384   : > { %v735_v3 = vpop.xlane.xlu0 %734 }
 0x388   : > { %v729_v5 = vpop.xlane.xlu0 %728  ;;  %v738_v7 = vpop.xlane.xlu1 %737 }
 0x389   : > { %4673 = vrcp.f32 %v738_v7 }
 0x38a   : > { %4675 = vrcp.f32 %v729_v5 }
 0x38b   : > { %4677 = vrcp.f32 %v735_v3 }
 0x38c   : > { %v732_v8 = vpop.xlane.xlu1 %731 }
 0x38d   : > { %4679 = vrcp.f32 %v732_v8 }
 0x390   : > { %v873_v27 = vpop.permute.xlu1 %872 }
 0x391   : > { %v747_v9 = vpop.xlane.xlu0 %746  ;;  %v894_v28 = vsel %vm588_vm0, %v873_v27, 0 }
 0x393   : > { %v4674_v10 = vpop.eup %4673 }
 0x394   : > { %v4676_v11 = vpop.eup %4675  ;;  %v762_v17 = vmul.f32 %v4674_v10, %v4662_v42  ;;  %v875_v29 = vpop.permute.xlu1 %874 }
 0x395   : > { %v741_v13 = vpop.xlane.xlu0 %740  ;;  %v4678_v15 = vpop.eup %4677  ;;  %v759_v18 = vmul.f32 %v4676_v11, %v5388_v41  ;;  %v897_v30 = vsel %vm588_vm0, %v875_v29, 0 }
 0x396   : > { %v761_v20 = vmul.f32 %v4678_v15, %v5384_v35 }
 0x397   : > { %v4680_v16 = vpop.eup %4679 }
 0x398   : > { %v760_v19 = vmul.f32 %v4680_v16, %v4664_v46  ;;  %v768_v23 = vpack.c.bf16 %v762_v17, %v761_v20 }
 0x399   : > { %v871_v21 = vpop.permute.xlu0 %870 }
 0x39a   : > { %4504 = vmatprep.subr.msk.bf16.mxu1 %vm588_vm0, %v871_v21  ;;  %v767_v22 = vpack.c.bf16 %v760_v19, %v759_v18  ;;  %v891_v25 = vsel %vm588_vm0, %v871_v21, 0 }
 0x39c   : > { %4132 = vmatprep.mubr.msk.bf16.mxu1 %vm678_vm1, %v767_v22 }
 0x39d   : > { %4133 = vmatmul.mubr.msk.bf16.vlgmr.msra.gmra.mrb[8].mxu1 %vm678_vm1, %v768_v23  ;;  %v859_v53 = vpop.permute.xlu0 %858 }
 0x39e   : > { %4141 = vmatpush3.bf16.xpose.msra.mxu1 %v891_v25 }
 0x39f   : > { %4505 = vmatprep.subr.msk.bf16.mxu1 %vm588_vm0, %v873_v27 }
 0x3a1   : > { %v863_v55 = vpop.permute.xlu0 %862 }
 0x3a6   : > { %4143 = vmatpush3.bf16.xpose.msra.mxu1 %v894_v28 }
 0x3a7   : > { %4506 = vmatprep.subr.msk.bf16.mxu1 %vm588_vm0, %v875_v29 }
 0x3ae   : > { %4145 = vmatpush3.bf16.xpose.msra.mxu1 %v897_v30 }
 0x3c5   : > { %v750_v32 = vpop.xlane.xlu1 %749 }
 0x3c6   : > { %4681 = vrcp.f32 %v750_v32 }
 0x3c7   : > { %4683 = vrcp.f32 %v741_v13 }
 0x3c8   : > { %4685 = vrcp.f32 %v747_v9 }
 0x3c9   : > { %v744_v34 = vpop.xlane.xlu1 %743 }
 0x3ca   : > { %4687 = vrcp.f32 %v744_v34 }
 0x3cd   : > { %v877_v35 = vpop.permute.xlu1 %876 }
 0x3ce   : > { %4507 = vmatprep.subr.msk.bf16.mxu1 %vm588_vm0, %v877_v35  ;;  %v900_v36 = vsel %vm588_vm0, %v877_v35, 0 }
 0x3cf   : > { %4147 = vmatpush3.bf16.xpose.msra.mxu1 %v900_v36 }
 0x3d0   : > { %v4682_v37 = vpop.eup %4681 }
 0x3d1   : > { %v4684_v39 = vpop.eup %4683  ;;  %v766_v43 = vmul.f32 %v4682_v37, %v4670_v1  ;;  %v861_v54 = vpop.permute.xlu1 %860 }
 0x3d2   : > { %v4686_v41 = vpop.eup %4685  ;;  %v763_v44 = vmul.f32 %v4684_v39, %v5398_v51 }
 0x3d3   : > { %v765_v48 = vmul.f32 %v4686_v41, %v5394_v49 }
 0x3d4   : > { %v4688_v42 = vpop.eup %4687 }
 0x3d5   : > { %v764_v46 = vmul.f32 %v4688_v42, %v4672_v4  ;;  %v770_v52 = vpack.c.bf16 %v766_v43, %v765_v48  ;;  %v865_v56 = vpop.permute.xlu1 %864 }
 0x3d7   : > { %v769_v50 = vpack.c.bf16 %v764_v46, %v763_v44 }
 0x3d9   : > { %4136 = vmatprep.mubr.msk.bf16.mxu1 %vm678_vm1, %v769_v50 }
 0x3da   : > { %4137 = vmatmul.mubr.msk.bf16.gmra.mrb[12].mxu1 %vm678_vm1, %v770_v52 }
 0x3db   : > { %4148 = vmatprep.mubr.msk.bf16.mxu1 %vm588_vm0, %v859_v53 }
 0x3e2   : > { %4149 = vmatmul.mubr.msk.bf16.vlgmr.msra.gmra.mrb[16].mxu1 %vm588_vm0, %v861_v54 }
 0x3e3   : > { %4152 = vmatprep.mubr.msk.bf16.mxu1 %vm588_vm0, %v863_v55 }
 0x3ea   : > { %4153 = vmatmul.mubr.msk.bf16.gmra.mrb[20].mxu1 %vm588_vm0, %v865_v56 }
 0x470   : > { %v5450_v51 = vpop.f32.mrb[8].mxu1 }
 0x471   : > { %v5452_v49 = vpop.f32.mrb[9].mxu1 }
 0x472   : > { %v5454_v59 = vpop.f32.mrb[10].mxu1 }
 0x473   : > { %v849_v60 = vpack.c.bf16 %v5454_v59, %v5450_v51  ;;  %v5458_v61 = vpop.f32.mrb[11].mxu1 }
 0x474   : > { %v848_v62 = vpack.c.bf16 %v5458_v61, %v5452_v49 }
 0x4ad   : > { %v5462_v63 = vpop.f32.mrb[12].mxu1 }
 0x4ae   : > { %v5464_v0 = vpop.f32.mrb[13].mxu1 }
 0x4af   : > { %v5466_v1 = vpop.f32.mrb[14].mxu1 }
 0x4b0   : > { %v851_v2 = vpack.c.bf16 %v5466_v1, %v5462_v63  ;;  %v5470_v4 = vpop.f32.mrb[15].mxu1 }
 0x4b1   : > { %v850_v6 = vpack.c.bf16 %v5470_v4, %v5464_v0 }
 0x4b5   : > { %v4150_v3 = vpop.f32.mrb[16].mxu1 }
 0x4b6   : > { %v936_v5 = vpop.f32.mrb[17].mxu1  ;;  %v973_v7 = vsel %vm678_vm1, %v4150_v3, -inf }
 0x4b7   : > { %974 = vmax.xlane.f32.xlu0 %v973_v7  ;;  %v4151_v8 = vpop.f32.mrb[18].mxu1  ;;  %v967_v11 = vsel %vm678_vm1, %v936_v5, -inf }
 0x4b8   : > { %v939_v9 = vpop.f32.mrb[19].mxu1  ;;  %v976_v16 = vsel %vm678_vm1, %v4151_v8, -inf }
 0x4b9   : > { %v970_v10 = vsel %vm678_vm1, %v939_v9, -inf }
 0x4ba   : > { %971 = vmax.xlane.f32.xlu1 %v970_v10 }
 0x4bb   : > { %968 = vmax.xlane.f32.xlu0 %v967_v11 }
 0x4bd   : > { %v4154_v13 = vpop.f32.mrb[20].mxu1 }
 0x4be   : > { %v952_v15 = vpop.f32.mrb[21].mxu1  ;;  %v985_v19 = vsel %vm678_vm1, %v4154_v13, -inf }
 0x4bf   : > { %977 = vmax.xlane.f32.xlu0 %v976_v16  ;;  %v5478_v17 = vpop.f32.mrb[22].mxu1  ;;  %v979_v20 = vsel %vm678_vm1, %v952_v15, -inf }
 0x4c0   : > { %v5480_v18 = vpop.f32.mrb[23].mxu1  ;;  %v988_v21 = vsel %vm678_vm1, %v5478_v17, -inf }
 0x4c1   : > { %v982_v22 = vsel %vm678_vm1, %v5480_v18, -inf }
 0x4c3   : > { %986 = vmax.xlane.f32.xlu0 %v985_v19 }
 0x4c7   : > { %980 = vmax.xlane.f32.xlu0 %v979_v20 }
 0x4cb   : > { %1065 = vrot.lane.b32.xlu1 %v5376_v12, %s5079_s21 }
 0x4cf   : > { %1067 = vrot.lane.b32.xlu1 %v5402_v57, %s5079_s21 }
 0x4dd   : > { %1063 = vrot.lane.b32.xlu0 %v5378_v14, %s5079_s21 }
 0x4f3   : > { %989 = vmax.xlane.f32.xlu1 %v988_v21 }
 0x4f7   : > { %983 = vmax.xlane.f32.xlu1 %v982_v22 }
 0x508   : > { %1069 = vrot.lane.b32.xlu1 %v5408_v58, %s5079_s21  ;;  %s4999_s21 = scalar_lea.vmem %s6299_s5, 1024 }
 0x509   : > { %p5000_p11 = scmp.ne.s32.totalorder %s6299_s5, %s4999_s21 }
 0x50b   : > { %p5001_p1 = pnand %p5000_p11, %p6366_p0 }
 0x50d   : > { %p5002_p3 = pneg %p5001_p1 }
 0x544   : > { %v975_v23 = vpop.xlane.xlu0 %974 }
 0x545   : > { %v993_v25 = vsub.f32 %v4150_v3, %v975_v23 }
 0x547   : > { %v1003_v27 = vmul.f32 1.442695, %v993_v25  ;;  %v972_v28 = vpop.xlane.xlu1 %971 }
 0x548   : > { %v969_v29 = vpop.xlane.xlu0 %968  ;;  %v992_v32 = vsub.f32 %v939_v9, %v972_v28 }
 0x549   : > { %4689 = vpow2.f32 %v1003_v27  ;;  %v991_v30 = vsub.f32 %v936_v5, %v969_v29 }
 0x54a   : > { %v1001_v37 = vmul.f32 1.442695, %v992_v32 }
 0x54b   : > { %v999_v34 = vmul.f32 1.442695, %v991_v30  ;;  %v1066_v54 = vpop.permute.xlu1 %1065 }
 0x54c   : > { %v978_v35 = vpop.xlane.xlu0 %977 }
 0x54d   : > { %4691 = vpow2.f32 %v999_v34  ;;  %v994_v36 = vsub.f32 %v4151_v8, %v978_v35 }
 0x54f   : > { %v1005_v39 = vmul.f32 1.442695, %v994_v36  ;;  %v1068_v8 = vpop.permute.xlu1 %1067 }
 0x550   : > { %v987_v41 = vpop.xlane.xlu0 %986 }
 0x551   : > { %4693 = vpow2.f32 %v1005_v39  ;;  %v997_v42 = vsub.f32 %v4154_v13, %v987_v41 }
 0x552   : > { %4695 = vpow2.f32 %v1001_v37 }
 0x553   : > { %v5496_v43 = vpop.eup %4689  ;;  %v1011_v44 = vmul.f32 1.442695, %v997_v42 }
 0x554   : > { %v981_v46 = vpop.xlane.xlu0 %980  ;;  %v1021_v48 = vsel %vm678_vm1, %v5496_v43, 0.0 }
 0x555   : > { %4697 = vpow2.f32 %v1011_v44  ;;  %v995_v50 = vsub.f32 %v952_v15, %v981_v46  ;;  %1022 = vadd.xlane.f32.xlu0 %v1021_v48 }
 0x557   : > { %v5500_v52 = vpop.eup %4691  ;;  %v1007_v53 = vmul.f32 1.442695, %v995_v50 }
 0x558   : > { %v1064_v55 = vpop.permute.xlu0 %1063  ;;  %v1015_v56 = vsel %vm678_vm1, %v5500_v52, 0.0 }
 0x559   : > { %4699 = vpow2.f32 %v1007_v53  ;;  %1016 = vadd.xlane.f32.xlu0 %v1015_v56  ;;  %4156 = vmatprep.subr.bf16.mxu1 %v1064_v55 }
 0x55a   : > { %4157 = vmatpush3.bf16.msra.mxu1 %v1064_v55 }
 0x55b   : > { %v5504_v3 = vpop.eup %4693  ;;  %4158 = vmatprep.subr.bf16.mxu1 %v1066_v54 }
 0x55c   : > { %v1024_v5 = vsel %vm678_vm1, %v5504_v3, 0.0  ;;  %v5508_v7 = vpop.eup %4695 }
 0x55d   : > { %1025 = vadd.xlane.f32.xlu1 %v1024_v5  ;;  %v1018_v11 = vsel %vm678_vm1, %v5508_v7, 0.0 }
 0x55e   : > { %4159 = vmatpush3.bf16.msra.mxu1 %v1066_v54 }
 0x55f   : > { %v5510_v9 = vpop.eup %4697  ;;  %4160 = vmatprep.subr.bf16.mxu1 %v1068_v8 }
 0x560   : > { %v1033_v10 = vsel %vm678_vm1, %v5510_v9, 0.0 }
 0x561   : > { %1034 = vadd.xlane.f32.xlu0 %v1033_v10  ;;  %1019 = vadd.xlane.f32.xlu1 %v1018_v11 }
 0x562   : > { %4161 = vmatpush3.bf16.msra.mxu1 %v1068_v8 }
 0x563   : > { %v5516_v13 = vpop.eup %4699 }
 0x564   : > { %v1027_v15 = vsel %vm678_vm1, %v5516_v13, 0.0 }
 0x565   : > { %1028 = vadd.xlane.f32.xlu0 %v1027_v15 }
 0x572   : > { %1334 = vrot.lane.b32.xlu1 %v5331_v33, %s5080_s23 }
 0x576   : > { %1336 = vrot.lane.b32.xlu1 %v5339_v40, %s5080_s23 }
 0x580   : > { %v990_v16 = vpop.xlane.xlu1 %989 }
 0x581   : > { %v998_v19 = vsub.f32 %v5478_v17, %v990_v16 }
 0x583   : > { %v1013_v20 = vmul.f32 1.442695, %v998_v19 }
 0x584   : > { %v984_v21 = vpop.xlane.xlu1 %983 }
 0x585   : > { %4701 = vpow2.f32 %v1013_v20  ;;  %v996_v22 = vsub.f32 %v5480_v18, %v984_v21 }
 0x587   : > { %v1009_v23 = vmul.f32 1.442695, %v996_v22 }
 0x588   : > { %v1070_v25 = vpop.permute.xlu1 %1069 }
 0x589   : > { %4162 = vmatprep.subr.bf16.mxu1 %v1070_v25  ;;  %4703 = vpow2.f32 %v1009_v23 }
 0x58a   : > { %4163 = vmatpush3.bf16.msra.mxu1 %v1070_v25 }
 0x58f   : > { %v5526_v27 = vpop.eup %4701 }
 0x590   : > { %v1036_v28 = vsel %vm678_vm1, %v5526_v27, 0.0 }
 0x591   : > { %1037 = vadd.xlane.f32.xlu0 %v1036_v28 }
 0x593   : > { %v5530_v29 = vpop.eup %4703 }
 0x594   : > { %v1030_v17 = vsel %vm678_vm1, %v5530_v29, 0.0 }
 0x59a   : > { %1031 = vadd.xlane.f32.xlu1 %v1030_v17 }
 0x5a7   : > { %1332 = vrot.lane.b32.xlu0 %v5321_v26, %s5080_s23 }
 0x5ab   : > { %1324 = vrot.lane.b32.xlu0 %v5319_v24, %s5080_s23  ;;  %1338 = vrot.lane.b32.xlu1 %v5347_v47, %s5080_s23 }
 0x5af   : > { %1328 = vrot.lane.b32.xlu0 %v5337_v38, %s5080_s23  ;;  %1326 = vrot.lane.b32.xlu1 %v5329_v31, %s5080_s23 }
 0x5b3   : > { %1715 = vrot.lane.b32.xlu0 %v5321_v26, %s5081_s7  ;;  %1330 = vrot.lane.b32.xlu1 %v5345_v45, %s5080_s23 }
 0x5b7   : > { %1719 = vrot.lane.b32.xlu0 %v5339_v40, %s5081_s7  ;;  %1717 = vrot.lane.b32.xlu1 %v5331_v33, %s5081_s7 }
 0x5bb   : > { %1707 = vrot.lane.b32.xlu0 %v5319_v24, %s5081_s7  ;;  %1721 = vrot.lane.b32.xlu1 %v5347_v47, %s5081_s7 }
 0x5bf   : > { %1711 = vrot.lane.b32.xlu0 %v5337_v38, %s5081_s7  ;;  %1709 = vrot.lane.b32.xlu1 %v5329_v31, %s5081_s7 }
 0x5c3   : > { %1713 = vrot.lane.b32.xlu1 %v5345_v45, %s5081_s7 }
 0x5e2   : > { %v1023_v18 = vpop.xlane.xlu0 %1022 }
 0x5e6   : > { %v1017_v32 = vpop.xlane.xlu0 %1016 }
 0x5ea   : > { %v1026_v30 = vpop.xlane.xlu1 %1025 }
 0x5eb   : > { %4705 = vrcp.f32 %v1026_v30 }
 0x5ec   : > { %4707 = vrcp.f32 %v1017_v32 }
 0x5ed   : > { %4709 = vrcp.f32 %v1023_v18 }
 0x5ee   : > { %v1020_v34 = vpop.xlane.xlu1 %1019  ;;  %v1035_v53 = vpop.xlane.xlu0 %1034 }
 0x5ef   : > { %4711 = vrcp.f32 %v1020_v34 }
 0x5f2   : > { %v1029_v54 = vpop.xlane.xlu0 %1028  ;;  %v1335_v55 = vpop.permute.xlu1 %1334 }
 0x5f5   : > { %v4706_v35 = vpop.eup %4705 }
 0x5f6   : > { %v4708_v36 = vpop.eup %4707  ;;  %v1050_v41 = vmul.f32 %v4706_v35, %v5504_v3  ;;  %v1337_v8 = vpop.permute.xlu1 %1336  ;;  %v1356_v3 = vsel %vm588_vm0, %v1335_v55, 0 }
 0x5f7   : > { %v4710_v37 = vpop.eup %4709  ;;  %v1047_v42 = vmul.f32 %v4708_v36, %v5500_v52  ;;  %v1359_v21 = vsel %vm588_vm0, %v1337_v8, 0 }
 0x5f8   : > { %v1049_v46 = vmul.f32 %v4710_v37, %v5496_v43 }
 0x5f9   : > { %v4712_v39 = vpop.eup %4711 }
 0x5fa   : > { %v1048_v44 = vmul.f32 %v4712_v39, %v5508_v7  ;;  %v1056_v50 = vpack.c.bf16 %v1050_v41, %v1049_v46  ;;  %v4649_v41 = vld [vmem:[#allocation7 + $0x8] sm:$0xff]  }
 0x5fb   : > { %4172 = vmatprep.subr.bf16.mxu0 %v4649_v41 }
 0x5fc   : > { %v1055_v48 = vpack.c.bf16 %v1048_v44, %v1047_v42  ;;  %4173 = vmatpush3.bf16.msra.mxu0 %v4649_v41 }
 0x5fe   : > { %4164 = vmatprep.mubr.msk.bf16.mxu1 %vm678_vm1, %v1055_v48 }
 0x5ff   : > { %4165 = vmatmul.mubr.msk.bf16.vlgmr.msra.gmra.mrb[24].mxu1 %vm678_vm1, %v1056_v50  ;;  %v4650_v50 = vld [vmem:[#allocation7] sm:$0xff]  }
 0x600   : > { %4182 = vmatprep.subr.bf16.mxu0 %v4650_v50 }
 0x61e   : > { %v1038_v56 = vpop.xlane.xlu0 %1037 }
 0x61f   : > { %4713 = vrcp.f32 %v1038_v56 }
 0x620   : > { %4715 = vrcp.f32 %v1029_v54 }
 0x621   : > { %4717 = vrcp.f32 %v1035_v53 }
 0x622   : > { %v1333_v5 = vpop.permute.xlu0 %1332 }
 0x623   : > { %4508 = vmatprep.subr.msk.bf16.mxu1 %vm588_vm0, %v1333_v5  ;;  %v1353_v52 = vsel %vm588_vm0, %v1333_v5, 0 }
 0x624   : > { %4193 = vmatpush3.bf16.xpose.msra.mxu1 %v1353_v52 }
 0x625   : > { %4509 = vmatprep.subr.msk.bf16.mxu1 %vm588_vm0, %v1335_v55 }
 0x626   : > { %v1325_v11 = vpop.permute.xlu0 %1324 }
 0x627   : > { %v1032_v43 = vpop.xlane.xlu1 %1031 }
 0x628   : > { %4719 = vrcp.f32 %v1032_v43 }
 0x629   : > { %v4714_v7 = vpop.eup %4713 }
 0x62a   : > { %v4716_v10 = vpop.eup %4715  ;;  %v1054_v20 = vmul.f32 %v4714_v7, %v5526_v27  ;;  %v1329_v17 = vpop.permute.xlu0 %1328 }
 0x62b   : > { %v4718_v15 = vpop.eup %4717  ;;  %v1339_v19 = vpop.permute.xlu1 %1338  ;;  %v1051_v22 = vmul.f32 %v4716_v10, %v5516_v13 }
 0x62c   : > { %4195 = vmatpush3.bf16.xpose.msra.mxu1 %v1356_v3  ;;  %v1053_v25 = vmul.f32 %v4718_v15, %v5510_v9  ;;  %v1362_v27 = vsel %vm588_vm0, %v1339_v19, 0 }
 0x62d   : > { %4510 = vmatprep.subr.msk.bf16.mxu1 %vm588_vm0, %v1337_v8 }
 0x62e   : > { %v1058_v18 = vpack.c.bf16 %v1054_v20, %v1053_v25  ;;  %v1716_v13 = vpop.permute.xlu0 %1715 }
 0x62f   : > { %v1327_v30 = vpop.permute.xlu1 %1326  ;;  %v1736_v9 = vsel %vm588_vm0, %v1716_v13, 0 }
 0x632   : > { %v4720_v16 = vpop.eup %4719  ;;  %v1720_v34 = vpop.permute.xlu0 %1719 }
 0x633   : > { %v1052_v23 = vmul.f32 %v4720_v16, %v5530_v29  ;;  %v1331_v29 = vpop.permute.xlu1 %1330  ;;  %v1742_v37 = vsel %vm588_vm0, %v1720_v34, 0 }
 0x634   : > { %4197 = vmatpush3.bf16.xpose.msra.mxu1 %v1359_v21 }
 0x635   : > { %4511 = vmatprep.subr.msk.bf16.mxu1 %vm588_vm0, %v1339_v19  ;;  %v1057_v28 = vpack.c.bf16 %v1052_v23, %v1051_v22 }
 0x636   : > { %v1708_v35 = vpop.permute.xlu0 %1707 }
 0x637   : > { %4168 = vmatprep.mubr.msk.bf16.mxu1 %vm678_vm1, %v1057_v28  ;;  %v1718_v32 = vpop.permute.xlu1 %1717 }
 0x638   : > { %4169 = vmatmul.mubr.msk.bf16.gmra.mrb[28].mxu1 %vm678_vm1, %v1058_v18  ;;  %v1739_v36 = vsel %vm588_vm0, %v1718_v32, 0 }
 0x639   : > { %4200 = vmatprep.mubr.msk.bf16.mxu1 %vm588_vm0, %v1325_v11 }
 0x63a   : > { %v1712_v46 = vpop.permute.xlu0 %1711 }
 0x63b   : > { %v1722_v39 = vpop.permute.xlu1 %1721 }
 0x63c   : > { %4199 = vmatpush3.bf16.xpose.msra.mxu1 %v1362_v27  ;;  %v1745_v42 = vsel %vm588_vm0, %v1722_v39, 0 }
 0x63d   : > { %4512 = vmatprep.subr.msk.bf16.mxu1 %vm588_vm0, %v1716_v13 }
 0x63f   : > { %v1710_v44 = vpop.permute.xlu1 %1709 }
 0x643   : > { %4201 = vmatmul.mubr.msk.bf16.vlgmr.msra.gmra.mrb[32].mxu1 %vm588_vm0, %v1327_v30  ;;  %v1714_v48 = vpop.permute.xlu1 %1713 }
 0x644   : > { %4204 = vmatprep.mubr.msk.bf16.mxu1 %vm588_vm0, %v1329_v17  ;;  %4235 = vmatpush3.bf16.xpose.msra.mxu1 %v1736_v9 }
 0x645   : > { %4513 = vmatprep.subr.msk.bf16.mxu1 %vm588_vm0, %v1718_v32 }
 0x64b   : > { %4205 = vmatmul.mubr.msk.bf16.gmra.mrb[36].mxu1 %vm588_vm0, %v1331_v29 }
 0x64c   : > { %4237 = vmatpush3.bf16.xpose.msra.mxu1 %v1739_v36  ;;  %4242 = vmatprep.mubr.msk.bf16.mxu1 %vm588_vm0, %v1708_v35 }
 0x64d   : > { %4514 = vmatprep.subr.msk.bf16.mxu1 %vm588_vm0, %v1720_v34 }
 0x654   : > { %4239 = vmatpush3.bf16.xpose.msra.mxu1 %v1742_v37 }
 0x655   : > { %4515 = vmatprep.subr.msk.bf16.mxu1 %vm588_vm0, %v1722_v39 }
 0x65c   : > { %4241 = vmatpush3.bf16.xpose.msra.mxu1 %v1745_v42 }
 0x663   : > { %4243 = vmatmul.mubr.msk.bf16.vlgmr.msra.gmra.mrb[40].mxu1 %vm588_vm0, %v1710_v44 }
 0x664   : > { %4246 = vmatprep.mubr.msk.bf16.mxu1 %vm588_vm0, %v1712_v46 }
 0x66b   : > { %4247 = vmatmul.mubr.msk.bf16.gmra.mrb[44].mxu1 %vm588_vm0, %v1714_v48 }
 0x6d2   : > { %v4166_v53 = vpop.f32.mrb[24].mxu1 }
 0x6d3   : > { %v1121_v54 = vpop.f32.mrb[25].mxu1 }
 0x6d4   : > { %v4167_v55 = vpop.f32.mrb[26].mxu1 }
 0x6d5   : > { %v1153_v56 = vpack.c.bf16 %v4167_v55, %v4166_v53  ;;  %v1124_v5 = vpop.f32.mrb[27].mxu1 }
 0x6d6   : > { %v1152_v8 = vpack.c.bf16 %v1124_v5, %v1121_v54 }
 0x6d8   : > { %4174 = vmatprep.mubr.msk.bf16.mxu0 %vm588_vm0, %v1152_v8 }
 0x6d9   : > { %4175 = vmatmul.mubr.msk.bf16.vlgmr.msra.gmra.mrb[24].mxu0 %vm588_vm0, %v1153_v56 }
 0x6da   : > { %4183 = vmatpush3.bf16.msra.mxu0 %v4650_v50 }
 0x70b   : > { %v4170_v52 = vpop.f32.mrb[28].mxu1 }
 0x70c   : > { %v1137_v43 = vpop.f32.mrb[29].mxu1 }
 0x70d   : > { %v4171_v3 = vpop.f32.mrb[30].mxu1 }
 0x70e   : > { %v1155_v7 = vpack.c.bf16 %v4171_v3, %v4170_v52  ;;  %v1140_v10 = vpop.f32.mrb[31].mxu1 }
 0x70f   : > { %v1154_v11 = vpack.c.bf16 %v1140_v10, %v1137_v43 }
 0x711   : > { %4178 = vmatprep.mubr.msk.bf16.mxu0 %vm588_vm0, %v1154_v11 }
 0x712   : > { %4179 = vmatmul.mubr.msk.bf16.gmra.mrb[28].mxu0 %vm588_vm0, %v1155_v7 }
 0x713   : > { %4184 = vmatprep.mubr.msk.bf16.mxu0 %vm588_vm0, %v848_v62 }
 0x716   : > { %v4202_v15 = vpop.f32.mrb[32].mxu1 }
 0x717   : > { %v1398_v16 = vpop.f32.mrb[33].mxu1  ;;  %v1435_v49 = vsel %vm678_vm1, %v4202_v15, -inf }
 0x718   : > { %v4203_v19 = vpop.f32.mrb[34].mxu1  ;;  %v1429_v20 = vsel %vm678_vm1, %v1398_v16, -inf }
 0x719   : > { %1430 = vmax.xlane.f32.xlu0 %v1429_v20  ;;  %v1401_v21 = vpop.f32.mrb[35].mxu1  ;;  %v1438_v25 = vsel %vm678_vm1, %v4203_v19, -inf }
 0x71a   : > { %4185 = vmatmul.mubr.msk.bf16.vlgmr.msra.gmra.mrb[24].mxu0 %vm588_vm0, %v849_v60  ;;  %v1432_v22 = vsel %vm678_vm1, %v1401_v21, -inf }
 0x71b   : > { %4188 = vmatprep.mubr.msk.bf16.mxu0 %vm588_vm0, %v850_v6  ;;  %1433 = vmax.xlane.f32.xlu1 %v1432_v22 }
 0x71d   : > { %1436 = vmax.xlane.f32.xlu0 %v1435_v49 }
 0x71e   : > { %v4206_v61 = vpop.f32.mrb[36].mxu1 }
 0x71f   : > { %v1414_v62 = vpop.f32.mrb[37].mxu1  ;;  %v1447_v4 = vsel %vm678_vm1, %v4206_v61, -inf }
 0x720   : > { %v5617_v23 = vpop.f32.mrb[38].mxu1  ;;  %v1441_v60 = vsel %vm678_vm1, %v1414_v62, -inf }
 0x721   : > { %1439 = vmax.xlane.f32.xlu0 %v1438_v25  ;;  %v5620_v51 = vpop.f32.mrb[39].mxu1  ;;  %v1450_v0 = vsel %vm678_vm1, %v5617_v23, -inf }
 0x722   : > { %4189 = vmatmul.mubr.msk.bf16.gmra.mrb[28].mxu0 %vm588_vm0, %v851_v2  ;;  %v1444_v59 = vsel %vm678_vm1, %v5620_v51, -inf }
 0x723   : > { %1445 = vmax.xlane.f32.xlu1 %v1444_v59 }
 0x725   : > { %1442 = vmax.xlane.f32.xlu0 %v1441_v60 }
 0x727   : > { %1451 = vmax.xlane.f32.xlu1 %v1450_v0 }
 0x729   : > { %1448 = vmax.xlane.f32.xlu0 %v1447_v4 }
 0x736   : > { %v5632_v6 = vpop.f32.mrb[40].mxu1 }
 0x737   : > { %v5634_v28 = vpop.f32.mrb[41].mxu1  ;;  %v1818_v60 = vsel %vm678_vm1, %v5632_v6, -inf }
 0x738   : > { %v5636_v63 = vpop.f32.mrb[42].mxu1  ;;  %v1812_v59 = vsel %vm678_vm1, %v5634_v28, -inf }
 0x739   : > { %v5638_v1 = vpop.f32.mrb[43].mxu1  ;;  %v1821_v0 = vsel %vm678_vm1, %v5636_v63, -inf }
 0x73e   : > { %v5640_v2 = vpop.f32.mrb[44].mxu1 }
 0x73f   : > { %v5642_v17 = vpop.f32.mrb[45].mxu1 }
 0x740   : > { %v5644_v18 = vpop.f32.mrb[46].mxu1  ;;  %v1824_v4 = vsel %vm678_vm1, %v5642_v17, -inf }
 0x741   : > { %v5646_v30 = vpop.f32.mrb[47].mxu1 }
 0x7a6   : > { %v1431_v27 = vpop.xlane.xlu0 %1430 }
 0x7a7   : > { %v1453_v13 = vsub.f32 %v1398_v16, %v1431_v27  ;;  %v1830_v27 = vsel %vm678_vm1, %v5640_v2, -inf }
 0x7a8   : > { %v1434_v29 = vpop.xlane.xlu1 %1433 }
 0x7a9   : > { %v1461_v34 = vmul.f32 1.442695, %v1453_v13  ;;  %v1454_v35 = vsub.f32 %v1401_v21, %v1434_v29  ;;  %v1815_v13 = vsel %vm678_vm1, %v5638_v1, -inf }
 0x7aa   : > { %v1437_v9 = vpop.xlane.xlu0 %1436 }
 0x7ab   : > { %v1455_v32 = vsub.f32 %v4202_v15, %v1437_v9  ;;  %v1463_v41 = vmul.f32 1.442695, %v1454_v35  ;;  %v1827_v9 = vsel %vm678_vm1, %v5646_v30, -inf  ;;  %v1833_v35 = vsel %vm678_vm1, %v5644_v18, -inf }
 0x7ad   : > { %v1465_v36 = vmul.f32 1.442695, %v1455_v32 }
 0x7ae   : > { %v1440_v37 = vpop.xlane.xlu0 %1439 }
 0x7af   : > { %4721 = vpow2.f32 %v1465_v36  ;;  %v1456_v39 = vsub.f32 %v4203_v19, %v1440_v37 }
 0x7b0   : > { %4723 = vpow2.f32 %v1461_v34  ;;  %v1446_v19 = vpop.xlane.xlu1 %1445 }
 0x7b1   : > { %v1467_v42 = vmul.f32 1.442695, %v1456_v39  ;;  %v1458_v22 = vsub.f32 %v5620_v51, %v1446_v19 }
 0x7b2   : > { %v1443_v44 = vpop.xlane.xlu0 %1442 }
 0x7b3   : > { %4725 = vpow2.f32 %v1467_v42  ;;  %v1457_v46 = vsub.f32 %v1414_v62, %v1443_v44 }
 0x7b4   : > { %4727 = vpow2.f32 %v1463_v41  ;;  %v1452_v20 = vpop.xlane.xlu1 %1451 }
 0x7b5   : > { %v1469_v54 = vmul.f32 1.442695, %v1457_v46  ;;  %v1460_v21 = vsub.f32 %v5617_v23, %v1452_v20 }
 0x7b6   : > { %v1449_v48 = vpop.xlane.xlu0 %1448 }
 0x7b7   : > { %v1459_v50 = vsub.f32 %v4206_v61, %v1449_v48  ;;  %v1475_v49 = vmul.f32 1.442695, %v1460_v21  ;;  %v1471_v61 = vmul.f32 1.442695, %v1458_v22 }
 0x7b9   : > { %v5648_v53 = vpop.eup %4721  ;;  %v1473_v55 = vmul.f32 1.442695, %v1459_v50 }
 0x7ba   : > { %v1483_v56 = vsel %vm678_vm1, %v5648_v53, 0.0  ;;  %v5652_v5 = vpop.eup %4723 }
 0x7bb   : > { %4729 = vpow2.f32 %v1473_v55  ;;  %1484 = vadd.xlane.f32.xlu0 %v1483_v56  ;;  %v1477_v52 = vsel %vm678_vm1, %v5652_v5, 0.0 }
 0x7bc   : > { %4731 = vpow2.f32 %v1469_v54 }
 0x7bd   : > { %v5654_v8 = vpop.eup %4725  ;;  %4733 = vpow2.f32 %v1475_v49 }
 0x7be   : > { %v1486_v43 = vsel %vm678_vm1, %v5654_v8, 0.0  ;;  %v5660_v3 = vpop.eup %4727  ;;  %4735 = vpow2.f32 %v1471_v61 }
 0x7bf   : > { %1478 = vadd.xlane.f32.xlu0 %v1477_v52  ;;  %1487 = vadd.xlane.f32.xlu1 %v1486_v43  ;;  %v1480_v7 = vsel %vm678_vm1, %v5660_v3, 0.0 }
 0x7c3   : > { %1481 = vadd.xlane.f32.xlu1 %v1480_v7 }
 0x7c5   : > { %v5664_v10 = vpop.eup %4729 }
 0x7c6   : > { %v1495_v11 = vsel %vm678_vm1, %v5664_v10, 0.0  ;;  %v5668_v15 = vpop.eup %4731 }
 0x7c7   : > { %1496 = vadd.xlane.f32.xlu0 %v1495_v11  ;;  %v1489_v16 = vsel %vm678_vm1, %v5668_v15, 0.0  ;;  %v5688_v62 = vpop.eup %4733 }
 0x7c8   : > { %v1498_v23 = vsel %vm678_vm1, %v5688_v62, 0.0  ;;  %v5692_v25 = vpop.eup %4735 }
 0x7c9   : > { %v1492_v51 = vsel %vm678_vm1, %v5692_v25, 0.0 }
 0x7cb   : > { %1490 = vadd.xlane.f32.xlu0 %v1489_v16 }
 0x7d4   : > { %1523 = vrot.lane.b32.xlu1 %v5376_v12, %s5080_s23 }
 0x7d8   : > { %1525 = vrot.lane.b32.xlu1 %v5402_v57, %s5080_s23 }
 0x7e1   : > { %1521 = vrot.lane.b32.xlu0 %v5378_v14, %s5080_s23 }
 0x7e5   : > { %2098 = vrot.lane.b32.xlu0 %v5321_v26, %s5082_s8 }
 0x7e9   : > { %2102 = vrot.lane.b32.xlu0 %v5339_v40, %s5082_s8 }
 0x7ed   : > { %2090 = vrot.lane.b32.xlu0 %v5319_v24, %s5082_s8 }
 0x7f1   : > { %2094 = vrot.lane.b32.xlu0 %v5337_v38, %s5082_s8 }
 0x7fc   : > { %1499 = vadd.xlane.f32.xlu1 %v1498_v23 }
 0x800   : > { %1493 = vadd.xlane.f32.xlu1 %v1492_v51 }
 0x810   : > { %1813 = vmax.xlane.f32.xlu0 %v1812_v59 }
 0x811   : > { %1527 = vrot.lane.b32.xlu1 %v5408_v58, %s5080_s23  ;;  %s5086_s23 = smov [#allocation8]  }
 0x814   : > { %1819 = vmax.xlane.f32.xlu0 %v1818_v60 }
 0x815   : > { %2100 = vrot.lane.b32.xlu1 %v5331_v33, %s5082_s8 }
 0x818   : > { %1822 = vmax.xlane.f32.xlu0 %v1821_v0 }
 0x819   : > { %2104 = vrot.lane.b32.xlu1 %v5347_v47, %s5082_s8 }
 0x81c   : > { %1825 = vmax.xlane.f32.xlu0 %v1824_v4 }
 0x81d   : > { %2092 = vrot.lane.b32.xlu1 %v5329_v31, %s5082_s8 }
 0x820   : > { %1831 = vmax.xlane.f32.xlu0 %v1830_v27 }
 0x821   : > { %2096 = vrot.lane.b32.xlu1 %v5345_v45, %s5082_s8 }
 0x845   : > { %1816 = vmax.xlane.f32.xlu1 %v1815_v13 }
 0x848   : > { %v1485_v29 = vpop.xlane.xlu0 %1484 }
 0x849   : > { %1828 = vmax.xlane.f32.xlu1 %v1827_v9 }
 0x84c   : > { %v1479_v32 = vpop.xlane.xlu0 %1478  ;;  %v1488_v34 = vpop.xlane.xlu1 %1487 }
 0x84d   : > { %1834 = vmax.xlane.f32.xlu1 %v1833_v35  ;;  %4737 = vrcp.f32 %v1479_v32 }
 0x850   : > { %v1482_v36 = vpop.xlane.xlu1 %1481 }
 0x851   : > { %4739 = vrcp.f32 %v1482_v36 }
 0x852   : > { %4741 = vrcp.f32 %v1488_v34 }
 0x853   : > { %4743 = vrcp.f32 %v1485_v29 }
 0x854   : > { %v1497_v37 = vpop.xlane.xlu0 %1496  ;;  %v1524_v44 = vpop.permute.xlu1 %1523 }
 0x857   : > { %v4738_v41 = vpop.eup %4737 }
 0x858   : > { %v1491_v39 = vpop.xlane.xlu0 %1490  ;;  %v1509_v48 = vmul.f32 %v4738_v41, %v5652_v5  ;;  %v1526_v52 = vpop.permute.xlu1 %1525 }
 0x85b   : > { %v4740_v42 = vpop.eup %4739 }
 0x85c   : > { %v1522_v46 = vpop.permute.xlu0 %1521  ;;  %v1510_v50 = vmul.f32 %v4740_v42, %v5660_v3  ;;  %v4742_v7 = vpop.eup %4741 }
 0x85d   : > { %4208 = vmatprep.subr.bf16.mxu0 %v1522_v46  ;;  %v4744_v16 = vpop.eup %4743  ;;  %v1512_v19 = vmul.f32 %v4742_v7, %v5654_v8 }
 0x85e   : > { %4209 = vmatpush3.bf16.msra.mxu0 %v1522_v46  ;;  %v1517_v54 = vpack.c.bf16 %v1510_v50, %v1509_v48  ;;  %v1511_v21 = vmul.f32 %v4744_v16, %v5648_v53 }
 0x85f   : > { %4210 = vmatprep.subr.bf16.mxu0 %v1524_v44 }
 0x860   : > { %v2099_v55 = vpop.permute.xlu0 %2098  ;;  %4216 = vmatprep.mubr.msk.bf16.mxu0 %vm678_vm1, %v1517_v54  ;;  %v1518_v22 = vpack.c.bf16 %v1512_v19, %v1511_v21 }
 0x861   : > { %4516 = vmatprep.subr.msk.bf16.mxu1 %vm588_vm0, %v2099_v55  ;;  %v2119_v56 = vsel %vm588_vm0, %v2099_v55, 0 }
 0x862   : > { %4211 = vmatpush3.bf16.msra.mxu0 %v1524_v44  ;;  %4277 = vmatpush3.bf16.xpose.msra.mxu1 %v2119_v56 }
 0x863   : > { %4212 = vmatprep.subr.bf16.mxu0 %v1526_v52 }
 0x864   : > { %v2103_v43 = vpop.permute.xlu0 %2102 }
 0x865   : > { %v2125_v32 = vsel %vm588_vm0, %v2103_v43, 0 }
 0x866   : > { %4213 = vmatpush3.bf16.msra.mxu0 %v1526_v52 }
 0x868   : > { %v2091_v5 = vpop.permute.xlu0 %2090 }
 0x869   : > { %4284 = vmatprep.mubr.msk.bf16.mxu1 %vm588_vm0, %v2091_v5 }
 0x86c   : > { %v2095_v53 = vpop.permute.xlu0 %2094 }
 0x889   : > { %v1500_v3 = vpop.xlane.xlu1 %1499 }
 0x88a   : > { %4745 = vrcp.f32 %v1500_v3 }
 0x88b   : > { %4747 = vrcp.f32 %v1491_v39 }
 0x88c   : > { %4749 = vrcp.f32 %v1497_v37 }
 0x88d   : > { %v1494_v11 = vpop.xlane.xlu1 %1493 }
 0x88e   : > { %4751 = vrcp.f32 %v1494_v11  ;;  %v4651_v11 = vld [vmem:[#allocation7 + $0x10] sm:$0xff]  }
 0x891   : > { %v1528_v20 = vpop.permute.xlu1 %1527 }
 0x892   : > { %4214 = vmatprep.subr.bf16.mxu0 %v1528_v20 }
 0x893   : > { %4215 = vmatpush3.bf16.msra.mxu0 %v1528_v20 }
 0x894   : > { %v4746_v49 = vpop.eup %4745  ;;  %4224 = vmatprep.subr.bf16.mxu0 %v4651_v11 }
 0x895   : > { %v2101_v61 = vpop.permute.xlu1 %2100  ;;  %v4748_v23 = vpop.eup %4747  ;;  %v1516_v8 = vmul.f32 %v4746_v49, %v5688_v62 }
 0x896   : > { %4217 = vmatmul.mubr.msk.bf16.vlgmr.msra.gmra.mrb[32].mxu0 %vm678_vm1, %v1518_v22  ;;  %4517 = vmatprep.subr.msk.bf16.mxu1 %vm588_vm0, %v2101_v61  ;;  %v2122_v51 = vsel %vm588_vm0, %v2101_v61, 0  ;;  %v4750_v59 = vpop.eup %4749  ;;  %v1513_v0 = vmul.f32 %v4748_v23, %v5668_v15 }
 0x897   : > { %4279 = vmatpush3.bf16.xpose.msra.mxu1 %v2122_v51  ;;  %v1515_v27 = vmul.f32 %v4750_v59, %v5664_v10  ;;  %4225 = vmatpush3.bf16.msra.mxu0 %v4651_v11 }
 0x898   : > { %v4752_v60 = vpop.eup %4751  ;;  %4518 = vmatprep.subr.msk.bf16.mxu1 %vm588_vm0, %v2103_v43 }
 0x899   : > { %v1514_v4 = vmul.f32 %v4752_v60, %v5692_v25  ;;  %v1520_v29 = vpack.c.bf16 %v1516_v8, %v1515_v27  ;;  %v2105_v34 = vpop.permute.xlu1 %2104 }
 0x89a   : > { %v2128_v39 = vsel %vm588_vm0, %v2105_v34, 0 }
 0x89b   : > { %v1519_v13 = vpack.c.bf16 %v1514_v4, %v1513_v0 }
 0x89d   : > { %v1814_v9 = vpop.xlane.xlu0 %1813  ;;  %4220 = vmatprep.mubr.msk.bf16.mxu0 %vm678_vm1, %v1519_v13  ;;  %v2093_v44 = vpop.permute.xlu1 %2092 }
 0x89e   : > { %4221 = vmatmul.mubr.msk.bf16.gmra.mrb[36].mxu0 %vm678_vm1, %v1520_v29  ;;  %v1836_v62 = vsub.f32 %v5634_v28, %v1814_v9 }
 0x89f   : > { %4281 = vmatpush3.bf16.xpose.msra.mxu1 %v2125_v32 }
 0x8a0   : > { %4519 = vmatprep.subr.msk.bf16.mxu1 %vm588_vm0, %v2105_v34  ;;  %v1844_v35 = vmul.f32 1.442695, %v1836_v62 }
 0x8a1   : > { %v1820_v15 = vpop.xlane.xlu0 %1819  ;;  %v2097_v52 = vpop.permute.xlu1 %2096 }
 0x8a2   : > { %v1838_v25 = vsub.f32 %v5632_v6, %v1820_v15 }
 0x8a4   : > { %v1848_v10 = vmul.f32 1.442695, %v1838_v25 }
 0x8a5   : > { %v1823_v36 = vpop.xlane.xlu0 %1822 }
 0x8a6   : > { %4753 = vpow2.f32 %v1848_v10  ;;  %v1839_v37 = vsub.f32 %v5636_v63, %v1823_v36 }
 0x8a7   : > { %4283 = vmatpush3.bf16.xpose.msra.mxu1 %v2128_v39  ;;  %4755 = vpow2.f32 %v1844_v35 }
 0x8a8   : > { %v1850_v41 = vmul.f32 1.442695, %v1839_v37 }
 0x8a9   : > { %v1826_v42 = vpop.xlane.xlu0 %1825 }
 0x8aa   : > { %4757 = vpow2.f32 %v1850_v41  ;;  %v1840_v28 = vsub.f32 %v5642_v17, %v1826_v42 }
 0x8ac   : > { %v1852_v63 = vmul.f32 1.442695, %v1840_v28 }
 0x8ad   : > { %v1832_v46 = vpop.xlane.xlu0 %1831 }
 0x8ae   : > { %v1842_v48 = vsub.f32 %v5640_v2, %v1832_v46  ;;  %4285 = vmatmul.mubr.msk.bf16.vlgmr.msra.gmra.mrb[48].mxu1 %vm588_vm0, %v2093_v44 }
 0x8af   : > { %4288 = vmatprep.mubr.msk.bf16.mxu1 %vm588_vm0, %v2095_v53 }
 0x8b0   : > { %v5750_v6 = vpop.eup %4753  ;;  %v1856_v50 = vmul.f32 1.442695, %v1842_v48 }
 0x8b1   : > { %v1866_v54 = vsel %vm678_vm1, %v5750_v6, 0.0  ;;  %v5754_v55 = vpop.eup %4755 }
 0x8b2   : > { %4759 = vpow2.f32 %v1856_v50  ;;  %1867 = vadd.xlane.f32.xlu0 %v1866_v54  ;;  %v1860_v2 = vsel %vm678_vm1, %v5754_v55, 0.0 }
 0x8b3   : > { %4761 = vpow2.f32 %v1852_v63 }
 0x8b4   : > { %v5756_v17 = vpop.eup %4757 }
 0x8b5   : > { %v1869_v56 = vsel %vm678_vm1, %v5756_v17, 0.0 }
 0x8b6   : > { %1861 = vadd.xlane.f32.xlu0 %v1860_v2  ;;  %1870 = vadd.xlane.f32.xlu1 %v1869_v56 }
 0x8b7   : > { %4289 = vmatmul.mubr.msk.bf16.gmra.mrb[52].mxu1 %vm588_vm0, %v2097_v52 }
 0x8bc   : > { %v5763_v43 = vpop.eup %4759 }
 0x8bd   : > { %v1878_v5 = vsel %vm678_vm1, %v5763_v43, 0.0  ;;  %v5767_v3 = vpop.eup %4761 }
 0x8be   : > { %1879 = vadd.xlane.f32.xlu0 %v1878_v5  ;;  %v1872_v7 = vsel %vm678_vm1, %v5767_v3, 0.0 }
 0x8c2   : > { %1873 = vadd.xlane.f32.xlu0 %v1872_v7 }
 0x8d2   : > { %v1817_v16 = vpop.xlane.xlu1 %1816 }
 0x8d3   : > { %v1837_v19 = vsub.f32 %v5638_v1, %v1817_v16 }
 0x8d5   : > { %v1846_v20 = vmul.f32 1.442695, %v1837_v19 }
 0x8d6   : > { %v1829_v1 = vpop.xlane.xlu1 %1828 }
 0x8d7   : > { %4763 = vpow2.f32 %v1846_v20  ;;  %v1841_v23 = vsub.f32 %v5646_v30, %v1829_v1 }
 0x8d8   : > { %1904 = vrot.lane.b32.xlu0 %v5378_v14, %s5081_s7 }
 0x8d9   : > { %v1854_v59 = vmul.f32 1.442695, %v1841_v23 }
 0x8da   : > { %v1835_v49 = vpop.xlane.xlu1 %1834 }
 0x8db   : > { %v1843_v61 = vsub.f32 %v5644_v18, %v1835_v49 }
 0x8dc   : > { %2481 = vrot.lane.b32.xlu0 %v5321_v26, %s5083_s30 }
 0x8dd   : > { %v1858_v51 = vmul.f32 1.442695, %v1843_v61 }
 0x8df   : > { %4765 = vpow2.f32 %v1858_v51 }
 0x8e0   : > { %2485 = vrot.lane.b32.xlu0 %v5339_v40, %s5083_s30  ;;  %4767 = vpow2.f32 %v1854_v59 }
 0x8e1   : > { %v5778_v21 = vpop.eup %4763 }
 0x8e2   : > { %v1863_v22 = vsel %vm678_vm1, %v5778_v21, 0.0 }
 0x8e3   : > { %1864 = vadd.xlane.f32.xlu1 %v1863_v22 }
 0x8e4   : > { %2473 = vrot.lane.b32.xlu0 %v5319_v24, %s5083_s30 }
 0x8e8   : > { %2477 = vrot.lane.b32.xlu0 %v5337_v38, %s5083_s30 }
 0x8e9   : > { %v5792_v60 = vpop.eup %4765 }
 0x8ea   : > { %v1881_v8 = vsel %vm678_vm1, %v5792_v60, 0.0  ;;  %v5796_v53 = vpop.eup %4767 }
 0x8eb   : > { %v1875_v0 = vsel %vm678_vm1, %v5796_v53, 0.0 }
 0x8f4   : > { %1906 = vrot.lane.b32.xlu1 %v5376_v12, %s5081_s7 }
 0x8f8   : > { %1908 = vrot.lane.b32.xlu1 %v5402_v57, %s5081_s7 }
 0x91c   : > { %1882 = vadd.xlane.f32.xlu1 %v1881_v8 }
 0x920   : > { %1876 = vadd.xlane.f32.xlu1 %v1875_v0 }
 0x931   : > { %1910 = vrot.lane.b32.xlu1 %v5408_v58, %s5081_s7  ;;  %s5003_s7 = sshll.u32 %s5086_s23, 4  ;;  %s5004_s7 = int_to_ptr.vmem [resolvable:$false] %s5003_s7 }
 0x932   : > { %p5006_p5 = scmp.lt.s32.totalorder %s6299_s5, %s5004_s7 }
 0x935   : > { %2483 = vrot.lane.b32.xlu1 %v5331_v33, %s5083_s30 }
 0x939   : > { %2487 = vrot.lane.b32.xlu1 %v5347_v47, %s5083_s30 }
 0x93d   : > { %2475 = vrot.lane.b32.xlu1 %v5329_v31, %s5083_s30 }
 0x93f   : > { %v5808_v18 = vpop.xlane.xlu0 %1867 }
 0x941   : > { %2479 = vrot.lane.b32.xlu1 %v5345_v45, %s5083_s30 }
 0x943   : > { %v1862_v30 = vpop.xlane.xlu0 %1861  ;;  %v1871_v35 = vpop.xlane.xlu1 %1870 }
 0x944   : > { %4769 = vrcp.f32 %v1862_v30 }
 0x94b   : > { %v5812_v4 = vpop.xlane.xlu0 %1879 }
 0x94e   : > { %v4770_v54 = vpop.eup %4769 }
 0x94f   : > { %v5814_v27 = vpop.xlane.xlu0 %1873  ;;  %v1892_v56 = vmul.f32 %v4770_v54, %v5754_v55 }
 0x953   : > { %v1905_v13 = vpop.permute.xlu0 %1904 }
 0x954   : > { %4250 = vmatprep.subr.bf16.mxu0 %v1905_v13 }
 0x957   : > { %v2482_v29 = vpop.permute.xlu0 %2481 }
 0x958   : > { %4520 = vmatprep.subr.msk.bf16.mxu1 %vm588_vm0, %v2482_v29  ;;  %v2502_v9 = vsel %vm588_vm0, %v2482_v29, 0 }
 0x959   : > { %4319 = vmatpush3.bf16.xpose.msra.mxu1 %v2502_v9 }
 0x95b   : > { %v5818_v32 = vpop.permute.xlu0 %2485 }
 0x95f   : > { %v2474_v34 = vpop.permute.xlu0 %2473 }
 0x960   : > { %4326 = vmatprep.mubr.msk.bf16.mxu1 %vm588_vm0, %v2474_v34 }
 0x969   : > { %v4218_v62 = vpop.f32.mrb[32].mxu0 }
 0x96a   : > { %v1579_v15 = vpop.f32.mrb[33].mxu0 }
 0x96b   : > { %v4219_v25 = vpop.f32.mrb[34].mxu0 }
 0x96c   : > { %v1611_v10 = vpack.c.bf16 %v4219_v25, %v4218_v62  ;;  %v1582_v36 = vpop.f32.mrb[35].mxu0 }
 0x96d   : > { %v1610_v37 = vpack.c.bf16 %v1582_v36, %v1579_v15 }
 0x96f   : > { %4226 = vmatprep.mubr.msk.bf16.mxu0 %vm588_vm0, %v1610_v37 }
 0x970   : > { %4227 = vmatmul.mubr.msk.bf16.vlgmr.msra.gmra.mrb[24].mxu0 %vm588_vm0, %v1611_v10  ;;  %v1865_v39 = vpop.xlane.xlu1 %1864 }
 0x971   : > { %4251 = vmatpush3.bf16.msra.mxu0 %v1905_v13  ;;  %4771 = vrcp.f32 %v1865_v39  ;;  %v4222_v41 = vpop.f32.mrb[36].mxu0 }
 0x972   : > { %v1595_v42 = vpop.f32.mrb[37].mxu0  ;;  %4773 = vrcp.f32 %v1871_v35 }
 0x973   : > { %v4223_v28 = vpop.f32.mrb[38].mxu0  ;;  %4775 = vrcp.f32 %v5808_v18 }
 0x974   : > { %v1613_v44 = vpack.c.bf16 %v4223_v28, %v4222_v41  ;;  %v1598_v46 = vpop.f32.mrb[39].mxu0  ;;  %v1907_v48 = vpop.permute.xlu1 %1906  ;;  %v2508_v28 = vsel %vm588_vm0, %v5818_v32, 0 }
 0x975   : > { %v1612_v63 = vpack.c.bf16 %v1598_v46, %v1595_v42  ;;  %4252 = vmatprep.subr.bf16.mxu0 %v1907_v48  ;;  %v4652_v46 = vld [vmem:[#allocation7 + $0x18] sm:$0xff]  }
 0x976   : > { %4253 = vmatpush3.bf16.msra.mxu0 %v1907_v48 }
 0x977   : > { %4230 = vmatprep.mubr.msk.bf16.mxu0 %vm588_vm0, %v1612_v63 }
 0x978   : > { %4231 = vmatmul.mubr.msk.bf16.gmra.mrb[28].mxu0 %vm588_vm0, %v1613_v44  ;;  %v1909_v50 = vpop.permute.xlu1 %1908 }
 0x979   : > { %4254 = vmatprep.subr.bf16.mxu0 %v1909_v50 }
 0x97a   : > { %4255 = vmatpush3.bf16.msra.mxu0 %v1909_v50 }
 0x97b   : > { %v4772_v2 = vpop.eup %4771 }
 0x97c   : > { %v1893_v52 = vmul.f32 %v4772_v2, %v5778_v21  ;;  %v4774_v13 = vpop.eup %4773 }
 0x97d   : > { %v4776_v9 = vpop.eup %4775  ;;  %v1895_v34 = vmul.f32 %v4774_v13, %v5756_v17 }
 0x97e   : > { %v1900_v5 = vpack.c.bf16 %v1893_v52, %v1892_v56  ;;  %v1894_v15 = vmul.f32 %v4776_v9, %v5750_v6 }
 0x980   : > { %4258 = vmatprep.mubr.msk.bf16.mxu0 %vm678_vm1, %v1900_v5  ;;  %v1901_v25 = vpack.c.bf16 %v1895_v34, %v1894_v15 }
 0x981   : > { %v5828_v7 = vpop.f32.mrb[48].mxu1 }
 0x982   : > { %v5830_v11 = vpop.f32.mrb[49].mxu1  ;;  %v2201_v21 = vsel %vm678_vm1, %v5828_v7, -inf }
 0x983   : > { %v5832_v16 = vpop.f32.mrb[50].mxu1  ;;  %v2195_v19 = vsel %vm678_vm1, %v5830_v11, -inf }
 0x984   : > { %2196 = vmax.xlane.f32.xlu0 %v2195_v19  ;;  %v5836_v20 = vpop.f32.mrb[51].mxu1  ;;  %v2204_v49 = vsel %vm678_vm1, %v5832_v16, -inf }
 0x985   : > { %v2198_v55 = vsel %vm678_vm1, %v5836_v20, -inf }
 0x986   : > { %2199 = vmax.xlane.f32.xlu1 %v2198_v55 }
 0x988   : > { %2202 = vmax.xlane.f32.xlu0 %v2201_v21 }
 0x98a   : > { %v5842_v22 = vpop.f32.mrb[52].mxu1 }
 0x98b   : > { %v5844_v1 = vpop.f32.mrb[53].mxu1  ;;  %v2213_v0 = vsel %vm678_vm1, %v5842_v22, -inf }
 0x98c   : > { %v5848_v61 = vpop.f32.mrb[54].mxu1  ;;  %2205 = vmax.xlane.f32.xlu0 %v2204_v49  ;;  %v2207_v59 = vsel %vm678_vm1, %v5844_v1, -inf }
 0x98d   : > { %v5850_v23 = vpop.f32.mrb[55].mxu1  ;;  %v2216_v8 = vsel %vm678_vm1, %v5848_v61, -inf }
 0x98e   : > { %v2210_v51 = vsel %vm678_vm1, %v5850_v23, -inf }
 0x98f   : > { %2211 = vmax.xlane.f32.xlu1 %v2210_v51 }
 0x990   : > { %2208 = vmax.xlane.f32.xlu0 %v2207_v59 }
 0x993   : > { %2217 = vmax.xlane.f32.xlu1 %v2216_v8 }
 0x994   : > { %2214 = vmax.xlane.f32.xlu0 %v2213_v0 }
 0x9a9   : > { %v1883_v30 = vpop.xlane.xlu1 %1882 }
 0x9aa   : > { %4777 = vrcp.f32 %v1883_v30 }
 0x9ab   : > { %4779 = vrcp.f32 %v5814_v27 }
 0x9ac   : > { %4781 = vrcp.f32 %v5812_v4 }
 0x9ad   : > { %v1877_v29 = vpop.xlane.xlu1 %1876 }
 0x9ae   : > { %4783 = vrcp.f32 %v1877_v29 }
 0x9b1   : > { %v1911_v62 = vpop.permute.xlu1 %1910 }
 0x9b2   : > { %4256 = vmatprep.subr.bf16.mxu0 %v1911_v62 }
 0x9b3   : > { %4257 = vmatpush3.bf16.msra.mxu0 %v1911_v62 }
 0x9b4   : > { %v4778_v35 = vpop.eup %4777  ;;  %4266 = vmatprep.subr.bf16.mxu0 %v4652_v46 }
 0x9b5   : > { %v2484_v18 = vpop.permute.xlu1 %2483  ;;  %v4780_v10 = vpop.eup %4779  ;;  %v1899_v6 = vmul.f32 %v4778_v35, %v5792_v60 }
 0x9b6   : > { %4259 = vmatmul.mubr.msk.bf16.vlgmr.msra.gmra.mrb[40].mxu0 %vm678_vm1, %v1901_v25  ;;  %4521 = vmatprep.subr.msk.bf16.mxu1 %vm588_vm0, %v2484_v18  ;;  %v2505_v4 = vsel %vm588_vm0, %v2484_v18, 0  ;;  %v4782_v27 = vpop.eup %4781  ;;  %v1896_v17 = vmul.f32 %v4780_v10, %v5767_v3 }
 0x9b7   : > { %4321 = vmatpush3.bf16.xpose.msra.mxu1 %v2505_v4  ;;  %v1898_v39 = vmul.f32 %v4782_v27, %v5763_v43  ;;  %4267 = vmatpush3.bf16.msra.mxu0 %v4652_v46 }
 0x9b8   : > { %v4784_v36 = vpop.eup %4783  ;;  %4522 = vmatprep.subr.msk.bf16.mxu1 %vm588_vm0, %v5818_v32 }
 0x9b9   : > { %v1897_v37 = vmul.f32 %v4784_v36, %v5796_v53  ;;  %v1903_v42 = vpack.c.bf16 %v1899_v6, %v1898_v39  ;;  %v2488_v44 = vpop.permute.xlu1 %2487  ;;  %v2478_v53 = vpop.permute.xlu0 %2477 }
 0x9ba   : > { %v2511_v60 = vsel %vm588_vm0, %v2488_v44, 0 }
 0x9bb   : > { %v1902_v41 = vpack.c.bf16 %v1897_v37, %v1896_v17 }
 0x9bd   : > { %4262 = vmatprep.mubr.msk.bf16.mxu0 %vm678_vm1, %v1902_v41  ;;  %v2476_v3 = vpop.permute.xlu1 %2475 }
 0x9be   : > { %4263 = vmatmul.mubr.msk.bf16.gmra.mrb[44].mxu0 %vm678_vm1, %v1903_v42 }
 0x9bf   : > { %4323 = vmatpush3.bf16.xpose.msra.mxu1 %v2508_v28 }
 0x9c0   : > { %4523 = vmatprep.subr.msk.bf16.mxu1 %vm588_vm0, %v2488_v44 }
 0x9c1   : > { %v2480_v43 = vpop.permute.xlu1 %2479 }
 0x9c7   : > { %4325 = vmatpush3.bf16.xpose.msra.mxu1 %v2511_v60 }
 0x9ce   : > { %4327 = vmatmul.mubr.msk.bf16.vlgmr.msra.gmra.mrb[56].mxu1 %vm588_vm0, %v2476_v3 }
 0x9cf   : > { %4330 = vmatprep.mubr.msk.bf16.mxu1 %vm588_vm0, %v2478_v53 }
 0x9d6   : > { %4331 = vmatmul.mubr.msk.bf16.gmra.mrb[60].mxu1 %vm588_vm0, %v2480_v43 }
 0xa11   : > { %v2197_v32 = vpop.xlane.xlu0 %2196 }
 0xa12   : > { %v2219_v48 = vsub.f32 %v5830_v11, %v2197_v32 }
 0xa13   : > { %v2200_v63 = vpop.xlane.xlu1 %2199 }
 0xa14   : > { %v2227_v2 = vmul.f32 1.442695, %v2219_v48  ;;  %v2220_v56 = vsub.f32 %v5836_v20, %v2200_v63 }
 0xa15   : > { %v2203_v50 = vpop.xlane.xlu0 %2202 }
 0xa16   : > { %v2221_v54 = vsub.f32 %v5828_v7, %v2203_v50  ;;  %v2229_v55 = vmul.f32 1.442695, %v2220_v56 }
 0xa18   : > { %v2231_v52 = vmul.f32 1.442695, %v2221_v54 }
 0xa19   : > { %v2206_v5 = vpop.xlane.xlu0 %2205 }
 0xa1a   : > { %4785 = vpow2.f32 %v2231_v52  ;;  %v2222_v19 = vsub.f32 %v5832_v16, %v2206_v5 }
 0xa1b   : > { %4787 = vpow2.f32 %v2227_v2 }
 0xa1c   : > { %v2233_v21 = vmul.f32 1.442695, %v2222_v19  ;;  %v2212_v25 = vpop.xlane.xlu1 %2211 }
 0xa1d   : > { %v2209_v49 = vpop.xlane.xlu0 %2208  ;;  %v2224_v10 = vsub.f32 %v5850_v23, %v2212_v25 }
 0xa1e   : > { %4789 = vpow2.f32 %v2233_v21  ;;  %v2223_v11 = vsub.f32 %v5844_v1, %v2209_v49 }
 0xa1f   : > { %4791 = vpow2.f32 %v2229_v55  ;;  %v2237_v27 = vmul.f32 1.442695, %v2224_v10 }
 0xa20   : > { %v2235_v8 = vmul.f32 1.442695, %v2223_v11  ;;  %v2218_v35 = vpop.xlane.xlu1 %2217 }
 0xa21   : > { %v2215_v51 = vpop.xlane.xlu0 %2214  ;;  %v2226_v18 = vsub.f32 %v5848_v61, %v2218_v35 }
 0xa22   : > { %v2225_v59 = vsub.f32 %v5842_v22, %v2215_v51 }
 0xa23   : > { %v2241_v4 = vmul.f32 1.442695, %v2226_v18 }
 0xa24   : > { %v5889_v7 = vpop.eup %4785  ;;  %v2239_v20 = vmul.f32 1.442695, %v2225_v59 }
 0xa25   : > { %v2249_v0 = vsel %vm678_vm1, %v5889_v7, 0.0  ;;  %v5893_v30 = vpop.eup %4787 }
 0xa26   : > { %4793 = vpow2.f32 %v2239_v20  ;;  %2250 = vadd.xlane.f32.xlu0 %v2249_v0  ;;  %v2243_v1 = vsel %vm678_vm1, %v5893_v30, 0.0 }
 0xa27   : > { %4795 = vpow2.f32 %v2235_v8 }
 0xa28   : > { %v5895_v16 = vpop.eup %4789  ;;  %4797 = vpow2.f32 %v2241_v4 }
 0xa29   : > { %v2252_v22 = vsel %vm678_vm1, %v5895_v16, 0.0  ;;  %v5901_v13 = vpop.eup %4791  ;;  %4799 = vpow2.f32 %v2237_v27 }
 0xa2a   : > { %2244 = vadd.xlane.f32.xlu0 %v2243_v1  ;;  %2253 = vadd.xlane.f32.xlu1 %v2252_v22  ;;  %v2246_v29 = vsel %vm678_vm1, %v5901_v13, 0.0 }
 0xa2e   : > { %2247 = vadd.xlane.f32.xlu1 %v2246_v29 }
 0xa30   : > { %v5905_v9 = vpop.eup %4793 }
 0xa31   : > { %v2261_v34 = vsel %vm678_vm1, %v5905_v9, 0.0  ;;  %v5909_v62 = vpop.eup %4795 }
 0xa32   : > { %2262 = vadd.xlane.f32.xlu0 %v2261_v34  ;;  %v2255_v15 = vsel %vm678_vm1, %v5909_v62, 0.0  ;;  %v5929_v36 = vpop.eup %4797 }
 0xa33   : > { %v2264_v61 = vsel %vm678_vm1, %v5929_v36, 0.0  ;;  %v5933_v6 = vpop.eup %4799 }
 0xa34   : > { %v2258_v23 = vsel %vm678_vm1, %v5933_v6, 0.0 }
 0xa36   : > { %2256 = vadd.xlane.f32.xlu0 %v2255_v15 }
 0xa3f   : > { %2289 = vrot.lane.b32.xlu1 %v5376_v12, %s5082_s8 }
 0xa43   : > { %2291 = vrot.lane.b32.xlu1 %v5402_v57, %s5082_s8 }
 0xa4c   : > { %2287 = vrot.lane.b32.xlu0 %v5378_v14, %s5082_s8 }
 0xa50   : > { %2864 = vrot.lane.b32.xlu0 %v5321_v26, %s5084_s6 }
 0xa54   : > { %2868 = vrot.lane.b32.xlu0 %v5339_v40, %s5084_s6 }
 0xa58   : > { %2856 = vrot.lane.b32.xlu0 %v5319_v24, %s5084_s6 }
 0xa5c   : > { %2860 = vrot.lane.b32.xlu0 %v5337_v38, %s5084_s6 }
 0xa67   : > { %2265 = vadd.xlane.f32.xlu1 %v2264_v61 }
 0xa6b   : > { %2259 = vadd.xlane.f32.xlu1 %v2258_v23 }
 0xa7c   : > { %2293 = vrot.lane.b32.xlu1 %v5408_v58, %s5082_s8  ;;  %s5005_s8 = scalar_lea.vmem %s5004_s7, 2048 }
 0xa7d   : > { %p5007_p9 = scmp.lt.s32.totalorder %s5005_s8, %s4999_s21 }
 0xa7f   : > { %p5008_p12 = por %p5007_p9, %p5006_p5 }
 0xa80   : > { %2866 = vrot.lane.b32.xlu1 %v5331_v33, %s5084_s6 }
 0xa81   : > { %p5009_p2 = pnand %p5008_p12, %p5002_p3 }
 0xa84   : > { %2870 = vrot.lane.b32.xlu1 %v5347_v47, %s5084_s6 }
 0xa88   : > { %2858 = vrot.lane.b32.xlu1 %v5329_v31, %s5084_s6 }
 0xa89   : > { %v4260_v17 = vpop.f32.mrb[40].mxu0 }
 0xa8a   : > { %v1962_v37 = vpop.f32.mrb[41].mxu0 }
 0xa8b   : > { %v4261_v39 = vpop.f32.mrb[42].mxu0 }
 0xa8c   : > { %v1994_v41 = vpack.c.bf16 %v4261_v39, %v4260_v17  ;;  %v1965_v42 = vpop.f32.mrb[43].mxu0  ;;  %2862 = vrot.lane.b32.xlu1 %v5345_v45, %s5084_s6 }
 0xa8d   : > { %v1993_v28 = vpack.c.bf16 %v1965_v42, %v1962_v37 }
 0xa8f   : > { %4268 = vmatprep.mubr.msk.bf16.mxu0 %vm588_vm0, %v1993_v28 }
 0xa90   : > { %4269 = vmatmul.mubr.msk.bf16.vlgmr.msra.gmra.mrb[24].mxu0 %vm588_vm0, %v1994_v41 }
 0xa91   : > { %v4264_v44 = vpop.f32.mrb[44].mxu0 }
 0xa92   : > { %v1978_v60 = vpop.f32.mrb[45].mxu0 }
 0xa93   : > { %v4265_v3 = vpop.f32.mrb[46].mxu0 }
 0xa94   : > { %v1996_v53 = vpack.c.bf16 %v4265_v3, %v4264_v44  ;;  %v1981_v43 = vpop.f32.mrb[47].mxu0 }
 0xa95   : > { %v1995_v46 = vpack.c.bf16 %v1981_v43, %v1978_v60 }
 0xa97   : > { %4272 = vmatprep.mubr.msk.bf16.mxu0 %vm588_vm0, %v1995_v46 }
 0xa98   : > { %4273 = vmatmul.mubr.msk.bf16.gmra.mrb[28].mxu0 %vm588_vm0, %v1996_v53 }
 0xaa1   : > { %v5951_v32 = vpop.f32.mrb[56].mxu1 }
 0xaa2   : > { %v5953_v48 = vpop.f32.mrb[57].mxu1  ;;  %v2584_v2 = vsel %vm678_vm1, %v5951_v32, -inf }
 0xaa3   : > { %v5955_v63 = vpop.f32.mrb[58].mxu1  ;;  %v2578_v50 = vsel %vm678_vm1, %v5953_v48, -inf }
 0xaa4   : > { %2579 = vmax.xlane.f32.xlu0 %v2578_v50  ;;  %v5959_v54 = vpop.f32.mrb[59].mxu1  ;;  %v2587_v19 = vsel %vm678_vm1, %v5955_v63, -inf }
 0xaa5   : > { %v2581_v49 = vsel %vm678_vm1, %v5959_v54, -inf }
 0xaa8   : > { %2585 = vmax.xlane.f32.xlu0 %v2584_v2 }
 0xaa9   : > { %v5963_v56 = vpop.f32.mrb[60].mxu1 }
 0xaaa   : > { %v5965_v52 = vpop.f32.mrb[61].mxu1  ;;  %v2596_v51 = vsel %vm678_vm1, %v5963_v56, -inf }
 0xaab   : > { %v5967_v5 = vpop.f32.mrb[62].mxu1  ;;  %v2590_v21 = vsel %vm678_vm1, %v5965_v52, -inf }
 0xaac   : > { %2588 = vmax.xlane.f32.xlu0 %v2587_v19  ;;  %v5971_v55 = vpop.f32.mrb[63].mxu1  ;;  %v2599_v0 = vsel %vm678_vm1, %v5967_v5, -inf }
 0xaad   : > { %v2593_v59 = vsel %vm678_vm1, %v5971_v55, -inf }
 0xab0   : > { %2591 = vmax.xlane.f32.xlu0 %v2590_v21  ;;  %2582 = vmax.xlane.f32.xlu1 %v2581_v49 }
 0xab3   : > { %v2251_v11 = vpop.xlane.xlu0 %2250 }
 0xab4   : > { %2597 = vmax.xlane.f32.xlu0 %v2596_v51  ;;  %2594 = vmax.xlane.f32.xlu1 %v2593_v59 }
 0xab7   : > { %v2245_v8 = vpop.xlane.xlu0 %2244  ;;  %v2254_v20 = vpop.xlane.xlu1 %2253 }
 0xab8   : > { %2600 = vmax.xlane.f32.xlu1 %v2599_v0  ;;  %4801 = vrcp.f32 %v2245_v8 }
 0xabb   : > { %v2248_v1 = vpop.xlane.xlu1 %2247 }
 0xabc   : > { %4803 = vrcp.f32 %v2248_v1 }
 0xabd   : > { %4805 = vrcp.f32 %v2254_v20 }
 0xabe   : > { %4807 = vrcp.f32 %v2251_v11 }
 0xabf   : > { %v2263_v22 = vpop.xlane.xlu0 %2262  ;;  %v2290_v25 = vpop.permute.xlu1 %2289 }
 0xac2   : > { %v4802_v34 = vpop.eup %4801 }
 0xac3   : > { %v2257_v29 = vpop.xlane.xlu0 %2256  ;;  %v2275_v18 = vmul.f32 %v4802_v34, %v5893_v30  ;;  %v2292_v23 = vpop.permute.xlu1 %2291 }
 0xac6   : > { %v4804_v15 = vpop.eup %4803 }
 0xac7   : > { %v2288_v35 = vpop.permute.xlu0 %2287  ;;  %v2276_v10 = vmul.f32 %v4804_v15, %v5901_v13  ;;  %v4806_v37 = vpop.eup %4805 }
 0xac8   : > { %4292 = vmatprep.subr.bf16.mxu0 %v2288_v35  ;;  %v4808_v41 = vpop.eup %4807  ;;  %v2278_v42 = vmul.f32 %v4806_v37, %v5895_v16 }
 0xac9   : > { %4293 = vmatpush3.bf16.msra.mxu0 %v2288_v35  ;;  %v2283_v4 = vpack.c.bf16 %v2276_v10, %v2275_v18  ;;  %v2277_v44 = vmul.f32 %v4808_v41, %v5889_v7 }
 0xaca   : > { %4294 = vmatprep.subr.bf16.mxu0 %v2290_v25 }
 0xacb   : > { %v2865_v27 = vpop.permute.xlu0 %2864  ;;  %4300 = vmatprep.mubr.msk.bf16.mxu0 %vm678_vm1, %v2283_v4  ;;  %v2284_v60 = vpack.c.bf16 %v2278_v42, %v2277_v44  ;;  %v4653_v44 = vld [vmem:[#allocation7 + $0x20] sm:$0xff]  }
 0xacc   : > { %v2885_v61 = vsel %vm588_vm0, %v2865_v27, 0  ;;  %4524 = vmatprep.subr.msk.bf16.mxu1 %vm588_vm0, %v2865_v27 }
 0xacd   : > { %4295 = vmatpush3.bf16.msra.mxu0 %v2290_v25  ;;  %4361 = vmatpush3.bf16.xpose.msra.mxu1 %v2885_v61 }
 0xace   : > { %4296 = vmatprep.subr.bf16.mxu0 %v2292_v23 }
 0xacf   : > { %v2869_v17 = vpop.permute.xlu0 %2868 }
 0xad0   : > { %v2891_v51 = vsel %vm588_vm0, %v2869_v17, 0 }
 0xad1   : > { %4297 = vmatpush3.bf16.msra.mxu0 %v2292_v23 }
 0xad3   : > { %v2857_v30 = vpop.permute.xlu0 %2856 }
 0xad4   : > { %4368 = vmatprep.mubr.msk.bf16.mxu1 %vm588_vm0, %v2857_v30 }
 0xad7   : > { %v2861_v8 = vpop.permute.xlu0 %2860 }
 0xaf4   : > { %v2266_v13 = vpop.xlane.xlu1 %2265 }
 0xaf5   : > { %4809 = vrcp.f32 %v2266_v13 }
 0xaf6   : > { %4811 = vrcp.f32 %v2257_v29 }
 0xaf7   : > { %4813 = vrcp.f32 %v2263_v22 }
 0xaf8   : > { %v2260_v39 = vpop.xlane.xlu1 %2259 }
 0xaf9   : > { %4815 = vrcp.f32 %v2260_v39 }
 0xafc   : > { %v2294_v28 = vpop.permute.xlu1 %2293 }
 0xafd   : > { %4298 = vmatprep.subr.bf16.mxu0 %v2294_v28 }
 0xafe   : > { %4299 = vmatpush3.bf16.msra.mxu0 %v2294_v28 }
 0xaff   : > { %v4810_v3 = vpop.eup %4809  ;;  %4308 = vmatprep.subr.bf16.mxu0 %v4653_v44 }
 0xb00   : > { %v2867_v53 = vpop.permute.xlu1 %2866  ;;  %v4812_v43 = vpop.eup %4811  ;;  %v2282_v16 = vmul.f32 %v4810_v3, %v5929_v36 }
 0xb01   : > { %v2888_v46 = vsel %vm588_vm0, %v2867_v53, 0  ;;  %4301 = vmatmul.mubr.msk.bf16.vlgmr.msra.gmra.mrb[48].mxu0 %vm678_vm1, %v2284_v60  ;;  %4525 = vmatprep.subr.msk.bf16.mxu1 %vm588_vm0, %v2867_v53  ;;  %v4814_v50 = vpop.eup %4813  ;;  %v2279_v7 = vmul.f32 %v4812_v43, %v5909_v62 }
 0xb02   : > { %4363 = vmatpush3.bf16.xpose.msra.mxu1 %v2888_v46  ;;  %v2281_v21 = vmul.f32 %v4814_v50, %v5905_v9  ;;  %4309 = vmatpush3.bf16.msra.mxu0 %v4653_v44 }
 0xb03   : > { %v4816_v2 = vpop.eup %4815  ;;  %4526 = vmatprep.subr.msk.bf16.mxu1 %vm588_vm0, %v2869_v17 }
 0xb04   : > { %v2280_v19 = vmul.f32 %v4816_v2, %v5933_v6  ;;  %v2286_v11 = vpack.c.bf16 %v2282_v16, %v2281_v21  ;;  %v2871_v59 = vpop.permute.xlu1 %2870 }
 0xb05   : > { %v2894_v36 = vsel %vm588_vm0, %v2871_v59, 0 }
 0xb06   : > { %v2285_v49 = vpack.c.bf16 %v2280_v19, %v2279_v7 }
 0xb08   : > { %4304 = vmatprep.mubr.msk.bf16.mxu0 %vm678_vm1, %v2285_v49  ;;  %v2859_v62 = vpop.permute.xlu1 %2858 }
 0xb09   : > { %4305 = vmatmul.mubr.msk.bf16.gmra.mrb[52].mxu0 %vm678_vm1, %v2286_v11 }
 0xb0a   : > { %4365 = vmatpush3.bf16.xpose.msra.mxu1 %v2891_v51 }
 0xb0b   : > { %4527 = vmatprep.subr.msk.bf16.mxu1 %vm588_vm0, %v2871_v59 }
 0xb0c   : > { %v2863_v9 = vpop.permute.xlu1 %2862 }
 0xb12   : > { %4367 = vmatpush3.bf16.xpose.msra.mxu1 %v2894_v36 }
 0xb19   : > { %4369 = vmatmul.mubr.msk.bf16.vlgmr.msra.gmra.mrb[64].mxu1 %vm588_vm0, %v2859_v62 }
 0xb1a   : > { %4372 = vmatprep.mubr.msk.bf16.mxu1 %vm588_vm0, %v2861_v8 }
 0xb21   : > { %4373 = vmatmul.mubr.msk.bf16.gmra.mrb[68].mxu1 %vm588_vm0, %v2863_v9 }
 0xb31   : > { %v2580_v6 = vpop.xlane.xlu0 %2579 }
 0xb32   : > { %v2602_v20 = vsub.f32 %v5953_v48, %v2580_v6 }
 0xb34   : > { %v2610_v22 = vmul.f32 1.442695, %v2602_v20 }
 0xb35   : > { %v2586_v0 = vpop.xlane.xlu0 %2585 }
 0xb36   : > { %v2604_v1 = vsub.f32 %v5951_v32, %v2586_v0 }
 0xb38   : > { %v2614_v29 = vmul.f32 1.442695, %v2604_v1 }
 0xb39   : > { %v2589_v34 = vpop.xlane.xlu0 %2588 }
 0xb3a   : > { %4817 = vpow2.f32 %v2614_v29  ;;  %v2605_v15 = vsub.f32 %v5955_v63, %v2589_v34 }
 0xb3b   : > { %4819 = vpow2.f32 %v2610_v22 }
 0xb3c   : > { %v2616_v25 = vmul.f32 1.442695, %v2605_v15 }
 0xb3d   : > { %v2592_v35 = vpop.xlane.xlu0 %2591  ;;  %v2583_v18 = vpop.xlane.xlu1 %2582 }
 0xb3e   : > { %4821 = vpow2.f32 %v2616_v25  ;;  %v2603_v10 = vsub.f32 %v5959_v54, %v2583_v18  ;;  %v2606_v4 = vsub.f32 %v5965_v52, %v2592_v35 }
 0xb40   : > { %v2612_v27 = vmul.f32 1.442695, %v2603_v10  ;;  %v2618_v23 = vmul.f32 1.442695, %v2606_v4 }
 0xb41   : > { %v2598_v48 = vpop.xlane.xlu0 %2597  ;;  %v2595_v60 = vpop.xlane.xlu1 %2594 }
 0xb42   : > { %v2608_v61 = vsub.f32 %v5963_v56, %v2598_v48  ;;  %4823 = vpow2.f32 %v2612_v27  ;;  %v2607_v43 = vsub.f32 %v5971_v55, %v2595_v60 }
 0xb44   : > { %v6013_v32 = vpop.eup %4817  ;;  %v2622_v17 = vmul.f32 1.442695, %v2608_v61  ;;  %v2620_v50 = vmul.f32 1.442695, %v2607_v43 }
 0xb45   : > { %v2632_v63 = vsel %vm678_vm1, %v6013_v32, 0.0  ;;  %v6017_v30 = vpop.eup %4819  ;;  %v2601_v3 = vpop.xlane.xlu1 %2600 }
 0xb46   : > { %4825 = vpow2.f32 %v2622_v17  ;;  %2633 = vadd.xlane.f32.xlu0 %v2632_v63  ;;  %v2626_v54 = vsel %vm678_vm1, %v6017_v30, 0.0  ;;  %v2609_v53 = vsub.f32 %v5967_v5, %v2601_v3 }
 0xb47   : > { %4827 = vpow2.f32 %v2618_v23 }
 0xb48   : > { %v6019_v13 = vpop.eup %4821  ;;  %v2624_v46 = vmul.f32 1.442695, %v2609_v53 }
 0xb49   : > { %v2635_v56 = vsel %vm678_vm1, %v6019_v13, 0.0 }
 0xb4a   : > { %2627 = vadd.xlane.f32.xlu0 %v2626_v54  ;;  %2636 = vadd.xlane.f32.xlu1 %v2635_v56  ;;  %4829 = vpow2.f32 %v2624_v46 }
 0xb4b   : > { %4831 = vpow2.f32 %v2620_v50 }
 0xb4c   : > { %v6025_v52 = vpop.eup %4823 }
 0xb4d   : > { %v2629_v37 = vsel %vm678_vm1, %v6025_v52, 0.0 }
 0xb4e   : > { %2630 = vadd.xlane.f32.xlu1 %v2629_v37 }
 0xb50   : > { %v6029_v39 = vpop.eup %4825 }
 0xb51   : > { %v2644_v41 = vsel %vm678_vm1, %v6029_v39, 0.0  ;;  %v6033_v42 = vpop.eup %4827 }
 0xb52   : > { %2645 = vadd.xlane.f32.xlu0 %v2644_v41  ;;  %v2638_v28 = vsel %vm678_vm1, %v6033_v42, 0.0 }
 0xb54   : > { %v6053_v2 = vpop.eup %4829 }
 0xb55   : > { %v6057_v5 = vpop.eup %4831 }
 0xb56   : > { %2639 = vadd.xlane.f32.xlu0 %v2638_v28 }
 0xb5f   : > { %2672 = vrot.lane.b32.xlu1 %v5376_v12, %s5083_s30 }
 0xb63   : > { %2674 = vrot.lane.b32.xlu1 %v5402_v57, %s5083_s30 }
 0xb6c   : > { %2670 = vrot.lane.b32.xlu0 %v5378_v14, %s5083_s30 }
 0xb70   : > { %3247 = vrot.lane.b32.xlu0 %v5321_v26, %s5085_s25  ;;  %v2647_v26 = vsel %vm678_vm1, %v6053_v2, 0.0 }
 0xb74   : > { %3251 = vrot.lane.b32.xlu0 %v5339_v40, %s5085_s25  ;;  %v2641_v40 = vsel %vm678_vm1, %v6057_v5, 0.0 }
 0xb78   : > { %3239 = vrot.lane.b32.xlu0 %v5319_v24, %s5085_s25 }
 0xb7c   : > { %3243 = vrot.lane.b32.xlu0 %v5337_v38, %s5085_s25 }
 0xb87   : > { %2648 = vadd.xlane.f32.xlu1 %v2647_v26 }
 0xb8b   : > { %2642 = vadd.xlane.f32.xlu1 %v2641_v40 }
 0xb9c   : > { %2676 = vrot.lane.b32.xlu1 %v5408_v58, %s5083_s30 }
 0xba0   : > { %3249 = vrot.lane.b32.xlu1 %v5331_v33, %s5085_s25 }
 0xba4   : > { %3253 = vrot.lane.b32.xlu1 %v5347_v47, %s5085_s25 }
 0xba8   : > { %3241 = vrot.lane.b32.xlu1 %v5329_v31, %s5085_s25 }
 0xbac   : > { %3245 = vrot.lane.b32.xlu1 %v5345_v45, %s5085_s25 }
 0xbd3   : > { %v6071_v24 = vpop.xlane.xlu0 %2633 }
 0xbd4   : > { %v4302_v38 = vpop.f32.mrb[48].mxu0 }
 0xbd5   : > { %v2345_v55 = vpop.f32.mrb[49].mxu0 }
 0xbd6   : > { %v4303_v16 = vpop.f32.mrb[50].mxu0 }
 0xbd7   : > { %v2377_v7 = vpack.c.bf16 %v4303_v16, %v4302_v38  ;;  %v2348_v19 = vpop.f32.mrb[51].mxu0  ;;  %v2628_v21 = vpop.xlane.xlu0 %2627 }
 0xbd8   : > { %v2376_v49 = vpack.c.bf16 %v2348_v19, %v2345_v55  ;;  %v2637_v11 = vpop.xlane.xlu1 %2636  ;;  %4833 = vrcp.f32 %v2628_v21 }
 0xbda   : > { %4310 = vmatprep.mubr.msk.bf16.mxu0 %vm588_vm0, %v2376_v49 }
 0xbdb   : > { %4311 = vmatmul.mubr.msk.bf16.vlgmr.msra.gmra.mrb[24].mxu0 %vm588_vm0, %v2377_v7 }
 0xbdc   : > { %v2631_v33 = vpop.xlane.xlu1 %2630  ;;  %v4306_v31 = vpop.f32.mrb[52].mxu0 }
 0xbdd   : > { %4835 = vrcp.f32 %v2631_v33  ;;  %v2361_v47 = vpop.f32.mrb[53].mxu0 }
 0xbde   : > { %v4307_v45 = vpop.f32.mrb[54].mxu0  ;;  %4837 = vrcp.f32 %v2637_v11 }
 0xbdf   : > { %v2379_v51 = vpack.c.bf16 %v4307_v45, %v4306_v31  ;;  %v2646_v59 = vpop.xlane.xlu0 %2645  ;;  %v2364_v36 = vpop.f32.mrb[55].mxu0  ;;  %4839 = vrcp.f32 %v6071_v24 }
 0xbe0   : > { %v2378_v62 = vpack.c.bf16 %v2364_v36, %v2361_v47  ;;  %v2673_v20 = vpop.permute.xlu1 %2672 }
 0xbe2   : > { %4314 = vmatprep.mubr.msk.bf16.mxu0 %vm588_vm0, %v2378_v62  ;;  %v4834_v9 = vpop.eup %4833 }
 0xbe3   : > { %v2640_v8 = vpop.xlane.xlu0 %2639  ;;  %4315 = vmatmul.mubr.msk.bf16.gmra.mrb[28].mxu0 %vm588_vm0, %v2379_v51  ;;  %v2658_v1 = vmul.f32 %v4834_v9, %v6017_v30 }
 0xbe4   : > { %v2675_v35 = vpop.permute.xlu1 %2674 }
 0xbe7   : > { %v4836_v6 = vpop.eup %4835  ;;  %v2671_v0 = vpop.permute.xlu0 %2670 }
 0xbe8   : > { %4334 = vmatprep.subr.bf16.mxu0 %v2671_v0  ;;  %v2659_v22 = vmul.f32 %v4836_v6, %v6025_v52  ;;  %v4838_v3 = vpop.eup %4837 }
 0xbe9   : > { %4335 = vmatpush3.bf16.msra.mxu0 %v2671_v0  ;;  %v4840_v43 = vpop.eup %4839  ;;  %v2661_v46 = vmul.f32 %v4838_v3, %v6019_v13 }
 0xbea   : > { %4336 = vmatprep.subr.bf16.mxu0 %v2673_v20  ;;  %v2666_v29 = vpack.c.bf16 %v2659_v22, %v2658_v1  ;;  %v2660_v26 = vmul.f32 %v4840_v43, %v6013_v32 }
 0xbeb   : > { %v3248_v34 = vpop.permute.xlu0 %3247 }
 0xbec   : > { %v3268_v15 = vsel %vm588_vm0, %v3248_v34, 0  ;;  %4342 = vmatprep.mubr.msk.bf16.mxu0 %vm678_vm1, %v2666_v29  ;;  %v6081_v25 = vpop.f32.mrb[64].mxu1  ;;  %4528 = vmatprep.subr.msk.bf16.mxu1 %vm588_vm0, %v3248_v34  ;;  %v2667_v40 = vpack.c.bf16 %v2661_v46, %v2660_v26 }
 0xbed   : > { %4337 = vmatpush3.bf16.msra.mxu0 %v2673_v20  ;;  %v6084_v18 = vpop.f32.mrb[65].mxu1  ;;  %4403 = vmatpush3.bf16.xpose.msra.mxu1 %v3268_v15  ;;  %v2967_v23 = vsel %vm678_vm1, %v6081_v25, -inf }
 0xbee   : > { %4338 = vmatprep.subr.bf16.mxu0 %v2675_v35  ;;  %v6086_v10 = vpop.f32.mrb[66].mxu1  ;;  %v2961_v4 = vsel %vm678_vm1, %v6084_v18, -inf }
 0xbef   : > { %v3252_v27 = vpop.permute.xlu0 %3251  ;;  %2962 = vmax.xlane.f32.xlu0 %v2961_v4  ;;  %v6090_v48 = vpop.f32.mrb[67].mxu1  ;;  %v2970_v56 = vsel %vm678_vm1, %v6086_v10, -inf }
 0xbf0   : > { %v2964_v61 = vsel %vm678_vm1, %v6090_v48, -inf  ;;  %v3274_v31 = vsel %vm588_vm0, %v3252_v27, 0 }
 0xbf1   : > { %2965 = vmax.xlane.f32.xlu1 %v2964_v61  ;;  %4339 = vmatpush3.bf16.msra.mxu0 %v2675_v35 }
 0xbf3   : > { %v3240_v17 = vpop.permute.xlu0 %3239  ;;  %2968 = vmax.xlane.f32.xlu0 %v2967_v23 }
 0xbf4   : > { %v6096_v63 = vpop.f32.mrb[68].mxu1  ;;  %4410 = vmatprep.mubr.msk.bf16.mxu1 %vm588_vm0, %v3240_v17 }
 0xbf5   : > { %v6099_v30 = vpop.f32.mrb[69].mxu1  ;;  %v2979_v44 = vsel %vm678_vm1, %v6096_v63, -inf }
 0xbf6   : > { %v6101_v54 = vpop.f32.mrb[70].mxu1  ;;  %v2973_v41 = vsel %vm678_vm1, %v6099_v30, -inf }
 0xbf7   : > { %2971 = vmax.xlane.f32.xlu0 %v2970_v56  ;;  %v6105_v52 = vpop.f32.mrb[71].mxu1  ;;  %v2982_v28 = vsel %vm678_vm1, %v6101_v54, -inf  ;;  %v3244_v45 = vpop.permute.xlu0 %3243 }
 0xbf8   : > { %v2976_v37 = vsel %vm678_vm1, %v6105_v52, -inf }
 0xbf9   : > { %2977 = vmax.xlane.f32.xlu1 %v2976_v37 }
 0xbfb   : > { %2974 = vmax.xlane.f32.xlu0 %v2973_v41 }
 0xbfd   : > { %2983 = vmax.xlane.f32.xlu1 %v2982_v28 }
 0xbff   : > { %2980 = vmax.xlane.f32.xlu0 %v2979_v44 }
 0xc14   : > { %v2649_v60 = vpop.xlane.xlu1 %2648 }
 0xc15   : > { %4841 = vrcp.f32 %v2649_v60 }
 0xc16   : > { %4843 = vrcp.f32 %v2640_v8 }
 0xc17   : > { %4845 = vrcp.f32 %v2646_v59 }
 0xc18   : > { %v2643_v53 = vpop.xlane.xlu1 %2642 }
 0xc19   : > { %4847 = vrcp.f32 %v2643_v53 }
 0xc1c   : > { %v2677_v50 = vpop.permute.xlu1 %2676 }
 0xc1d   : > { %4340 = vmatprep.subr.bf16.mxu0 %v2677_v50 }
 0xc1e   : > { %4341 = vmatpush3.bf16.msra.mxu0 %v2677_v50 }
 0xc1f   : > { %v4842_v38 = vpop.eup %4841 }
 0xc20   : > { %v3250_v55 = vpop.permute.xlu1 %3249  ;;  %v4844_v16 = vpop.eup %4843  ;;  %v2665_v13 = vmul.f32 %v4842_v38, %v6053_v2 }
 0xc21   : > { %v3271_v24 = vsel %vm588_vm0, %v3250_v55, 0  ;;  %4343 = vmatmul.mubr.msk.bf16.vlgmr.msra.gmra.mrb[56].mxu0 %vm678_vm1, %v2667_v40  ;;  %4529 = vmatprep.subr.msk.bf16.mxu1 %vm588_vm0, %v3250_v55  ;;  %v4846_v7 = vpop.eup %4845  ;;  %v2662_v32 = vmul.f32 %v4844_v16, %v6033_v42 }
 0xc22   : > { %4405 = vmatpush3.bf16.xpose.msra.mxu1 %v3271_v24  ;;  %v2664_v49 = vmul.f32 %v4846_v7, %v6029_v39 }
 0xc23   : > { %v4848_v19 = vpop.eup %4847  ;;  %4530 = vmatprep.subr.msk.bf16.mxu1 %vm588_vm0, %v3252_v27 }
 0xc24   : > { %v2663_v21 = vmul.f32 %v4848_v19, %v6057_v5  ;;  %v2669_v33 = vpack.c.bf16 %v2665_v13, %v2664_v49  ;;  %v3254_v47 = vpop.permute.xlu1 %3253  ;;  %v4654_v5 = vld [vmem:[#allocation7 + $0x28] sm:$0xff]  }
 0xc25   : > { %v3277_v2 = vsel %vm588_vm0, %v3254_v47, 0  ;;  %4350 = vmatprep.subr.bf16.mxu0 %v4654_v5 }
 0xc26   : > { %v2668_v11 = vpack.c.bf16 %v2663_v21, %v2662_v32  ;;  %4351 = vmatpush3.bf16.msra.mxu0 %v4654_v5 }
 0xc28   : > { %4346 = vmatprep.mubr.msk.bf16.mxu0 %vm678_vm1, %v2668_v11  ;;  %v3242_v42 = vpop.permute.xlu1 %3241 }
 0xc29   : > { %4347 = vmatmul.mubr.msk.bf16.gmra.mrb[60].mxu0 %vm678_vm1, %v2669_v33 }
 0xc2a   : > { %4407 = vmatpush3.bf16.xpose.msra.mxu1 %v3274_v31 }
 0xc2b   : > { %4531 = vmatprep.subr.msk.bf16.mxu1 %vm588_vm0, %v3254_v47 }
 0xc2c   : > { %v3246_v39 = vpop.permute.xlu1 %3245 }
 0xc32   : > { %4409 = vmatpush3.bf16.xpose.msra.mxu1 %v3277_v2 }
 0xc39   : > { %4411 = vmatmul.mubr.msk.bf16.vlgmr.msra.gmra.mrb[72].mxu1 %vm588_vm0, %v3242_v42 }
 0xc3a   : > { %4414 = vmatprep.mubr.msk.bf16.mxu1 %vm588_vm0, %v3244_v45 }
 0xc41   : > { %4415 = vmatmul.mubr.msk.bf16.gmra.mrb[76].mxu1 %vm588_vm0, %v3246_v39 }
 0xc7c   : > { %v2963_v51 = vpop.xlane.xlu0 %2962 }
 0xc7d   : > { %v2985_v59 = vsub.f32 %v6084_v18, %v2963_v51 }
 0xc7e   : > { %v2966_v36 = vpop.xlane.xlu1 %2965 }
 0xc7f   : > { %v2993_v9 = vmul.f32 1.442695, %v2985_v59  ;;  %v2986_v6 = vsub.f32 %v6090_v48, %v2966_v36 }
 0xc80   : > { %v2969_v62 = vpop.xlane.xlu0 %2968 }
 0xc81   : > { %v2987_v8 = vsub.f32 %v6081_v25, %v2969_v62  ;;  %v2995_v22 = vmul.f32 1.442695, %v2986_v6 }
 0xc83   : > { %v2997_v20 = vmul.f32 1.442695, %v2987_v8 }
 0xc84   : > { %v2972_v0 = vpop.xlane.xlu0 %2971 }
 0xc85   : > { %4849 = vpow2.f32 %v2997_v20  ;;  %v2988_v1 = vsub.f32 %v6086_v10, %v2972_v0 }
 0xc86   : > { %4851 = vpow2.f32 %v2993_v9  ;;  %v2978_v44 = vpop.xlane.xlu1 %2977 }
 0xc87   : > { %v2999_v29 = vmul.f32 1.442695, %v2988_v1  ;;  %v2990_v53 = vsub.f32 %v6105_v52, %v2978_v44 }
 0xc88   : > { %v2975_v34 = vpop.xlane.xlu0 %2974 }
 0xc89   : > { %4853 = vpow2.f32 %v2999_v29  ;;  %v2989_v15 = vsub.f32 %v6099_v30, %v2975_v34  ;;  %v3003_v46 = vmul.f32 1.442695, %v2990_v53 }
 0xc8a   : > { %4855 = vpow2.f32 %v2995_v22  ;;  %v2984_v60 = vpop.xlane.xlu1 %2983 }
 0xc8b   : > { %v3001_v4 = vmul.f32 1.442695, %v2989_v15  ;;  %v2992_v3 = vsub.f32 %v6101_v54, %v2984_v60 }
 0xc8c   : > { %v2981_v35 = vpop.xlane.xlu0 %2980 }
 0xc8d   : > { %v2991_v18 = vsub.f32 %v6096_v63, %v2981_v35  ;;  %v3007_v43 = vmul.f32 1.442695, %v2992_v3 }
 0xc8f   : > { %v6140_v25 = vpop.eup %4849  ;;  %v3005_v27 = vmul.f32 1.442695, %v2991_v18 }
 0xc90   : > { %v3015_v48 = vsel %vm678_vm1, %v6140_v25, 0.0  ;;  %v6144_v61 = vpop.eup %4851 }
 0xc91   : > { %4857 = vpow2.f32 %v3005_v27  ;;  %3016 = vadd.xlane.f32.xlu0 %v3015_v48  ;;  %v3009_v23 = vsel %vm678_vm1, %v6144_v61, 0.0 }
 0xc92   : > { %4859 = vpow2.f32 %v3001_v4 }
 0xc93   : > { %v6146_v10 = vpop.eup %4853  ;;  %4861 = vpow2.f32 %v3007_v43 }
 0xc94   : > { %v3018_v17 = vsel %vm678_vm1, %v6146_v10, 0.0  ;;  %v6152_v63 = vpop.eup %4855  ;;  %4863 = vpow2.f32 %v3003_v46 }
 0xc95   : > { %3010 = vadd.xlane.f32.xlu0 %v3009_v23  ;;  %3019 = vadd.xlane.f32.xlu1 %v3018_v17  ;;  %v3012_v30 = vsel %vm678_vm1, %v6152_v63, 0.0 }
 0xc99   : > { %3013 = vadd.xlane.f32.xlu1 %v3012_v30 }
 0xc9b   : > { %v6156_v56 = vpop.eup %4857 }
 0xc9c   : > { %v3027_v37 = vsel %vm678_vm1, %v6156_v56, 0.0  ;;  %v6160_v41 = vpop.eup %4859 }
 0xc9d   : > { %3028 = vadd.xlane.f32.xlu0 %v3027_v37  ;;  %v3021_v28 = vsel %vm678_vm1, %v6160_v41, 0.0  ;;  %v6172_v50 = vpop.eup %4861 }
 0xc9e   : > { %v3030_v26 = vsel %vm678_vm1, %v6172_v50, 0.0  ;;  %v6176_v40 = vpop.eup %4863 }
 0xc9f   : > { %v3024_v38 = vsel %vm678_vm1, %v6176_v40, 0.0 }
 0xca1   : > { %3022 = vadd.xlane.f32.xlu0 %v3021_v28 }
 0xcaa   : > { %3055 = vrot.lane.b32.xlu1 %v5376_v12, %s5084_s6 }
 0xcae   : > { %3057 = vrot.lane.b32.xlu1 %v5402_v57, %s5084_s6 }
 0xcb7   : > { %3053 = vrot.lane.b32.xlu0 %v5378_v14, %s5084_s6 }
 0xcd2   : > { %3031 = vadd.xlane.f32.xlu1 %v3030_v26 }
 0xcd6   : > { %3025 = vadd.xlane.f32.xlu1 %v3024_v38 }
 0xce7   : > { %3059 = vrot.lane.b32.xlu1 %v5408_v58, %s5084_s6 }
 0xcf4   : > { %v4344_v54 = vpop.f32.mrb[56].mxu0 }
 0xcf5   : > { %v2728_v52 = vpop.f32.mrb[57].mxu0 }
 0xcf6   : > { %v4345_v55 = vpop.f32.mrb[58].mxu0 }
 0xcf7   : > { %v2760_v16 = vpack.c.bf16 %v4345_v55, %v4344_v54  ;;  %v2731_v24 = vpop.f32.mrb[59].mxu0 }
 0xcf8   : > { %v2759_v7 = vpack.c.bf16 %v2731_v24, %v2728_v52 }
 0xcfa   : > { %4352 = vmatprep.mubr.msk.bf16.mxu0 %vm588_vm0, %v2759_v7 }
 0xcfb   : > { %4353 = vmatmul.mubr.msk.bf16.vlgmr.msra.gmra.mrb[24].mxu0 %vm588_vm0, %v2760_v16 }
 0xcfc   : > { %v4348_v19 = vpop.f32.mrb[60].mxu0 }
 0xcfd   : > { %v2744_v13 = vpop.f32.mrb[61].mxu0 }
 0xcfe   : > { %v4349_v32 = vpop.f32.mrb[62].mxu0 }
 0xcff   : > { %v2762_v21 = vpack.c.bf16 %v4349_v32, %v4348_v19  ;;  %v2747_v49 = vpop.f32.mrb[63].mxu0 }
 0xd00   : > { %v2761_v11 = vpack.c.bf16 %v2747_v49, %v2744_v13 }
 0xd02   : > { %4356 = vmatprep.mubr.msk.bf16.mxu0 %vm588_vm0, %v2761_v11 }
 0xd03   : > { %4357 = vmatmul.mubr.msk.bf16.gmra.mrb[28].mxu0 %vm588_vm0, %v2762_v21 }
 0xd0c   : > { %v6186_v33 = vpop.f32.mrb[72].mxu1 }
 0xd0d   : > { %v6188_v31 = vpop.f32.mrb[73].mxu1  ;;  %v3350_v39 = vsel %vm678_vm1, %v6186_v33, -inf }
 0xd0e   : > { %v6190_v47 = vpop.f32.mrb[74].mxu1  ;;  %v3344_v2 = vsel %vm678_vm1, %v6188_v31, -inf }
 0xd0f   : > { %3345 = vmax.xlane.f32.xlu0 %v3344_v2  ;;  %v6194_v42 = vpop.f32.mrb[75].mxu1  ;;  %v3353_v36 = vsel %vm678_vm1, %v6190_v47, -inf }
 0xd10   : > { %v3347_v45 = vsel %vm678_vm1, %v6194_v42, -inf }
 0xd11   : > { %3348 = vmax.xlane.f32.xlu1 %v3347_v45 }
 0xd13   : > { %3351 = vmax.xlane.f32.xlu0 %v3350_v39 }
 0xd14   : > { %v6200_v5 = vpop.f32.mrb[76].mxu1 }
 0xd15   : > { %v6202_v51 = vpop.f32.mrb[77].mxu1  ;;  %v3362_v0 = vsel %vm678_vm1, %v6200_v5, -inf }
 0xd16   : > { %v6204_v59 = vpop.f32.mrb[78].mxu1  ;;  %v3356_v9 = vsel %vm678_vm1, %v6202_v51, -inf }
 0xd17   : > { %3354 = vmax.xlane.f32.xlu0 %v3353_v36  ;;  %v6208_v62 = vpop.f32.mrb[79].mxu1  ;;  %v3365_v6 = vsel %vm678_vm1, %v6204_v59, -inf }
 0xd18   : > { %v3359_v8 = vsel %vm678_vm1, %v6208_v62, -inf }
 0xd19   : > { %3360 = vmax.xlane.f32.xlu1 %v3359_v8 }
 0xd1b   : > { %3357 = vmax.xlane.f32.xlu0 %v3356_v9 }
 0xd1d   : > { %3366 = vmax.xlane.f32.xlu1 %v3365_v6 }
 0xd1e   : > { %v3017_v20 = vpop.xlane.xlu0 %3016 }
 0xd1f   : > { %3363 = vmax.xlane.f32.xlu0 %v3362_v0 }
 0xd22   : > { %v3011_v1 = vpop.xlane.xlu0 %3010  ;;  %v3020_v22 = vpop.xlane.xlu1 %3019 }
 0xd23   : > { %4865 = vrcp.f32 %v3011_v1 }
 0xd26   : > { %v3014_v29 = vpop.xlane.xlu1 %3013 }
 0xd27   : > { %4867 = vrcp.f32 %v3014_v29 }
 0xd28   : > { %4869 = vrcp.f32 %v3020_v22 }
 0xd29   : > { %4871 = vrcp.f32 %v3017_v20 }
 0xd2a   : > { %v3029_v34 = vpop.xlane.xlu0 %3028  ;;  %v3056_v4 = vpop.permute.xlu1 %3055 }
 0xd2d   : > { %v4866_v35 = vpop.eup %4865 }
 0xd2e   : > { %v3023_v15 = vpop.xlane.xlu0 %3022  ;;  %v3041_v48 = vmul.f32 %v4866_v35, %v6144_v61  ;;  %v3058_v30 = vpop.permute.xlu1 %3057 }
 0xd31   : > { %v4868_v18 = vpop.eup %4867 }
 0xd32   : > { %v3054_v27 = vpop.permute.xlu0 %3053  ;;  %v3042_v23 = vmul.f32 %v4868_v18, %v6152_v63  ;;  %v4870_v28 = vpop.eup %4869 }
 0xd33   : > { %4376 = vmatprep.subr.bf16.mxu0 %v3054_v27  ;;  %v4872_v63 = vpop.eup %4871  ;;  %v3044_v44 = vmul.f32 %v4870_v28, %v6146_v10 }
 0xd34   : > { %4377 = vmatpush3.bf16.msra.mxu0 %v3054_v27  ;;  %v3049_v17 = vpack.c.bf16 %v3042_v23, %v3041_v48  ;;  %v3043_v3 = vmul.f32 %v4872_v63, %v6140_v25 }
 0xd35   : > { %4378 = vmatprep.subr.bf16.mxu0 %v3056_v4 }
 0xd36   : > { %4384 = vmatprep.mubr.msk.bf16.mxu0 %vm678_vm1, %v3049_v17  ;;  %v3050_v53 = vpack.c.bf16 %v3044_v44, %v3043_v3 }
 0xd38   : > { %4379 = vmatpush3.bf16.msra.mxu0 %v3056_v4 }
 0xd39   : > { %4380 = vmatprep.subr.bf16.mxu0 %v3058_v30 }
 0xd3c   : > { %4381 = vmatpush3.bf16.msra.mxu0 %v3058_v30 }
 0xd5f   : > { %v3032_v37 = vpop.xlane.xlu1 %3031 }
 0xd60   : > { %4873 = vrcp.f32 %v3032_v37 }
 0xd61   : > { %4875 = vrcp.f32 %v3023_v15 }
 0xd62   : > { %4877 = vrcp.f32 %v3029_v34  ;;  %v4655_v34 = vld [vmem:[#allocation7 + $0x30] sm:$0xff]  }
 0xd63   : > { %v3026_v61 = vpop.xlane.xlu1 %3025 }
 0xd64   : > { %4879 = vrcp.f32 %v3026_v61 }
 0xd67   : > { %v3060_v60 = vpop.permute.xlu1 %3059 }
 0xd68   : > { %4382 = vmatprep.subr.bf16.mxu0 %v3060_v60 }
 0xd69   : > { %4383 = vmatpush3.bf16.msra.mxu0 %v3060_v60 }
 0xd6a   : > { %v4874_v43 = vpop.eup %4873  ;;  %4392 = vmatprep.subr.bf16.mxu0 %v4655_v34 }
 0xd6b   : > { %v4876_v46 = vpop.eup %4875  ;;  %v3048_v54 = vmul.f32 %v4874_v43, %v6172_v50 }
 0xd6c   : > { %4385 = vmatmul.mubr.msk.bf16.vlgmr.msra.gmra.mrb[64].mxu0 %vm678_vm1, %v3050_v53  ;;  %v4878_v26 = vpop.eup %4877  ;;  %v3045_v52 = vmul.f32 %v4876_v46, %v6160_v41 }
 0xd6d   : > { %v3047_v10 = vmul.f32 %v4878_v26, %v6156_v56  ;;  %4393 = vmatpush3.bf16.msra.mxu0 %v4655_v34 }
 0xd6e   : > { %v4880_v38 = vpop.eup %4879 }
 0xd6f   : > { %v3046_v55 = vmul.f32 %v4880_v38, %v6176_v40  ;;  %v3052_v24 = vpack.c.bf16 %v3048_v54, %v3047_v10 }
 0xd71   : > { %v3051_v16 = vpack.c.bf16 %v3046_v55, %v3045_v52 }
 0xd73   : > { %4388 = vmatprep.mubr.msk.bf16.mxu0 %vm678_vm1, %v3051_v16 }
 0xd74   : > { %4389 = vmatmul.mubr.msk.bf16.gmra.mrb[68].mxu0 %vm678_vm1, %v3052_v24 }
 0xd9c   : > { %v3346_v25 = vpop.xlane.xlu0 %3345 }
 0xd9d   : > { %v3368_v7 = vsub.f32 %v6188_v31, %v3346_v25 }
 0xd9e   : > { %v3349_v19 = vpop.xlane.xlu1 %3348 }
 0xd9f   : > { %v3376_v50 = vmul.f32 1.442695, %v3368_v7  ;;  %v3369_v41 = vsub.f32 %v6194_v42, %v3349_v19 }
 0xda0   : > { %v3352_v13 = vpop.xlane.xlu0 %3351 }
 0xda1   : > { %v3370_v32 = vsub.f32 %v6186_v33, %v3352_v13  ;;  %v3378_v49 = vmul.f32 1.442695, %v3369_v41 }
 0xda3   : > { %v3380_v21 = vmul.f32 1.442695, %v3370_v32 }
 0xda4   : > { %v3355_v40 = vpop.xlane.xlu0 %3354 }
 0xda5   : > { %4881 = vpow2.f32 %v3380_v21  ;;  %v3371_v56 = vsub.f32 %v6190_v47, %v3355_v40  ;;  %v4656_v40 = vld [vmem:[#allocation7 + $0x38] sm:$0xff]  }
 0xda6   : > { %4883 = vpow2.f32 %v3376_v50  ;;  %v3361_v15 = vpop.xlane.xlu1 %3360 }
 0xda7   : > { %v3382_v11 = vmul.f32 1.442695, %v3371_v56  ;;  %v3373_v4 = vsub.f32 %v6208_v62, %v3361_v15 }
 0xda8   : > { %v3358_v2 = vpop.xlane.xlu0 %3357 }
 0xda9   : > { %4885 = vpow2.f32 %v3382_v11  ;;  %v3372_v31 = vsub.f32 %v6202_v51, %v3358_v2  ;;  %v3386_v48 = vmul.f32 1.442695, %v3373_v4  ;;  %v3896_v4 = vld [vmem:[%s6351_s3] ss:$0 sm:$0xff] }
 0xdaa   : > { %4887 = vpow2.f32 %v3378_v49  ;;  %v3367_v35 = vpop.xlane.xlu1 %3366 }
 0xdab   : > { %v3384_v36 = vmul.f32 1.442695, %v3372_v31  ;;  %v3375_v18 = vsub.f32 %v6204_v59, %v3367_v35 }
 0xdac   : > { %v3364_v45 = vpop.xlane.xlu0 %3363 }
 0xdad   : > { %v3374_v39 = vsub.f32 %v6200_v5, %v3364_v45  ;;  %v3390_v27 = vmul.f32 1.442695, %v3375_v18 }
 0xdaf   : > { %v6236_v33 = vpop.eup %4881  ;;  %v3388_v42 = vmul.f32 1.442695, %v3374_v39 }
 0xdb0   : > { %v3398_v8 = vsel %vm678_vm1, %v6236_v33, 0.0  ;;  %v6240_v9 = vpop.eup %4883 }
 0xdb1   : > { %4889 = vpow2.f32 %v3388_v42  ;;  %3399 = vadd.xlane.f32.xlu0 %v3398_v8  ;;  %v3392_v51 = vsel %vm678_vm1, %v6240_v9, 0.0 }
 0xdb2   : > { %4891 = vpow2.f32 %v3384_v36 }
 0xdb3   : > { %v6242_v47 = vpop.eup %4885  ;;  %4893 = vpow2.f32 %v3390_v27 }
 0xdb4   : > { %v3401_v5 = vsel %vm678_vm1, %v6242_v47, 0.0  ;;  %v4888_v6 = vpop.eup %4887  ;;  %4895 = vpow2.f32 %v3386_v48 }
 0xdb5   : > { %3393 = vadd.xlane.f32.xlu0 %v3392_v51  ;;  %3402 = vadd.xlane.f32.xlu1 %v3401_v5  ;;  %v3395_v20 = vsel %vm678_vm1, %v4888_v6, 0.0 }
 0xdb9   : > { %3396 = vadd.xlane.f32.xlu1 %v3395_v20 }
 0xdbb   : > { %v6249_v0 = vpop.eup %4889 }
 0xdbc   : > { %v3410_v1 = vsel %vm678_vm1, %v6249_v0, 0.0  ;;  %v6253_v22 = vpop.eup %4891 }
 0xdbd   : > { %3411 = vadd.xlane.f32.xlu0 %v3410_v1  ;;  %v3404_v29 = vsel %vm678_vm1, %v6253_v22, 0.0  ;;  %v6265_v23 = vpop.eup %4893 }
 0xdbe   : > { %v6269_v17 = vpop.eup %4895 }
 0xdc1   : > { %3405 = vadd.xlane.f32.xlu0 %v3404_v29 }
 0xdca   : > { %3438 = vrot.lane.b32.xlu1 %v5376_v12, %s5085_s25  ;;  %v3413_v12 = vsel %vm678_vm1, %v6265_v23, 0.0 }
 0xdce   : > { %3440 = vrot.lane.b32.xlu1 %v5402_v57, %s5085_s25 }
 0xdd7   : > { %3436 = vrot.lane.b32.xlu0 %v5378_v14, %s5085_s25  ;;  %v3407_v14 = vsel %vm678_vm1, %v6269_v17, 0.0 }
 0xdf2   : > { %3414 = vadd.xlane.f32.xlu1 %v3413_v12 }
 0xdf6   : > { %3408 = vadd.xlane.f32.xlu1 %v3407_v14 }
 0xe07   : > { %3442 = vrot.lane.b32.xlu1 %v5408_v58, %s5085_s25 }
 0xe3e   : > { %v3400_v57 = vpop.xlane.xlu0 %3399 }
 0xe3f   : > { %v4386_v59 = vpop.f32.mrb[64].mxu0 }
 0xe40   : > { %v3111_v62 = vpop.f32.mrb[65].mxu0 }
 0xe41   : > { %v4387_v30 = vpop.f32.mrb[66].mxu0 }
 0xe42   : > { %v3143_v37 = vpack.c.bf16 %v4387_v30, %v4386_v59  ;;  %v3114_v28 = vpop.f32.mrb[67].mxu0  ;;  %v3394_v61 = vpop.xlane.xlu0 %3393 }
 0xe43   : > { %v3142_v63 = vpack.c.bf16 %v3114_v28, %v3111_v62  ;;  %v3403_v44 = vpop.xlane.xlu1 %3402  ;;  %4897 = vrcp.f32 %v3394_v61 }
 0xe45   : > { %4394 = vmatprep.mubr.msk.bf16.mxu0 %vm588_vm0, %v3142_v63 }
 0xe46   : > { %4395 = vmatmul.mubr.msk.bf16.vlgmr.msra.gmra.mrb[24].mxu0 %vm588_vm0, %v3143_v37 }
 0xe47   : > { %v3397_v60 = vpop.xlane.xlu1 %3396  ;;  %v4390_v3 = vpop.f32.mrb[68].mxu0 }
 0xe48   : > { %4899 = vrcp.f32 %v3397_v60  ;;  %v3127_v53 = vpop.f32.mrb[69].mxu0 }
 0xe49   : > { %v4391_v43 = vpop.f32.mrb[70].mxu0  ;;  %4901 = vrcp.f32 %v3403_v44 }
 0xe4a   : > { %v3145_v58 = vpack.c.bf16 %v4391_v43, %v4390_v3  ;;  %v3130_v46 = vpop.f32.mrb[71].mxu0  ;;  %v3412_v26 = vpop.xlane.xlu0 %3411  ;;  %4903 = vrcp.f32 %v3400_v57 }
 0xe4b   : > { %v3144_v38 = vpack.c.bf16 %v3130_v46, %v3127_v53  ;;  %v3439_v10 = vpop.permute.xlu1 %3438 }
 0xe4d   : > { %4398 = vmatprep.mubr.msk.bf16.mxu0 %vm588_vm0, %v3144_v38  ;;  %v4898_v52 = vpop.eup %4897 }
 0xe4e   : > { %4399 = vmatmul.mubr.msk.bf16.gmra.mrb[28].mxu0 %vm588_vm0, %v3145_v58  ;;  %v3406_v54 = vpop.xlane.xlu0 %3405  ;;  %v3424_v24 = vmul.f32 %v4898_v52, %v6240_v9 }
 0xe4f   : > { %v3441_v19 = vpop.permute.xlu1 %3440 }
 0xe52   : > { %v4900_v55 = vpop.eup %4899  ;;  %v3437_v16 = vpop.permute.xlu0 %3436 }
 0xe53   : > { %v3425_v25 = vmul.f32 %v4900_v55, %v4888_v6  ;;  %4418 = vmatprep.subr.bf16.mxu0 %v3437_v16  ;;  %v4902_v32 = vpop.eup %4901 }
 0xe54   : > { %4419 = vmatpush3.bf16.msra.mxu0 %v3437_v16  ;;  %v4904_v41 = vpop.eup %4903  ;;  %v3427_v21 = vmul.f32 %v4902_v32, %v6242_v47 }
 0xe55   : > { %v3432_v7 = vpack.c.bf16 %v3425_v25, %v3424_v24  ;;  %4420 = vmatprep.subr.bf16.mxu0 %v3439_v10  ;;  %v3426_v49 = vmul.f32 %v4904_v41, %v6236_v33 }
 0xe57   : > { %4426 = vmatprep.mubr.msk.bf16.mxu0 %vm678_vm1, %v3432_v7  ;;  %v3433_v11 = vpack.c.bf16 %v3427_v21, %v3426_v49 }
 0xe58   : > { %4421 = vmatpush3.bf16.msra.mxu0 %v3439_v10 }
 0xe59   : > { %4422 = vmatprep.subr.bf16.mxu0 %v3441_v19 }
 0xe5c   : > { %4423 = vmatpush3.bf16.msra.mxu0 %v3441_v19 }
 0xe7f   : > { %v3415_v13 = vpop.xlane.xlu1 %3414 }
 0xe80   : > { %4905 = vrcp.f32 %v3415_v13 }
 0xe81   : > { %4907 = vrcp.f32 %v3406_v54 }
 0xe82   : > { %4909 = vrcp.f32 %v3412_v26 }
 0xe83   : > { %v3409_v50 = vpop.xlane.xlu1 %3408 }
 0xe84   : > { %4911 = vrcp.f32 %v3409_v50 }
 0xe87   : > { %v3443_v56 = vpop.permute.xlu1 %3442 }
 0xe88   : > { %4424 = vmatprep.subr.bf16.mxu0 %v3443_v56 }
 0xe89   : > { %4425 = vmatpush3.bf16.msra.mxu0 %v3443_v56 }
 0xe8a   : > { %4434 = vmatprep.subr.bf16.mxu0 %v4656_v40  ;;  %v4906_v2 = vpop.eup %4905 }
 0xe8b   : > { %v4908_v31 = vpop.eup %4907  ;;  %v3431_v36 = vmul.f32 %v4906_v2, %v6265_v23 }
 0xe8c   : > { %4427 = vmatmul.mubr.msk.bf16.vlgmr.msra.gmra.mrb[72].mxu0 %vm678_vm1, %v3433_v11  ;;  %v4910_v45 = vpop.eup %4909  ;;  %v3428_v42 = vmul.f32 %v4908_v31, %v6253_v22 }
 0xe8d   : > { %4435 = vmatpush3.bf16.msra.mxu0 %v4656_v40  ;;  %v3430_v9 = vmul.f32 %v4910_v45, %v6249_v0 }
 0xe8e   : > { %v4912_v39 = vpop.eup %4911 }
 0xe8f   : > { %v3429_v8 = vmul.f32 %v4912_v39, %v6269_v17  ;;  %v3435_v47 = vpack.c.bf16 %v3431_v36, %v3430_v9 }
 0xe91   : > { %v3434_v33 = vpack.c.bf16 %v3429_v8, %v3428_v42 }
 0xe93   : > { %4430 = vmatprep.mubr.msk.bf16.mxu0 %vm678_vm1, %v3434_v33 }
 0xe94   : > { %4431 = vmatmul.mubr.msk.bf16.gmra.mrb[76].mxu0 %vm678_vm1, %v3435_v47 }
 0xf5f   : > { %v4428_v51 = vpop.f32.mrb[72].mxu0 }
 0xf60   : > { %v3494_v5 = vpop.f32.mrb[73].mxu0 }
 0xf61   : > { %v4429_v6 = vpop.f32.mrb[74].mxu0 }
 0xf62   : > { %v3526_v20 = vpack.c.bf16 %v4429_v6, %v4428_v51  ;;  %v3497_v1 = vpop.f32.mrb[75].mxu0 }
 0xf63   : > { %v3525_v29 = vpack.c.bf16 %v3497_v1, %v3494_v5 }
 0xf65   : > { %4436 = vmatprep.mubr.msk.bf16.mxu0 %vm588_vm0, %v3525_v29 }
 0xf66   : > { %4437 = vmatmul.mubr.msk.bf16.vlgmr.msra.gmra.mrb[24].mxu0 %vm588_vm0, %v3526_v20 }
 0xf67   : > { %v4432_v22 = vpop.f32.mrb[76].mxu0 }
 0xf68   : > { %v3510_v34 = vpop.f32.mrb[77].mxu0 }
 0xf69   : > { %v4433_v0 = vpop.f32.mrb[78].mxu0 }
 0xf6a   : > { %v3528_v15 = vpack.c.bf16 %v4433_v0, %v4432_v22  ;;  %v3513_v35 = vpop.f32.mrb[79].mxu0 }
 0xf6b   : > { %v3527_v18 = vpack.c.bf16 %v3513_v35, %v3510_v34 }
 0xf6d   : > { %4440 = vmatprep.mubr.msk.bf16.mxu0 %vm588_vm0, %v3527_v18 }
 0xf6e   : > { %4441 = vmatmul.mubr.msk.bf16.gmra.mrb[28].mxu0 %vm588_vm0, %v3528_v15 }
0x1039   : > { %v4438_v27 = vpop.f32.mrb[24].mxu0 }
0x103a   : > { %v3631_v48 = vadd.f32 %v4438_v27, %v3896_v4  ;;  %v3583_v23 = vpop.f32.mrb[25].mxu0 }
0x103b   : > { %v3629_v12 = vadd.f32 %v3896_v4, %v3583_v23  ;;  %v4439_v17 = vpop.f32.mrb[26].mxu0 }
0x103c   : > { %3639 = vst [vmem:[%s244_s29 + $0x10] sm:$0xff] %v3631_v48  ;;  %v3632_v14 = vadd.f32 %v4439_v17, %v3896_v4  ;;  %v3586_v57 = vpop.f32.mrb[27].mxu0 }
0x103d   : > { %3637 = vst [vmem:[%s244_s29] sm:$0xff] %v3629_v12  ;;  %v3630_v59 = vadd.f32 %v3896_v4, %v3586_v57 }
0x103e   : > { %3640 = vst [vmem:[%s244_s29 + $0x18] sm:$0xff] %v3632_v14 }
0x103f   : > { %3638 = vst [vmem:[%s244_s29 + $0x8] sm:$0xff] %v3630_v59 }
0x1041   : > { %v4442_v62 = vpop.f32.mrb[28].mxu0 }
0x1042   : > { %v3635_v30 = vadd.f32 %v4442_v62, %v3896_v4  ;;  %v3599_v37 = vpop.f32.mrb[29].mxu0 }
0x1043   : > { %v3633_v28 = vadd.f32 %v3896_v4, %v3599_v37  ;;  %v4443_v61 = vpop.f32.mrb[30].mxu0 }
0x1044   : > { %3643 = vst [vmem:[%s244_s29 + $0x30] sm:$0xff] %v3635_v30  ;;  %v3636_v63 = vadd.f32 %v4443_v61, %v3896_v4  ;;  %v3602_v44 = vpop.f32.mrb[31].mxu0 }
0x1045   : > { %3641 = vst [vmem:[%s244_s29 + $0x20] sm:$0xff] %v3633_v28  ;;  %v3634_v60 = vadd.f32 %v3896_v4, %v3602_v44 }
0x1046   : > { %3644 = vst [vmem:[%s244_s29 + $0x38] sm:$0xff] %v3636_v63 }
0x1047   : > { %3642 = vst [vmem:[%s244_s29 + $0x28] sm:$0xff] %v3634_v60 }
0x1048   : > { %5012 = shalt.err (!%p5009_p2)
}
0x1049   : > { %s5013_s30 = scalar_lea.hbm %s6304_s28, 1024  ;;  %s5017_s9 = scalar_lea.hbm %s6352_s4, 2048 }
0x104a   : > { %p5014_p13 = scmp.ne.s32.totalorder %s6304_s28, %s5013_s30  ;;  %p5018_p4 = scmp.lt.u32.totalorder %s6304_s28, %s6352_s4 }
0x104b   : > { %p5019_p7 = scmp.lt.u32.totalorder %s5017_s9, %s5013_s30  ;;  %p5021_p11 = scmp.lt.u32.totalorder %s5013_s30, %s6304_s28 }
0x104c   : > { %p5015_p6 = pnand %p5014_p13, %p6366_p0 }
0x104d   : > { %p5020_p8 = por %p5019_p7, %p5018_p4 }
0x104e   : > { %p5016_p10 = pneg %p5015_p6 }
0x104f   : > { %p5022_p1 = por %p5021_p11, %p5020_p8 }
0x1051   : > { %p5023_p3 = pnand %p5022_p1, %p5016_p10 }
0x1053   : > { %5026 = shalt.err (!%p5023_p3)
}
0x1054   : > { %s5087_s29 = smov 128   ;;  %s5088_s12 = smov 8  }
0x1055   : > { %4542 = dma.vmem_to_hbm [thread:$0]  (%p6366_p0), %s6299_s5, 1024, %s6304_s28, %s3646_s19, %s5087_s29, %s5087_s29, %s5088_s12  }
0x1056 PF: > { %s3674_s13 = sand.u32 1, %s5057_s15   ;;  %p6367_p5 = scmp.ne.s32.totalorder %s6357_s22, 0 }
0x1057   : > { %p6368_p9 = scmp.ge.s32.totalorder %s5069_s18, 2  ;;  %s3675_s24 = scalar_lea.sflag [#allocation4], %s3674_s13 }
0x1059   : > { %p4556_p12 = pnand %p6368_p9, %p6367_p5 }
0x105b   : > { %5052 = dma.done.wait (!%p4556_p12), %s3675_s24, 1024  }
0x105c   : > { %5054 = vsyncadd (!%p4556_p12), %s3675_s24, 4294966272  ;;  %p18_p2 = scmp.ge.s32.totalorder %s5227_s11, 4   ;;  %s6369_s15 = smov %s5061_s16 }
0x105d   : > { %s6370_s16 = smov %s5065_s17  ;;  %s6371_s17 = smov %s5236_s14 }
0x105e   : > { %s6372_s18 = smov %s5227_s11  ;;  %20 = sbr.rel (!%p18_p2) target bundleno = 6 (0x6), region = 89 }
0x1065   :  { %3680 = vsyncpa [#allocation3], 1 }
0x1066   :  { %3682 = vsyncpa [#allocation3 + $0x1], 1 }
0x1067   :  { %3683 = vsyncpa [#allocation6], 1 }
0x1068   :  { %3684 = vsyncpa [#allocation4], 1 }
0x1069   :  { %3686 = vsyncpa [#allocation4 + $0x1], 1 }

</bundles_post_ra>
